<compile_context>
chip_gen: v7x
topology: tpu7x:2x2x1
jax: 0.10.0
libtpu: 0.0.40
codegen_flags: <defaults>
</compile_context>

<pallas_src>
from functools import partial

import jax
import jax.numpy as jnp
from jax.experimental import pallas as pl
from jax.experimental.pallas import tpu as pltpu


# ---------------------------------------------------------------------------
# Kernel
# ---------------------------------------------------------------------------
def _amil_kernel(x_ref,
                 fc1_w_ref, fc1_b_ref,
                 ab_w_ref, ab_b_ref,
                 cw_ref, cb_ref,
                 h_ref, attn_ref, attn_ws_ref):
    """One grid step: TB bags x N instances.

    Per-step shapes:
      x_ref       (TB, N, L_in)  compute dtype
      fc1_w_ref   (L_in, L)      compute dtype
      fc1_b_ref   (1, L)
      ab_w_ref    (L, 2D)        fused [tanh | sigmoid] projection
      ab_b_ref    (1, 2D)
      cw_ref      (1, D)
      cb_ref      (1, 1)
      h_ref       (TB, L)   f32  attention-pooled bag features
      attn_ref    (TB, N)   f32  softmax attention
      attn_ws_ref (TB, N)   f32  pre-softmax attention scores
    """
    tb, n, l_in = x_ref.shape
    w_dtype = fc1_w_ref.dtype
    d = ab_w_ref.shape[1] // 2

    # Flatten (TB, N, L_in) -> (TB*N, L_in): one big M dimension for the MXU.
    x = x_ref[...].reshape(tb * n, l_in)

    # fc1: Linear + ReLU (Dropout == identity in eval mode).
    h1 = jnp.dot(x, fc1_w_ref[...], preferred_element_type=jnp.float32)
    h1 = jnp.maximum(h1 + fc1_b_ref[...].astype(jnp.float32), 0.0)
    # Single copy of the largest intermediate in the compute dtype; it feeds
    # both the gated-attention matmul and the weighted pooling (no-op in f32).
    h1 = h1.astype(w_dtype)                                           # (TB*N, L)
    l_hid = h1.shape[1]

    # Fused gated attention: [a | b] = h1 @ [Wa | Wb] + [ba | bb].
    pre = jnp.dot(h1, ab_w_ref[...], preferred_element_type=jnp.float32)
    pre = pre + ab_b_ref[...].astype(jnp.float32)                     # (TB*N, 2D)
    gated = jnp.tanh(pre[:, :d]) * jax.nn.sigmoid(pre[:, d:])         # (TB*N, D) f32

    # attention_c: Linear(D -> 1), activation=None.  VPU multiply + lane
    # reduction; scores land directly in (TB, N).
    gated3 = gated.reshape(tb, n, d)
    cw = cw_ref[...].astype(jnp.float32)                              # (1, D)
    a_ws = jnp.sum(gated3 * cw[None, :, :], axis=2)                   # (TB, N)
    a_ws = a_ws + cb_ref[...].astype(jnp.float32)

    # Per-bag softmax over the instance axis (f32).
    mx = jnp.max(a_ws, axis=1, keepdims=True)
    e = jnp.exp(a_ws - mx)
    attn = e / jnp.sum(e, axis=1, keepdims=True)                      # (TB, N) f32

    # Weighted pooling: VPU multiply + sublane reduce over the instance axis.
    # attn is f32, so the product/accumulation promote to f32 even when h1
    # is bf16.  (Replaces the degenerate M=1 / K=N batched matmul.)
    h1_r = h1.reshape(tb, n, l_hid)
    pooled = jnp.sum(attn[:, :, None] * h1_r, axis=1)                 # (TB, L) f32

    h_ref[...] = pooled.astype(h_ref.dtype)
    attn_ref[...] = attn.astype(attn_ref.dtype)
    attn_ws_ref[...] = a_ws.astype(attn_ws_ref.dtype)


# ---------------------------------------------------------------------------
# Wrapper
# ---------------------------------------------------------------------------
def prepare_params(params, compute_dtype=jnp.float32):
    """One-time weight preparation (hoisted out of the per-call forward):
    cast to the compute dtype and fuse the tanh/sigmoid projections into a
    single (L, 2D) weight.  Call once, reuse for every forward."""
    cast = lambda a: jnp.asarray(a, compute_dtype)
    return {
        "fc1_w": cast(params["fc1_w"]),                                  # (L_in, L)
        "fc1_b": cast(params["fc1_b"]).reshape(1, -1),                   # (1, L)
        "ab_w": jnp.concatenate([cast(params["aw"]), cast(params["bw"])], axis=1),
        "ab_b": jnp.concatenate(
            [cast(params["ab"]).reshape(1, -1), cast(params["bb"]).reshape(1, -1)],
            axis=1),                                                     # (1, 2D)
        "cw": cast(params["cw"]).reshape(1, -1),                         # (1, D)
        "cb": cast(params["cb"]).reshape(1, 1),                          # (1, 1)
        # Tiny classifier runs in plain f32 XLA on the pooled features.
        "clf_w": jnp.asarray(params["clf_w"], jnp.float32),
        "clf_b": jnp.asarray(params["clf_b"], jnp.float32).reshape(1, -1),
    }


def _round_up(v, m):
    return ((v + m - 1) // m) * m


def _choose_block(batch, block_bags):
    """Pick the per-step bag block TB and the padded batch size."""
    tb_req = max(8, _round_up(int(block_bags), 8))
    b8 = _round_up(batch, 8)
    if b8 <= max(tb_req, 256):
        # Small batch: whole (padded) batch in a single grid step.
        return b8, b8
    # Large batch: multiple "parallel" grid steps (keeps v7x's two
    # TensorCores busy) with TB*N rows (>= 256 by default) per MXU pass.
    return tb_req, _round_up(batch, tb_req)


def _amil_forward_impl(x, prep, block_bags):
    B, N, L_in = x.shape
    L = prep["fc1_w"].shape[1]
    compute_dtype = prep["fc1_w"].dtype

    tb, b_pad = _choose_block(B, block_bags)
    x_p = x.astype(compute_dtype)
    if b_pad != B:
        # Zero padding is benign: padded bags see a uniform softmax, produce
        # finite outputs, and are sliced away below.
        x_p = jnp.pad(x_p, ((0, b_pad - B), (0, 0), (0, 0)))

    weights = (prep["fc1_w"], prep["fc1_b"], prep["ab_w"], prep["ab_b"],
               prep["cw"], prep["cb"])

    def wspec(arr):
        nd = arr.ndim
        return pl.BlockSpec(arr.shape, lambda b, nd=nd: (0,) * nd)

    h_pad, attn_pad, attn_ws_pad = pl.pallas_call(
        _amil_kernel,
        out_shape=(
            jax.ShapeDtypeStruct((b_pad, L), jnp.float32),   # pooled bag features
            jax.ShapeDtypeStruct((b_pad, N), jnp.float32),   # softmax attention
            jax.ShapeDtypeStruct((b_pad, N), jnp.float32),   # pre-softmax scores
        ),
        grid_spec=pltpu.PrefetchScalarGridSpec(
            num_scalar_prefetch=0,
            grid=(b_pad // tb,),
            in_specs=[pl.BlockSpec((tb, N, L_in), lambda b: (b, 0, 0))]
                     + [wspec(w) for w in weights],
            out_specs=[
                pl.BlockSpec((tb, L), lambda b: (b, 0)),
                pl.BlockSpec((tb, N), lambda b: (b, 0)),
                pl.BlockSpec((tb, N), lambda b: (b, 0)),
            ],
        ),
        # At these sizes VMEM use is far below the 32 MiB scoped default on
        # every generation (incl. v7x's 64 MiB physical); no override needed.
        compiler_params=pltpu.CompilerParams(
            dimension_semantics=("parallel",)),
    )(x_p, *weights)

    h = h_pad[:B]
    attn = attn_pad[:B]
    attn_ws = attn_ws_pad[:B]

    # Classifier + class softmax + top-1 on the pooled features: tiny
    # (B, L) @ (L, C) — plain XLA, fused into this single jitted graph.
    logits = h @ prep["clf_w"] + prep["clf_b"]
    y_prob = jax.nn.softmax(logits, axis=1)
    y_hat = jnp.argmax(logits, axis=1, keepdims=True)   # torch.topk(logits, 1, dim=1)[1]

    return {
        "logits": logits,
        "y_hat": y_hat,
        "y_prob": y_prob,
        "h": h,
        "attention": attn,
        "attention_without_softmax": attn_ws,
    }


_amil_forward_jit = jax.jit(_amil_forward_impl, static_argnums=(2,))


def amil_forward(x, prep, *, block_bags=32):
    """Full AMIL forward (eval mode).  `prep` comes from prepare_params()."""
    if x.ndim == 2:          # AMIL treats a 2-D input as a single bag
        x = x[None]
    return _amil_forward_jit(x, prep, int(block_bags))


# ---------------------------------------------------------------------------
# Test harness
# ---------------------------------------------------------------------------
def make_params(key, L_in, L, D, C):
    # torch Linear default init: U(-1/sqrt(fan_in), +1/sqrt(fan_in))
    def linear(k, fin, fout):
        k1, k2 = jax.random.split(k)
        bound = 1.0 / (fin ** 0.5)
        w = jax.random.uniform(k1, (fin, fout), jnp.float32, -bound, bound)
        b = jax.random.uniform(k2, (1, fout), jnp.float32, -bound, bound)
        return w, b

    ks = jax.random.split(key, 5)
    fc1_w, fc1_b = linear(ks[0], L_in, L)
    aw, ab = linear(ks[1], L, D)
    bw, bb = linear(ks[2], L, D)
    cw, cb = linear(ks[3], D, 1)
    clf_w, clf_b = linear(ks[4], L, C)
    return dict(fc1_w=fc1_w, fc1_b=fc1_b, aw=aw, ab=ab, bw=bw, bb=bb,
                cw=cw, cb=cb, clf_w=clf_w, clf_b=clf_b)


def reference_forward(x, p):
    """Pure-JAX reference of the same forward (eval mode), full-f32 matmuls."""
    with jax.default_matmul_precision("float32"):
        h1 = jnp.maximum(jnp.einsum("bnl,lk->bnk", x, p["fc1_w"]) + p["fc1_b"], 0.0)
        a = jnp.tanh(jnp.einsum("bnl,ld->bnd", h1, p["aw"]) + p["ab"])
        b = jax.nn.sigmoid(jnp.einsum("bnl,ld->bnd", h1, p["bw"]) + p["bb"])
        a_ws = (jnp.einsum("bnd,do->bno", a * b, p["cw"]) + p["cb"])[..., 0]  # (B, N)
        A = jax.nn.softmax(a_ws, axis=1)
        h = jnp.einsum("bn,bnl->bl", A, h1)
        logits = h @ p["clf_w"] + p["clf_b"]
    return logits, jax.nn.softmax(logits, axis=1), h, A, a_ws


if __name__ == "__main__":
    # AMIL(size_arg='small', input_size=512, n_classes=2): sizes = [512, 512, 256]
    B, N, L_in, L, D, C = 12, 8, 512, 512, 256, 2

    key = jax.random.PRNGKey(0)
    kx, kp = jax.random.split(key)
    x = jax.random.normal(kx, (B, N, L_in), jnp.float32)
    params = make_params(kp, L_in, L, D, C)

    # f32 path: B=12 pads to 16 bags -> whole batch in one grid step
    # (128 rows streamed through each weight matrix).
    prep = prepare_params(params)
    res = amil_forward(x, prep)
    jax.block_until_ready(res)

    ref_logits, ref_prob, ref_h, ref_A, ref_Aws = reference_forward(x, params)
    assert res["logits"].shape == (B, C) and res["y_hat"].shape == (B, 1)
    assert res["attention"].shape == (B, N)
    # Tolerances cover MXU f32 multi-pass vs XLA-highest matmul differences.
    assert jnp.allclose(res["logits"], ref_logits, atol=2e-2, rtol=2e-2)
    assert jnp.allclose(res["y_prob"], ref_prob, atol=1e-2, rtol=1e-2)
    assert jnp.allclose(res["h"], ref_h, atol=2e-2, rtol=2e-2)
    assert jnp.allclose(res["attention"], ref_A, atol=1e-2, rtol=1e-2)
    assert jnp.allclose(res["attention_without_softmax"], ref_Aws, atol=2e-2, rtol=2e-2)

    # bf16 weights/activations (MXU-native on v5e/v6e/v7x); accumulation,
    # tanh/sigmoid and both softmaxes stay f32.  h1 is double-rounded
    # (f32 acc -> bf16 -> reuse), so ~1e-2 on attention / ~1e-1 on logits is
    # the expected accuracy of this mode.
    prep_bf16 = prepare_params(params, jnp.bfloat16)
    res_bf16 = amil_forward(x, prep_bf16)
    jax.block_until_ready(res_bf16)
    assert jnp.max(jnp.abs(res_bf16["attention"] - ref_A)) < 5e-2
    assert jnp.max(jnp.abs(res_bf16["logits"] - ref_logits)) < 2e-1

    print("KERNEL_OK")
</pallas_src>

<mosaic_0001>
module attributes {stable_mosaic.version = 11 : i64} {
  func.func @_amil_kernel(%arg0: i32, %arg1: memref<16x8x512xf32, #tpu.memory_space<vmem>>, %arg2: memref<512x512xf32, #tpu.memory_space<vmem>>, %arg3: memref<1x512xf32, #tpu.memory_space<vmem>>, %arg4: memref<512x512xf32, #tpu.memory_space<vmem>>, %arg5: memref<1x512xf32, #tpu.memory_space<vmem>>, %arg6: memref<1x256xf32, #tpu.memory_space<vmem>>, %arg7: memref<1x1xf32, #tpu.memory_space<vmem>>, %arg8: memref<16x512xf32, #tpu.memory_space<vmem>>, %arg9: memref<16x8xf32, #tpu.memory_space<vmem>>, %arg10: memref<16x8xf32, #tpu.memory_space<vmem>>) attributes {dimension_semantics = [#tpu.dimension_semantics<parallel>], iteration_bounds = array<i64: 1>, scalar_prefetch = 0 : i64, scratch_operands = 0 : i64, tpu.core_type = #tpu.core_type<tc>, window_params = [{transform_indices = @transform_0, window_bounds = array<i64: 16, 8, 512>}, {pipeline_mode = #tpu.pipeline_mode<synchronous>, transform_indices = @transform_1, window_bounds = array<i64: 512, 512>}, {pipeline_mode = #tpu.pipeline_mode<synchronous>, transform_indices = @transform_2, window_bounds = array<i64: 1, 512>}, {pipeline_mode = #tpu.pipeline_mode<synchronous>, transform_indices = @transform_3, window_bounds = array<i64: 512, 512>}, {pipeline_mode = #tpu.pipeline_mode<synchronous>, transform_indices = @transform_4, window_bounds = array<i64: 1, 512>}, {pipeline_mode = #tpu.pipeline_mode<synchronous>, transform_indices = @transform_5, window_bounds = array<i64: 1, 256>}, {pipeline_mode = #tpu.pipeline_mode<synchronous>, transform_indices = @transform_6, window_bounds = array<i64: 1, 1>}, {transform_indices = @transform_7, window_bounds = array<i64: 16, 512>}, {transform_indices = @transform_8, window_bounds = array<i64: 16, 8>}, {transform_indices = @transform_9, window_bounds = array<i64: 16, 8>}]} {
    %c0 = arith.constant 0 : index
    %c0_0 = arith.constant 0 : index
    %c0_1 = arith.constant 0 : index
    %0 = vector.load %arg1[%c0, %c0_0, %c0_1] : memref<16x8x512xf32, #tpu.memory_space<vmem>>, vector<16x8x512xf32>
    %1 = vector.shape_cast %0 : vector<16x8x512xf32> to vector<128x512xf32>
    %c0_2 = arith.constant 0 : index
    %c0_3 = arith.constant 0 : index
    %2 = vector.load %arg2[%c0_2, %c0_3] : memref<512x512xf32, #tpu.memory_space<vmem>>, vector<512x512xf32>
    %cst = arith.constant dense<0.000000e+00> : vector<128x512xf32>
    %3 = tpu.matmul %1, %2, %cst {dimension_numbers = #tpu.dot_dimension_numbers<[1], [0], [0], [1], [0, 0, 1, 1], [], []>} : vector<128x512xf32>, vector<512x512xf32>, vector<128x512xf32> -> vector<128x512xf32>
    %c0_4 = arith.constant 0 : index
    %c0_5 = arith.constant 0 : index
    %4 = vector.load %arg3[%c0_4, %c0_5] : memref<1x512xf32, #tpu.memory_space<vmem>>, vector<1x512xf32>
    %5 = vector.broadcast %4 : vector<1x512xf32> to vector<128x512xf32>
    %6 = arith.addf %3, %5 : vector<128x512xf32>
    %cst_6 = arith.constant 0.000000e+00 : f32
    %7 = vector.broadcast %cst_6 : f32 to vector<128x512xf32>
    %8 = arith.maximumf %6, %7 : vector<128x512xf32>
    %c0_7 = arith.constant 0 : index
    %c0_8 = arith.constant 0 : index
    %9 = vector.load %arg4[%c0_7, %c0_8] : memref<512x512xf32, #tpu.memory_space<vmem>>, vector<512x512xf32>
    %cst_9 = arith.constant dense<0.000000e+00> : vector<128x512xf32>
    %10 = tpu.matmul %8, %9, %cst_9 {dimension_numbers = #tpu.dot_dimension_numbers<[1], [0], [0], [1], [0, 0, 1, 1], [], []>} : vector<128x512xf32>, vector<512x512xf32>, vector<128x512xf32> -> vector<128x512xf32>
    %c0_10 = arith.constant 0 : index
    %c0_11 = arith.constant 0 : index
    %11 = vector.load %arg5[%c0_10, %c0_11] : memref<1x512xf32, #tpu.memory_space<vmem>>, vector<1x512xf32>
    %12 = vector.broadcast %11 : vector<1x512xf32> to vector<128x512xf32>
    %13 = arith.addf %10, %12 : vector<128x512xf32>
    %14 = vector.extract_strided_slice %13 {offsets = [0, 0], sizes = [128, 256], strides = [1, 1]} : vector<128x512xf32> to vector<128x256xf32>
    %15 = math.tanh %14 : vector<128x256xf32>
    %16 = vector.extract_strided_slice %13 {offsets = [0, 256], sizes = [128, 256], strides = [1, 1]} : vector<128x512xf32> to vector<128x256xf32>
    %17 = arith.negf %16 : vector<128x256xf32>
    %18 = math.exp %17 : vector<128x256xf32>
    %cst_12 = arith.constant 1.000000e+00 : f32
    %19 = vector.broadcast %cst_12 : f32 to vector<128x256xf32>
    %20 = arith.addf %19, %18 : vector<128x256xf32>
    %21 = arith.divf %19, %20 : vector<128x256xf32>
    %22 = arith.mulf %15, %21 : vector<128x256xf32>
    %23 = vector.shape_cast %22 : vector<128x256xf32> to vector<16x8x256xf32>
    %c0_13 = arith.constant 0 : index
    %c0_14 = arith.constant 0 : index
    %24 = vector.load %arg6[%c0_13, %c0_14] : memref<1x256xf32, #tpu.memory_space<vmem>>, vector<1x256xf32>
    %25 = vector.shape_cast %24 : vector<1x256xf32> to vector<1x1x256xf32>
    %26 = vector.broadcast %25 : vector<1x1x256xf32> to vector<16x8x256xf32>
    %27 = arith.mulf %23, %26 : vector<16x8x256xf32>
    %cst_15 = arith.constant dense<0.000000e+00> : vector<16x8xf32>
    %28 = vector.multi_reduction <add>, %27, %cst_15 [2] : vector<16x8x256xf32> to vector<16x8xf32>
    %c0_16 = arith.constant 0 : index
    %c0_17 = arith.constant 0 : index
    %29 = vector.load %arg7[%c0_16, %c0_17] : memref<1x1xf32, #tpu.memory_space<vmem>>, vector<1x1xf32>
    %30 = vector.broadcast %29 : vector<1x1xf32> to vector<16x8xf32>
    %31 = arith.addf %28, %30 : vector<16x8xf32>
    %cst_18 = arith.constant dense<0xFF800000> : vector<16xf32>
    %32 = vector.multi_reduction <maximumf>, %31, %cst_18 [1] : vector<16x8xf32> to vector<16xf32>
    %33 = vector.shape_cast %32 : vector<16xf32> to vector<16x1xf32>
    %34 = vector.broadcast %33 : vector<16x1xf32> to vector<16x8xf32>
    %35 = arith.subf %31, %34 : vector<16x8xf32>
    %36 = math.exp %35 : vector<16x8xf32>
    %cst_19 = arith.constant dense<0.000000e+00> : vector<16xf32>
    %37 = vector.multi_reduction <add>, %36, %cst_19 [1] : vector<16x8xf32> to vector<16xf32>
    %38 = vector.shape_cast %37 : vector<16xf32> to vector<16x1xf32>
    %39 = vector.broadcast %38 : vector<16x1xf32> to vector<16x8xf32>
    %40 = arith.divf %36, %39 : vector<16x8xf32>
    %41 = vector.shape_cast %8 : vector<128x512xf32> to vector<16x8x512xf32>
    %42 = vector.shape_cast %40 : vector<16x8xf32> to vector<16x8x1xf32>
    %43 = vector.broadcast %42 : vector<16x8x1xf32> to vector<16x8x512xf32>
    %44 = arith.mulf %43, %41 : vector<16x8x512xf32>
    %cst_20 = arith.constant dense<0.000000e+00> : vector<16x512xf32>
    %45 = vector.multi_reduction <add>, %44, %cst_20 [1] : vector<16x8x512xf32> to vector<16x512xf32>
    %c0_21 = arith.constant 0 : index
    %c0_22 = arith.constant 0 : index
    %46 = vector.load %arg8[%c0_21, %c0_22] : memref<16x512xf32, #tpu.memory_space<vmem>>, vector<16x512xf32>
    tpu.vector_store %arg8[%c0_21, %c0_22], %45 {strides = array<i32>} : memref<16x512xf32, #tpu.memory_space<vmem>>, vector<16x512xf32>,
    %c0_23 = arith.constant 0 : index
    %c0_24 = arith.constant 0 : index
    %47 = vector.load %arg9[%c0_23, %c0_24] : memref<16x8xf32, #tpu.memory_space<vmem>>, vector<16x8xf32>
    tpu.vector_store %arg9[%c0_23, %c0_24], %40 {strides = array<i32>} : memref<16x8xf32, #tpu.memory_space<vmem>>, vector<16x8xf32>,
    %c0_25 = arith.constant 0 : index
    %c0_26 = arith.constant 0 : index
    %48 = vector.load %arg10[%c0_25, %c0_26] : memref<16x8xf32, #tpu.memory_space<vmem>>, vector<16x8xf32>
    tpu.vector_store %arg10[%c0_25, %c0_26], %31 {strides = array<i32>} : memref<16x8xf32, #tpu.memory_space<vmem>>, vector<16x8xf32>,
    return
  }
  func.func @transform_0(%arg0: i32) -> (i32, i32, i32) {
    %c0_i32 = arith.constant 0 : i32
    %c0_i32_0 = arith.constant 0 : i32
    %c0_i32_1 = arith.constant 0 : i32
    return %arg0, %c0_i32, %c0_i32_0 : i32, i32, i32
  }
  func.func @transform_1(%arg0: i32) -> (i32, i32) {
    %c0_i32 = arith.constant 0 : i32
    %c0_i32_0 = arith.constant 0 : i32
    %c0_i32_1 = arith.constant 0 : i32
    return %c0_i32, %c0_i32_0 : i32, i32
  }
  func.func @transform_2(%arg0: i32) -> (i32, i32) {
    %c0_i32 = arith.constant 0 : i32
    %c0_i32_0 = arith.constant 0 : i32
    %c0_i32_1 = arith.constant 0 : i32
    return %c0_i32, %c0_i32_0 : i32, i32
  }
  func.func @transform_3(%arg0: i32) -> (i32, i32) {
    %c0_i32 = arith.constant 0 : i32
    %c0_i32_0 = arith.constant 0 : i32
    %c0_i32_1 = arith.constant 0 : i32
    return %c0_i32, %c0_i32_0 : i32, i32
  }
  func.func @transform_4(%arg0: i32) -> (i32, i32) {
    %c0_i32 = arith.constant 0 : i32
    %c0_i32_0 = arith.constant 0 : i32
    %c0_i32_1 = arith.constant 0 : i32
    return %c0_i32, %c0_i32_0 : i32, i32
  }
  func.func @transform_5(%arg0: i32) -> (i32, i32) {
    %c0_i32 = arith.constant 0 : i32
    %c0_i32_0 = arith.constant 0 : i32
    %c0_i32_1 = arith.constant 0 : i32
    return %c0_i32, %c0_i32_0 : i32, i32
  }
  func.func @transform_6(%arg0: i32) -> (i32, i32) {
    %c0_i32 = arith.constant 0 : i32
    %c0_i32_0 = arith.constant 0 : i32
    %c0_i32_1 = arith.constant 0 : i32
    return %c0_i32, %c0_i32_0 : i32, i32
  }
  func.func @transform_7(%arg0: i32) -> (i32, i32) {
    %c0_i32 = arith.constant 0 : i32
    %c0_i32_0 = arith.constant 0 : i32
    return %arg0, %c0_i32 : i32, i32
  }
  func.func @transform_8(%arg0: i32) -> (i32, i32) {
    %c0_i32 = arith.constant 0 : i32
    %c0_i32_0 = arith.constant 0 : i32
    return %arg0, %c0_i32 : i32, i32
  }
  func.func @transform_9(%arg0: i32) -> (i32, i32) {
    %c0_i32 = arith.constant 0 : i32
    %c0_i32_0 = arith.constant 0 : i32
    return %arg0, %c0_i32 : i32, i32
  }
}

</mosaic_0001>

<bundles_post_ra>
// kernel: _amil_forward_impl.1
= control target key start
LH: loop header
LB: loop body
LE: loop exit
PB: predicated region body
PF: predicated region fallthrough
CT: control target
= control target key end

     0   :  { %s6322_s0 = inlined_call_operand.vmem [shape: f32[16,8,512], index: 0, kind: input, shape index: {}]   ;;  %s6323_s1 = inlined_call_operand.hbm [shape: f32[512,512], index: 1, kind: input, shape index: {}]   ;;  %s6324_s2 = inlined_call_operand.vmem [shape: f32[1,512], index: 2, kind: input, shape index: {}]   ;;  %s6325_s3 = inlined_call_operand.hbm [shape: f32[512,512], index: 3, kind: input, shape index: {}]   ;;  %s6326_s4 = inlined_call_operand.vmem [shape: f32[1,512], index: 4, kind: input, shape index: {}]   ;;  %s6327_s5 = inlined_call_operand.vmem [shape: f32[1,256], index: 5, kind: input, shape index: {}]   ;;  %s6328_s6 = inlined_call_operand.<no memory space> [shape: f32[1,1], index: 6, kind: input, shape index: {}]   ;;  %s6329_s7 = inlined_call_operand.vmem [shape: f32[16,512], index: 7, kind: output, shape index: {0}]   ;;  %s6330_s8 = inlined_call_operand.vmem [shape: f32[16,8], index: 8, kind: output, shape index: {1}]   ;;  %s6331_s9 = inlined_call_operand.vmem [shape: f32[16,8], index: 9, kind: output, shape index: {2}]  }
   0x1   :  { %v15_v0 = vstv %s6328_s6 }
   0x2   :  { %16 = vst [vmem:[#allocation2] sm:$0x1] %v15_v0 }
   0x3   :  { %17 = vsyncpa [#allocation4], 0 }
   0x4   :  { %18 = vsyncpa [#allocation6], 0  ;;  %s4785_s11 = smov [#allocation3]   ;;  %s4737_s15 = scalar_lea.hbm %s6323_s1, 32768 }
   0x5   :  { %s26_s12 = sshll.u32 %s4785_s11, 4  ;;  %p4738_p0 = scmp.ne.s32.totalorder %s6323_s1, %s4737_s15  ;;  %s27_s12 = int_to_ptr.vmem [resolvable:$true] %s26_s12 }
   0x6   :  { %p4741_p1 = scmp.lt.u32.totalorder %s4737_s15, %s6323_s1 }
   0x8   :  { %p4743_p2 = pnand %p4741_p1, %p4738_p0 }
   0xa   :  { %4746 = shalt.err (!%p4743_p2)
}
   0xb   :  { %s4747_s6 = scalar_lea.vmem %s27_s12, 32768  ;;  %p4752_p4 = scmp.lt.s32.totalorder %s27_s12, %s27_s12 }
   0xc   :  { %p4748_p3 = scmp.ne.s32.totalorder %s27_s12, %s4747_s6  ;;  %p4753_p5 = scmp.lt.s32.totalorder %s4747_s6, %s4747_s6 }
   0xe   :  { %p4754_p6 = por %p4753_p5, %p4752_p4 }
  0x10   :  { %p4755_p7 = pnand %p4754_p6, %p4748_p3 }
  0x12   :  { %4758 = shalt.err (!%p4755_p7)
}
  0x13   :  { %s4786_s20 = smov 512   ;;  %s4787_s21 = smov 32  }
  0x14   :  { %32 = dma.hbm_to_vmem [thread:$0]  %s6323_s1, 32768, %s27_s12, [#allocation4], %s4786_s20, %s4786_s20, %s4787_s21  }
  0x15   :  { %s4788_s24 = smov [#allocation5]   ;;  %s4759_s28 = scalar_lea.hbm %s6325_s3, 32768 }
  0x16   :  { %s40_s25 = sshll.u32 %s4788_s24, 4  ;;  %p4760_p8 = scmp.ne.s32.totalorder %s6325_s3, %s4759_s28  ;;  %s41_s25 = int_to_ptr.vmem [resolvable:$true] %s40_s25 }
  0x17   :  { %p4763_p9 = scmp.lt.u32.totalorder %s4759_s28, %s6325_s3 }
  0x19   :  { %p4765_p10 = pnand %p4763_p9, %p4760_p8 }
  0x1b   :  { %4768 = shalt.err (!%p4765_p10)
}
  0x1c   :  { %s4769_s13 = scalar_lea.vmem %s41_s25, 32768  ;;  %p4774_p12 = scmp.lt.s32.totalorder %s41_s25, %s41_s25 }
  0x1d   :  { %p4770_p11 = scmp.ne.s32.totalorder %s41_s25, %s4769_s13  ;;  %p4775_p13 = scmp.lt.s32.totalorder %s4769_s13, %s4769_s13 }
  0x1f   :  { %p4776_p0 = por %p4775_p13, %p4774_p12 }
  0x21   :  { %p4777_p1 = pnand %p4776_p0, %p4770_p11 }
  0x23   :  { %4780 = shalt.err (!%p4777_p1)
}
  0x24   :  { %46 = dma.hbm_to_vmem [thread:$0]  %s6325_s3, 32768, %s41_s25, [#allocation6], %s4786_s20, %s4786_s20, %s4787_s21  }
  0x25   :  { %4781 = dma.done.wait [#allocation4], 32768  }
  0x26   :  { %4782 = vsyncadd [#allocation4], 4294934528 }
  0x27   :  { %4783 = dma.done.wait [#allocation6], 32768  }
  0x28   :  { %4784 = vsyncadd [#allocation6], 4294934528  ;;  %v124_v1 = vld [vmem:[#allocation3 + $0x8] sm:$0xff]  ;;  %v126_v3 = vld [vmem:[#allocation3 + $0x18] sm:$0xff]  ;;  %vm2487_vm0 = vcmask 1041409   ;;  %vm2489_vm1 = vcmask 1042434  }
  0x29   :  { %v128_v2 = vld [vmem:[#allocation3 + $0x28] sm:$0xff]  ;;  %v130_v5 = vld [vmem:[#allocation3 + $0x38] sm:$0xff]  ;;  %v123_v6 = vld [vmem:[#allocation3] sm:$0xff]  ;;  %vm2491_vm2 = vcmask 1043459   ;;  %vm2493_vm3 = vcmask 1044484   ;;  %vm2495_vm4 = vcmask 1045509  }
  0x2a   :  { %v3706_v4 = vpack.c.bf16 %v128_v2, %v124_v1  ;;  %v127_v7 = vld [vmem:[#allocation3 + $0x20] sm:$0xff]  ;;  %v3834_v8 = vpack.c.bf16 %v130_v5, %v126_v3  ;;  %v125_v10 = vld [vmem:[#allocation3 + $0x10] sm:$0xff]  ;;  %v132_v12 = vld [vmem:[#allocation3 + $0x48] sm:$0xff]  ;;  %vm2497_vm5 = vcmask 1046534   ;;  %vm2499_vm6 = vcmask 1047559  }
  0x2b   :  { %v3708_v9 = vpack.c.bf16 %v127_v7, %v123_v6  ;;  %v129_v11 = vld [vmem:[#allocation3 + $0x30] sm:$0xff]  ;;  %v136_v14 = vld [vmem:[#allocation3 + $0x68] sm:$0xff]  ;;  %v134_v15 = vld [vmem:[#allocation3 + $0x58] sm:$0xff]  ;;  %vm2510_vm7 = vcmask 64512  }
  0x2c   :  { %3707 = vmatprep.subr.bf16.mxu0 %v3706_v4  ;;  %v3836_v13 = vpack.c.bf16 %v129_v11, %v125_v10  ;;  %v138_v16 = vld [vmem:[#allocation3 + $0x78] sm:$0xff]  ;;  %3835 = vmatprep.subr.bf16.mxu1 %v3834_v8  ;;  %v3710_v17 = vpack.c.bf16 %v136_v14, %v132_v12  ;;  %v131_v19 = vld [vmem:[#allocation3 + $0x40] sm:$0xff]  ;;  %v133_v21 = vld [vmem:[#allocation3 + $0x50] sm:$0xff] }
  0x2d   :  { %3709 = vmatpush1.bf16.msra.mxu0 %v3708_v9  ;;  %v3838_v18 = vpack.c.bf16 %v138_v16, %v134_v15  ;;  %v135_v20 = vld [vmem:[#allocation3 + $0x60] sm:$0xff]  ;;  %v137_v23 = vld [vmem:[#allocation3 + $0x70] sm:$0xff]  ;;  %v140_v24 = vld [vmem:[#allocation3 + $0x88] sm:$0xff] }
  0x2e   :  { %3837 = vmatpush1.bf16.msra.mxu1 %v3836_v13  ;;  %v3712_v22 = vpack.c.bf16 %v135_v20, %v131_v19  ;;  %v144_v25 = vld [vmem:[#allocation3 + $0xa8] sm:$0xff]  ;;  %3711 = vmatprep.subr.bf16.mxu0 %v3710_v17  ;;  %v3840_v26 = vpack.c.bf16 %v137_v23, %v133_v21  ;;  %v142_v28 = vld [vmem:[#allocation3 + $0x98] sm:$0xff]  ;;  %v139_v30 = vld [vmem:[#allocation3 + $0x80] sm:$0xff] }
  0x2f   :  { %3839 = vmatprep.subr.bf16.mxu1 %v3838_v18  ;;  %v3714_v27 = vpack.c.bf16 %v144_v25, %v140_v24  ;;  %v146_v29 = vld [vmem:[#allocation3 + $0xb8] sm:$0xff]  ;;  %v143_v32 = vld [vmem:[#allocation3 + $0xa0] sm:$0xff]  ;;  %v141_v33 = vld [vmem:[#allocation3 + $0x90] sm:$0xff] }
  0x30   :  { %v3842_v31 = vpack.c.bf16 %v146_v29, %v142_v28  ;;  %v145_v34 = vld [vmem:[#allocation3 + $0xb0] sm:$0xff]  ;;  %v3716_v35 = vpack.c.bf16 %v143_v32, %v139_v30  ;;  %v148_v36 = vld [vmem:[#allocation3 + $0xc8] sm:$0xff]  ;;  %v150_v38 = vld [vmem:[#allocation3 + $0xd8] sm:$0xff] }
  0x31   :  { %3713 = vmatpush1.bf16.msra.mxu0 %v3712_v22  ;;  %v152_v37 = vld [vmem:[#allocation3 + $0xe8] sm:$0xff]  ;;  %v3844_v39 = vpack.c.bf16 %v145_v34, %v141_v33  ;;  %v154_v41 = vld [vmem:[#allocation3 + $0xf8] sm:$0xff]  ;;  %v147_v42 = vld [vmem:[#allocation3 + $0xc0] sm:$0xff] }
  0x32   :  { %3841 = vmatpush1.bf16.msra.mxu1 %v3840_v26  ;;  %3715 = vmatprep.subr.bf16.mxu0 %v3714_v27  ;;  %v3718_v40 = vpack.c.bf16 %v152_v37, %v148_v36  ;;  %v151_v43 = vld [vmem:[#allocation3 + $0xe0] sm:$0xff]  ;;  %v3846_v44 = vpack.c.bf16 %v154_v41, %v150_v38  ;;  %v149_v45 = vld [vmem:[#allocation3 + $0xd0] sm:$0xff]  ;;  %v156_v47 = vld [vmem:[#allocation3 + $0x108] sm:$0xff] }
  0x33   :  { %3843 = vmatprep.subr.bf16.mxu1 %v3842_v31  ;;  %v153_v46 = vld [vmem:[#allocation3 + $0xf0] sm:$0xff]  ;;  %v160_v48 = vld [vmem:[#allocation3 + $0x128] sm:$0xff]  ;;  %v158_v49 = vld [vmem:[#allocation3 + $0x118] sm:$0xff]  ;;  %v3720_v51 = vpack.c.bf16 %v151_v43, %v147_v42 }
  0x34   :  { %v162_v50 = vld [vmem:[#allocation3 + $0x138] sm:$0xff]  ;;  %v3848_v52 = vpack.c.bf16 %v153_v46, %v149_v45  ;;  %v3722_v53 = vpack.c.bf16 %v160_v48, %v156_v47  ;;  %v155_v54 = vld [vmem:[#allocation3 + $0x100] sm:$0xff]  ;;  %v157_v56 = vld [vmem:[#allocation3 + $0x110] sm:$0xff] }
  0x35   :  { %3717 = vmatpush1.bf16.msra.mxu0 %v3716_v35  ;;  %v159_v55 = vld [vmem:[#allocation3 + $0x120] sm:$0xff]  ;;  %v3850_v57 = vpack.c.bf16 %v162_v50, %v158_v49  ;;  %v161_v58 = vld [vmem:[#allocation3 + $0x130] sm:$0xff]  ;;  %v164_v59 = vld [vmem:[#allocation3 + $0x148] sm:$0xff] }
  0x36   :  { %3845 = vmatpush1.bf16.msra.mxu1 %v3844_v39  ;;  %3719 = vmatprep.subr.bf16.mxu0 %v3718_v40  ;;  %v168_v60 = vld [vmem:[#allocation3 + $0x168] sm:$0xff]  ;;  %v166_v61 = vld [vmem:[#allocation3 + $0x158] sm:$0xff]  ;;  %v3724_v63 = vpack.c.bf16 %v159_v55, %v155_v54  ;;  %v3852_v0 = vpack.c.bf16 %v161_v58, %v157_v56  ;;  %v163_v2 = vld [vmem:[#allocation3 + $0x140] sm:$0xff] }
  0x37   :  { %3847 = vmatprep.subr.bf16.mxu1 %v3846_v44  ;;  %v170_v62 = vld [vmem:[#allocation3 + $0x178] sm:$0xff]  ;;  %v3726_v1 = vpack.c.bf16 %v168_v60, %v164_v59  ;;  %v167_v3 = vld [vmem:[#allocation3 + $0x160] sm:$0xff]  ;;  %v165_v4 = vld [vmem:[#allocation3 + $0x150] sm:$0xff] }
  0x38   :  { %v3854_v5 = vpack.c.bf16 %v170_v62, %v166_v61  ;;  %v169_v6 = vld [vmem:[#allocation3 + $0x170] sm:$0xff]  ;;  %v172_v7 = vld [vmem:[#allocation3 + $0x188] sm:$0xff]  ;;  %v174_v9 = vld [vmem:[#allocation3 + $0x198] sm:$0xff]  ;;  %v3728_v11 = vpack.c.bf16 %v167_v3, %v163_v2 }
  0x39   :  { %3721 = vmatpush1.bf16.msra.mxu0 %v3720_v51  ;;  %v176_v8 = vld [vmem:[#allocation3 + $0x1a8] sm:$0xff]  ;;  %v178_v10 = vld [vmem:[#allocation3 + $0x1b8] sm:$0xff]  ;;  %v3856_v12 = vpack.c.bf16 %v169_v6, %v165_v4  ;;  %v171_v14 = vld [vmem:[#allocation3 + $0x180] sm:$0xff] }
  0x3a   :  { %3849 = vmatpush1.bf16.msra.mxu1 %v3848_v52  ;;  %3723 = vmatprep.subr.bf16.mxu0 %v3722_v53  ;;  %v3730_v13 = vpack.c.bf16 %v176_v8, %v172_v7  ;;  %v175_v15 = vld [vmem:[#allocation3 + $0x1a0] sm:$0xff]  ;;  %v173_v16 = vld [vmem:[#allocation3 + $0x190] sm:$0xff]  ;;  %v3858_v17 = vpack.c.bf16 %v178_v10, %v174_v9  ;;  %v180_v19 = vld [vmem:[#allocation3 + $0x1c8] sm:$0xff] }
  0x3b   :  { %3851 = vmatprep.subr.bf16.mxu1 %v3850_v57  ;;  %v177_v18 = vld [vmem:[#allocation3 + $0x1b0] sm:$0xff]  ;;  %v184_v20 = vld [vmem:[#allocation3 + $0x1e8] sm:$0xff]  ;;  %v182_v21 = vld [vmem:[#allocation3 + $0x1d8] sm:$0xff]  ;;  %v3732_v23 = vpack.c.bf16 %v175_v15, %v171_v14 }
  0x3c   :  { %v186_v22 = vld [vmem:[#allocation3 + $0x1f8] sm:$0xff]  ;;  %v3860_v24 = vpack.c.bf16 %v177_v18, %v173_v16  ;;  %v3734_v25 = vpack.c.bf16 %v184_v20, %v180_v19  ;;  %v179_v26 = vld [vmem:[#allocation3 + $0x1c0] sm:$0xff]  ;;  %v181_v28 = vld [vmem:[#allocation3 + $0x1d0] sm:$0xff] }
  0x3d   :  { %3725 = vmatpush1.bf16.msra.mxu0 %v3724_v63  ;;  %v183_v27 = vld [vmem:[#allocation3 + $0x1e0] sm:$0xff]  ;;  %v3862_v29 = vpack.c.bf16 %v186_v22, %v182_v21  ;;  %v185_v30 = vld [vmem:[#allocation3 + $0x1f0] sm:$0xff]  ;;  %v188_v31 = vld [vmem:[#allocation3 + $0x208] sm:$0xff] }
  0x3e   :  { %3853 = vmatpush1.bf16.msra.mxu1 %v3852_v0  ;;  %3727 = vmatprep.subr.bf16.mxu0 %v3726_v1  ;;  %v192_v32 = vld [vmem:[#allocation3 + $0x228] sm:$0xff]  ;;  %v190_v33 = vld [vmem:[#allocation3 + $0x218] sm:$0xff]  ;;  %v3736_v35 = vpack.c.bf16 %v183_v27, %v179_v26  ;;  %v3864_v36 = vpack.c.bf16 %v185_v30, %v181_v28  ;;  %v187_v38 = vld [vmem:[#allocation3 + $0x200] sm:$0xff] }
  0x3f   :  { %3855 = vmatprep.subr.bf16.mxu1 %v3854_v5  ;;  %v194_v34 = vld [vmem:[#allocation3 + $0x238] sm:$0xff]  ;;  %v3738_v37 = vpack.c.bf16 %v192_v32, %v188_v31  ;;  %v191_v39 = vld [vmem:[#allocation3 + $0x220] sm:$0xff]  ;;  %v189_v40 = vld [vmem:[#allocation3 + $0x210] sm:$0xff] }
  0x40   :  { %v3866_v41 = vpack.c.bf16 %v194_v34, %v190_v33  ;;  %v193_v42 = vld [vmem:[#allocation3 + $0x230] sm:$0xff]  ;;  %v196_v43 = vld [vmem:[#allocation3 + $0x248] sm:$0xff]  ;;  %v198_v45 = vld [vmem:[#allocation3 + $0x258] sm:$0xff]  ;;  %v3740_v47 = vpack.c.bf16 %v191_v39, %v187_v38 }
  0x41   :  { %3729 = vmatpush1.bf16.msra.mxu0 %v3728_v11  ;;  %v200_v44 = vld [vmem:[#allocation3 + $0x268] sm:$0xff]  ;;  %v202_v46 = vld [vmem:[#allocation3 + $0x278] sm:$0xff]  ;;  %v3868_v48 = vpack.c.bf16 %v193_v42, %v189_v40  ;;  %v195_v50 = vld [vmem:[#allocation3 + $0x240] sm:$0xff] }
  0x42   :  { %3857 = vmatpush1.bf16.msra.mxu1 %v3856_v12  ;;  %3731 = vmatprep.subr.bf16.mxu0 %v3730_v13  ;;  %v3742_v49 = vpack.c.bf16 %v200_v44, %v196_v43  ;;  %v199_v51 = vld [vmem:[#allocation3 + $0x260] sm:$0xff]  ;;  %v197_v52 = vld [vmem:[#allocation3 + $0x250] sm:$0xff]  ;;  %v3870_v53 = vpack.c.bf16 %v202_v46, %v198_v45  ;;  %v204_v55 = vld [vmem:[#allocation3 + $0x288] sm:$0xff] }
  0x43   :  { %3859 = vmatprep.subr.bf16.mxu1 %v3858_v17  ;;  %v201_v54 = vld [vmem:[#allocation3 + $0x270] sm:$0xff]  ;;  %v208_v56 = vld [vmem:[#allocation3 + $0x2a8] sm:$0xff]  ;;  %v206_v57 = vld [vmem:[#allocation3 + $0x298] sm:$0xff]  ;;  %v3744_v59 = vpack.c.bf16 %v199_v51, %v195_v50 }
  0x44   :  { %v210_v58 = vld [vmem:[#allocation3 + $0x2b8] sm:$0xff]  ;;  %v3872_v60 = vpack.c.bf16 %v201_v54, %v197_v52  ;;  %v3746_v61 = vpack.c.bf16 %v208_v56, %v204_v55  ;;  %v203_v62 = vld [vmem:[#allocation3 + $0x280] sm:$0xff]  ;;  %v205_v0 = vld [vmem:[#allocation3 + $0x290] sm:$0xff] }
  0x45   :  { %3733 = vmatpush1.bf16.msra.mxu0 %v3732_v23  ;;  %v207_v63 = vld [vmem:[#allocation3 + $0x2a0] sm:$0xff]  ;;  %v3874_v1 = vpack.c.bf16 %v210_v58, %v206_v57  ;;  %v209_v2 = vld [vmem:[#allocation3 + $0x2b0] sm:$0xff]  ;;  %v212_v3 = vld [vmem:[#allocation3 + $0x2c8] sm:$0xff] }
  0x46   :  { %3861 = vmatpush1.bf16.msra.mxu1 %v3860_v24  ;;  %3735 = vmatprep.subr.bf16.mxu0 %v3734_v25  ;;  %v216_v4 = vld [vmem:[#allocation3 + $0x2e8] sm:$0xff]  ;;  %v214_v5 = vld [vmem:[#allocation3 + $0x2d8] sm:$0xff]  ;;  %v3748_v7 = vpack.c.bf16 %v207_v63, %v203_v62  ;;  %v211_v8 = vld [vmem:[#allocation3 + $0x2c0] sm:$0xff]  ;;  %v3876_v9 = vpack.c.bf16 %v209_v2, %v205_v0 }
  0x47   :  { %3863 = vmatprep.subr.bf16.mxu1 %v3862_v29  ;;  %v218_v6 = vld [vmem:[#allocation3 + $0x2f8] sm:$0xff]  ;;  %v3750_v10 = vpack.c.bf16 %v216_v4, %v212_v3  ;;  %v215_v11 = vld [vmem:[#allocation3 + $0x2e0] sm:$0xff]  ;;  %v213_v12 = vld [vmem:[#allocation3 + $0x2d0] sm:$0xff] }
  0x48   :  { %v217_v13 = vld [vmem:[#allocation3 + $0x2f0] sm:$0xff]  ;;  %v3878_v14 = vpack.c.bf16 %v218_v6, %v214_v5  ;;  %v220_v15 = vld [vmem:[#allocation3 + $0x308] sm:$0xff]  ;;  %v222_v18 = vld [vmem:[#allocation3 + $0x318] sm:$0xff]  ;;  %v3752_v20 = vpack.c.bf16 %v215_v11, %v211_v8 }
  0x49   :  { %3737 = vmatpush1.bf16.msra.mxu0 %v3736_v35  ;;  %v224_v16 = vld [vmem:[#allocation3 + $0x328] sm:$0xff]  ;;  %v226_v19 = vld [vmem:[#allocation3 + $0x338] sm:$0xff]  ;;  %v3880_v21 = vpack.c.bf16 %v217_v13, %v213_v12  ;;  %v219_v23 = vld [vmem:[#allocation3 + $0x300] sm:$0xff] }
  0x4a   :  { %3865 = vmatpush1.bf16.msra.mxu1 %v3864_v36  ;;  %3739 = vmatprep.subr.bf16.mxu0 %v3738_v37  ;;  %v60_v17 = vld [vmem:[%s6322_s0 + $0x8] sm:$0xff]  ;;  %v3754_v22 = vpack.c.bf16 %v224_v16, %v220_v15  ;;  %v221_v25 = vld [vmem:[#allocation3 + $0x310] sm:$0xff]  ;;  %v3882_v26 = vpack.c.bf16 %v226_v19, %v222_v18  ;;  %v230_v30 = vld [vmem:[#allocation3 + $0x358] sm:$0xff] }
  0x4b   :  { %3867 = vmatprep.subr.bf16.mxu1 %v3866_v41  ;;  %465 = vmatprep.mubr.f32.mxu0 %v60_v17  ;;  %v223_v24 = vld [vmem:[#allocation3 + $0x320] sm:$0xff]  ;;  %v225_v27 = vld [vmem:[#allocation3 + $0x330] sm:$0xff]  ;;  %v228_v28 = vld [vmem:[#allocation3 + $0x348] sm:$0xff] }
  0x4c   :  { %787 = vmatprep.mubr.f32.mxu1 %v60_v17  ;;  %v232_v29 = vld [vmem:[#allocation3 + $0x368] sm:$0xff]  ;;  %v234_v31 = vld [vmem:[#allocation3 + $0x378] sm:$0xff]  ;;  %v3756_v32 = vpack.c.bf16 %v223_v24, %v219_v23  ;;  %v3884_v33 = vpack.c.bf16 %v225_v27, %v221_v25  ;;  %v227_v35 = vld [vmem:[#allocation3 + $0x340] sm:$0xff] }
  0x4d   :  { %3741 = vmatpush1.bf16.msra.mxu0 %v3740_v47  ;;  %v3758_v34 = vpack.c.bf16 %v232_v29, %v228_v28  ;;  %v231_v36 = vld [vmem:[#allocation3 + $0x360] sm:$0xff]  ;;  %v229_v37 = vld [vmem:[#allocation3 + $0x350] sm:$0xff]  ;;  %v3886_v38 = vpack.c.bf16 %v234_v31, %v230_v30  ;;  %v236_v40 = vld [vmem:[#allocation3 + $0x388] sm:$0xff] }
  0x4e   :  { %3869 = vmatpush1.bf16.msra.mxu1 %v3868_v48  ;;  %3743 = vmatprep.subr.bf16.mxu0 %v3742_v49  ;;  %v233_v39 = vld [vmem:[#allocation3 + $0x370] sm:$0xff]  ;;  %v240_v41 = vld [vmem:[#allocation3 + $0x3a8] sm:$0xff]  ;;  %v238_v42 = vld [vmem:[#allocation3 + $0x398] sm:$0xff]  ;;  %v3760_v44 = vpack.c.bf16 %v231_v36, %v227_v35 }
  0x4f   :  { %3871 = vmatprep.subr.bf16.mxu1 %v3870_v53  ;;  %v242_v43 = vld [vmem:[#allocation3 + $0x3b8] sm:$0xff]  ;;  %v3888_v45 = vpack.c.bf16 %v233_v39, %v229_v37  ;;  %v3762_v46 = vpack.c.bf16 %v240_v41, %v236_v40  ;;  %v235_v47 = vld [vmem:[#allocation3 + $0x380] sm:$0xff]  ;;  %v237_v49 = vld [vmem:[#allocation3 + $0x390] sm:$0xff] }
  0x50   :  { %v239_v48 = vld [vmem:[#allocation3 + $0x3a0] sm:$0xff]  ;;  %v3890_v50 = vpack.c.bf16 %v242_v43, %v238_v42  ;;  %v241_v51 = vld [vmem:[#allocation3 + $0x3b0] sm:$0xff]  ;;  %v244_v52 = vld [vmem:[#allocation3 + $0x3c8] sm:$0xff] }
  0x51   :  { %3745 = vmatpush1.bf16.msra.mxu0 %v3744_v59  ;;  %v248_v53 = vld [vmem:[#allocation3 + $0x3e8] sm:$0xff]  ;;  %v246_v54 = vld [vmem:[#allocation3 + $0x3d8] sm:$0xff]  ;;  %v3764_v56 = vpack.c.bf16 %v239_v48, %v235_v47  ;;  %v3892_v57 = vpack.c.bf16 %v241_v51, %v237_v49  ;;  %v243_v59 = vld [vmem:[#allocation3 + $0x3c0] sm:$0xff] }
  0x52   :  { %3873 = vmatpush1.bf16.msra.mxu1 %v3872_v60  ;;  %3747 = vmatprep.subr.bf16.mxu0 %v3746_v61  ;;  %v250_v55 = vld [vmem:[#allocation3 + $0x3f8] sm:$0xff]  ;;  %v3766_v58 = vpack.c.bf16 %v248_v53, %v244_v52  ;;  %v247_v60 = vld [vmem:[#allocation3 + $0x3e0] sm:$0xff]  ;;  %v245_v61 = vld [vmem:[#allocation3 + $0x3d0] sm:$0xff] }
  0x53   :  { %3875 = vmatprep.subr.bf16.mxu1 %v3874_v1  ;;  %v3894_v62 = vpack.c.bf16 %v250_v55, %v246_v54  ;;  %v249_v63 = vld [vmem:[#allocation3 + $0x3f0] sm:$0xff]  ;;  %v252_v0 = vld [vmem:[#allocation3 + $0x408] sm:$0xff]  ;;  %v254_v2 = vld [vmem:[#allocation3 + $0x418] sm:$0xff]  ;;  %v3768_v4 = vpack.c.bf16 %v247_v60, %v243_v59 }
  0x54   :  { %v256_v1 = vld [vmem:[#allocation3 + $0x428] sm:$0xff]  ;;  %v258_v3 = vld [vmem:[#allocation3 + $0x438] sm:$0xff]  ;;  %v3896_v5 = vpack.c.bf16 %v249_v63, %v245_v61  ;;  %v255_v8 = vld [vmem:[#allocation3 + $0x420] sm:$0xff] }
  0x55   :  { %3749 = vmatpush1.bf16.msra.mxu0 %v3748_v7  ;;  %v3770_v6 = vpack.c.bf16 %v256_v1, %v252_v0  ;;  %v251_v7 = vld [vmem:[#allocation3 + $0x400] sm:$0xff]  ;;  %v257_v11 = vld [vmem:[#allocation3 + $0x430] sm:$0xff]  ;;  %v260_v12 = vld [vmem:[#allocation3 + $0x448] sm:$0xff] }
  0x56   :  { %3877 = vmatpush1.bf16.msra.mxu1 %v3876_v9  ;;  %3751 = vmatprep.subr.bf16.mxu0 %v3750_v10  ;;  %v3898_v9 = vpack.c.bf16 %v258_v3, %v254_v2  ;;  %v253_v10 = vld [vmem:[#allocation3 + $0x410] sm:$0xff]  ;;  %v264_v13 = vld [vmem:[#allocation3 + $0x468] sm:$0xff]  ;;  %v3772_v15 = vpack.c.bf16 %v255_v8, %v251_v7  ;;  %v262_v16 = vld [vmem:[#allocation3 + $0x458] sm:$0xff] }
  0x57   :  { %3879 = vmatprep.subr.bf16.mxu1 %v3878_v14  ;;  %v59_v14 = vld [vmem:[%s6322_s0] sm:$0xff]  ;;  %v3900_v18 = vpack.c.bf16 %v257_v11, %v253_v10  ;;  %v261_v23 = vld [vmem:[#allocation3 + $0x450] sm:$0xff]  ;;  %v272_v27 = vld [vmem:[#allocation3 + $0x4a8] sm:$0xff] }
  0x58   :  { %v266_v17 = vld [vmem:[#allocation3 + $0x478] sm:$0xff]  ;;  %v259_v19 = vld [vmem:[#allocation3 + $0x440] sm:$0xff]  ;;  %v265_v24 = vld [vmem:[#allocation3 + $0x470] sm:$0xff] }
  0x59   :  { %3753 = vmatpush1.bf16.msra.mxu0 %v3752_v20  ;;  %v263_v20 = vld [vmem:[#allocation3 + $0x460] sm:$0xff]  ;;  %v3902_v25 = vpack.c.bf16 %v266_v17, %v262_v16  ;;  %v270_v30 = vld [vmem:[#allocation3 + $0x498] sm:$0xff]  ;;  %v269_v37 = vld [vmem:[#allocation3 + $0x490] sm:$0xff] }
  0x5a   :  { %3881 = vmatpush1.bf16.msra.mxu1 %v3880_v21  ;;  %3755 = vmatprep.subr.bf16.mxu0 %v3754_v22  ;;  %v64_v21 = vld [vmem:[%s6322_s0 + $0x28] sm:$0xff]  ;;  %v3774_v22 = vpack.c.bf16 %v264_v13, %v260_v12  ;;  %v63_v28 = vld [vmem:[%s6322_s0 + $0x20] sm:$0xff]  ;;  %v3776_v29 = vpack.c.bf16 %v263_v20, %v259_v19  ;;  %v277_v51 = vld [vmem:[#allocation3 + $0x4d0] sm:$0xff] }
  0x5b   :  { %3883 = vmatprep.subr.bf16.mxu1 %v3882_v26  ;;  %v268_v26 = vld [vmem:[#allocation3 + $0x488] sm:$0xff]  ;;  %v274_v31 = vld [vmem:[#allocation3 + $0x4b8] sm:$0xff]  ;;  %v275_v47 = vld [vmem:[#allocation3 + $0x4c0] sm:$0xff] }
  0x5c   :  { %v68_v35 = vld [vmem:[%s6322_s0 + $0x48] sm:$0xff]  ;;  %v3778_v36 = vpack.c.bf16 %v272_v27, %v268_v26  ;;  %v3906_v39 = vpack.c.bf16 %v274_v31, %v270_v30  ;;  %v67_v42 = vld [vmem:[%s6322_s0 + $0x40] sm:$0xff]  ;;  %v281_v52 = vld [vmem:[#allocation3 + $0x4f0] sm:$0xff] }
  0x5d   :  { %3757 = vmatpush1.bf16.msra.mxu0 %v3756_v32  ;;  %v3904_v32 = vpack.c.bf16 %v265_v24, %v261_v23  ;;  %v276_v40 = vld [vmem:[#allocation3 + $0x4c8] sm:$0xff]  ;;  %v279_v48 = vld [vmem:[#allocation3 + $0x4e0] sm:$0xff]  ;;  %v290_v59 = vld [vmem:[#allocation3 + $0x538] sm:$0xff]  ;;  %v3912_v60 = vpack.c.bf16 %v281_v52, %v277_v51 }
  0x5e   :  { %3885 = vmatpush1.bf16.msra.mxu1 %v3884_v33  ;;  %3759 = vmatprep.subr.bf16.mxu0 %v3758_v34  ;;  %v267_v33 = vld [vmem:[#allocation3 + $0x480] sm:$0xff]  ;;  %v280_v41 = vld [vmem:[#allocation3 + $0x4e8] sm:$0xff]  ;;  %v285_v1 = vld [vmem:[#allocation3 + $0x510] sm:$0xff] }
  0x5f   :  { %3887 = vmatprep.subr.bf16.mxu1 %v3886_v38  ;;  %v271_v34 = vld [vmem:[#allocation3 + $0x4a0] sm:$0xff]  ;;  %v273_v38 = vld [vmem:[#allocation3 + $0x4b0] sm:$0xff]  ;;  %v284_v54 = vld [vmem:[#allocation3 + $0x508] sm:$0xff] }
  0x60   :  { %v3780_v43 = vpack.c.bf16 %v271_v34, %v267_v33  ;;  %v72_v49 = vld [vmem:[%s6322_s0 + $0x68] sm:$0xff]  ;;  %v289_v2 = vld [vmem:[#allocation3 + $0x530] sm:$0xff]  ;;  %v294_v8 = vld [vmem:[#allocation3 + $0x558] sm:$0xff] }
  0x61   :  { %3761 = vmatpush1.bf16.msra.mxu0 %v3760_v44  ;;  %v278_v44 = vld [vmem:[#allocation3 + $0x4d8] sm:$0xff]  ;;  %v288_v55 = vld [vmem:[#allocation3 + $0x528] sm:$0xff]  ;;  %v283_v61 = vld [vmem:[#allocation3 + $0x500] sm:$0xff]  ;;  %v3916_v10 = vpack.c.bf16 %v289_v2, %v285_v1 }
  0x62   :  { %3889 = vmatpush1.bf16.msra.mxu1 %v3888_v45  ;;  %3763 = vmatprep.subr.bf16.mxu0 %v3762_v46  ;;  %v282_v45 = vld [vmem:[#allocation3 + $0x4f8] sm:$0xff]  ;;  %v3908_v46 = vpack.c.bf16 %v273_v38, %v269_v37  ;;  %v76_v63 = vld [vmem:[%s6322_s0 + $0x88] sm:$0xff]  ;;  %v3786_v0 = vpack.c.bf16 %v288_v55, %v284_v54  ;;  %v297_v16 = vld [vmem:[#allocation3 + $0x570] sm:$0xff] }
  0x63   :  { %3891 = vmatprep.subr.bf16.mxu1 %v3890_v50  ;;  %v3782_v50 = vpack.c.bf16 %v280_v41, %v276_v40  ;;  %v3910_v53 = vpack.c.bf16 %v282_v45, %v278_v44  ;;  %v291_v11 = vld [vmem:[#allocation3 + $0x540] sm:$0xff]  ;;  %v304_v19 = vld [vmem:[#allocation3 + $0x5a8] sm:$0xff]  ;;  %v306_v23 = vld [vmem:[#allocation3 + $0x5b8] sm:$0xff] }
  0x64   :  { %v295_v12 = vld [vmem:[#allocation3 + $0x560] sm:$0xff]  ;;  %v305_v30 = vld [vmem:[#allocation3 + $0x5b0] sm:$0xff]  ;;  %v312_v33 = vld [vmem:[#allocation3 + $0x5e8] sm:$0xff] }
  0x65   :  { %3765 = vmatpush1.bf16.msra.mxu0 %v3764_v56  ;;  %v71_v56 = vld [vmem:[%s6322_s0 + $0x60] sm:$0xff]  ;;  %v80_v13 = vld [vmem:[%s6322_s0 + $0xa8] sm:$0xff]  ;;  %v313_v44 = vld [vmem:[#allocation3 + $0x5f0] sm:$0xff] }
  0x66   :  { %3893 = vmatpush1.bf16.msra.mxu1 %v3892_v57  ;;  %3767 = vmatprep.subr.bf16.mxu0 %v3766_v58  ;;  %v3784_v57 = vpack.c.bf16 %v279_v48, %v275_v47  ;;  %v286_v58 = vld [vmem:[#allocation3 + $0x518] sm:$0xff]  ;;  %v303_v26 = vld [vmem:[#allocation3 + $0x5a0] sm:$0xff]  ;;  %v320_v47 = vld [vmem:[#allocation3 + $0x628] sm:$0xff] }
  0x67   :  { %3895 = vmatprep.subr.bf16.mxu1 %v3894_v62  ;;  %v287_v62 = vld [vmem:[#allocation3 + $0x520] sm:$0xff]  ;;  %v3914_v3 = vpack.c.bf16 %v290_v59, %v286_v58  ;;  %v314_v37 = vld [vmem:[#allocation3 + $0x5f8] sm:$0xff]  ;;  %v321_v58 = vld [vmem:[#allocation3 + $0x630] sm:$0xff] }
  0x68   :  { %v3788_v7 = vpack.c.bf16 %v287_v62, %v283_v61  ;;  %v79_v20 = vld [vmem:[%s6322_s0 + $0xa0] sm:$0xff]  ;;  %v84_v27 = vld [vmem:[%s6322_s0 + $0xc8] sm:$0xff] }
  0x69   :  { %3769 = vmatpush1.bf16.msra.mxu0 %v3768_v4  ;;  %v292_v4 = vld [vmem:[#allocation3 + $0x548] sm:$0xff]  ;;  %v83_v34 = vld [vmem:[%s6322_s0 + $0xc0] sm:$0xff] }
  0x6a   :  { %3897 = vmatpush1.bf16.msra.mxu1 %v3896_v5  ;;  %3771 = vmatprep.subr.bf16.mxu0 %v3770_v6  ;;  %v296_v5 = vld [vmem:[#allocation3 + $0x568] sm:$0xff]  ;;  %v75_v6 = vld [vmem:[%s6322_s0 + $0x80] sm:$0xff] }
  0x6b   :  { %3899 = vmatprep.subr.bf16.mxu1 %v3898_v9  ;;  %v298_v9 = vld [vmem:[#allocation3 + $0x578] sm:$0xff]  ;;  %v311_v40 = vld [vmem:[#allocation3 + $0x5e0] sm:$0xff]  ;;  %v328_v61 = vld [vmem:[#allocation3 + $0x668] sm:$0xff] }
  0x6c   :  { %466 = vmatmul.mubr.f32.vlgmr.msra.gmra.mrb[0].mxu0 %v59_v14  ;;  %v3918_v17 = vpack.c.bf16 %v298_v9, %v294_v8  ;;  %v88_v41 = vld [vmem:[%s6322_s0 + $0xe8] sm:$0xff]  ;;  %v87_v48 = vld [vmem:[%s6322_s0 + $0xe0] sm:$0xff]  ;;  %v329_v8 = vld [vmem:[#allocation3 + $0x670] sm:$0xff] }
  0x6d   :  { %788 = vmatmul.mubr.f32.vlgmr.msra.gmra.mrb[0].mxu1 %v59_v14  ;;  %3773 = vmatpush1.bf16.msra.mxu0 %v3772_v15  ;;  %v3790_v14 = vpack.c.bf16 %v296_v5, %v292_v4  ;;  %v293_v15 = vld [vmem:[#allocation3 + $0x550] sm:$0xff]  ;;  %v322_v51 = vld [vmem:[#allocation3 + $0x638] sm:$0xff]  ;;  %v319_v54 = vld [vmem:[#allocation3 + $0x620] sm:$0xff] }
  0x6e   :  { %3901 = vmatpush1.bf16.msra.mxu1 %v3900_v18  ;;  %471 = vmatprep.mubr.f32.mxu0 %v64_v21  ;;  %v300_v18 = vld [vmem:[#allocation3 + $0x588] sm:$0xff]  ;;  %v3920_v24 = vpack.c.bf16 %v297_v16, %v293_v15  ;;  %v91_v62 = vld [vmem:[%s6322_s0 + $0x100] sm:$0xff] }
  0x6f   :  { %793 = vmatprep.mubr.f32.mxu1 %v64_v21  ;;  %3775 = vmatprep.subr.bf16.mxu0 %v3774_v22  ;;  %v3792_v21 = vpack.c.bf16 %v295_v12, %v291_v11  ;;  %v302_v22 = vld [vmem:[#allocation3 + $0x598] sm:$0xff]  ;;  %v92_v55 = vld [vmem:[%s6322_s0 + $0x108] sm:$0xff] }
  0x70   :  { %472 = vmatmul.mubr.f32.gmra.mrb[2].mxu0 %v63_v28  ;;  %3903 = vmatprep.subr.bf16.mxu1 %v3902_v25  ;;  %v299_v25 = vld [vmem:[#allocation3 + $0x580] sm:$0xff]  ;;  %v3922_v31 = vpack.c.bf16 %v306_v23, %v302_v22  ;;  %v330_v1 = vld [vmem:[#allocation3 + $0x678] sm:$0xff]  ;;  %v336_v11 = vld [vmem:[#allocation3 + $0x6a8] sm:$0xff] }
  0x71   :  { %794 = vmatmul.mubr.f32.gmra.mrb[2].mxu1 %v63_v28  ;;  %3777 = vmatpush1.bf16.msra.mxu0 %v3776_v29  ;;  %v3794_v28 = vpack.c.bf16 %v304_v19, %v300_v18  ;;  %v301_v29 = vld [vmem:[#allocation3 + $0x590] sm:$0xff]  ;;  %v327_v4 = vld [vmem:[#allocation3 + $0x660] sm:$0xff]  ;;  %v338_v15 = vld [vmem:[#allocation3 + $0x6b8] sm:$0xff] }
  0x72   :  { %3905 = vmatpush1.bf16.msra.mxu1 %v3904_v32  ;;  %477 = vmatprep.mubr.f32.mxu0 %v68_v35  ;;  %v308_v32 = vld [vmem:[#allocation3 + $0x5c8] sm:$0xff]  ;;  %v3924_v38 = vpack.c.bf16 %v305_v30, %v301_v29  ;;  %v95_v12 = vld [vmem:[%s6322_s0 + $0x120] sm:$0xff]  ;;  %v337_v22 = vld [vmem:[#allocation3 + $0x6b0] sm:$0xff] }
  0x73   :  { %799 = vmatprep.mubr.f32.mxu1 %v68_v35  ;;  %3779 = vmatprep.subr.bf16.mxu0 %v3778_v36  ;;  %v3796_v35 = vpack.c.bf16 %v303_v26, %v299_v25  ;;  %v310_v36 = vld [vmem:[#allocation3 + $0x5d8] sm:$0xff]  ;;  %v96_v5 = vld [vmem:[%s6322_s0 + $0x128] sm:$0xff] }
  0x74   :  { %478 = vmatmul.mubr.f32.gmra.mrb[4].mxu0 %v67_v42  ;;  %3907 = vmatprep.subr.bf16.mxu1 %v3906_v39  ;;  %v307_v39 = vld [vmem:[#allocation3 + $0x5c0] sm:$0xff]  ;;  %v3926_v45 = vpack.c.bf16 %v314_v37, %v310_v36  ;;  %v344_v25 = vld [vmem:[#allocation3 + $0x6e8] sm:$0xff]  ;;  %v346_v29 = vld [vmem:[#allocation3 + $0x6f8] sm:$0xff] }
  0x75   :  { %800 = vmatmul.mubr.f32.gmra.mrb[4].mxu1 %v67_v42  ;;  %3781 = vmatpush1.bf16.msra.mxu0 %v3780_v43  ;;  %v3798_v42 = vpack.c.bf16 %v312_v33, %v308_v32  ;;  %v309_v43 = vld [vmem:[#allocation3 + $0x5d0] sm:$0xff]  ;;  %v335_v18 = vld [vmem:[#allocation3 + $0x6a0] sm:$0xff] }
  0x76   :  { %3909 = vmatpush1.bf16.msra.mxu1 %v3908_v46  ;;  %483 = vmatprep.mubr.f32.mxu0 %v72_v49  ;;  %v316_v46 = vld [vmem:[#allocation3 + $0x608] sm:$0xff]  ;;  %v3928_v52 = vpack.c.bf16 %v313_v44, %v309_v43  ;;  %v99_v26 = vld [vmem:[%s6322_s0 + $0x140] sm:$0xff]  ;;  %v345_v36 = vld [vmem:[#allocation3 + $0x6f0] sm:$0xff] }
  0x77   :  { %805 = vmatprep.mubr.f32.mxu1 %v72_v49  ;;  %3783 = vmatprep.subr.bf16.mxu0 %v3782_v50  ;;  %v3800_v49 = vpack.c.bf16 %v311_v40, %v307_v39  ;;  %v318_v50 = vld [vmem:[#allocation3 + $0x618] sm:$0xff]  ;;  %v100_v19 = vld [vmem:[%s6322_s0 + $0x148] sm:$0xff] }
  0x78   :  { %484 = vmatmul.mubr.f32.gmra.mrb[6].mxu0 %v71_v56  ;;  %3911 = vmatprep.subr.bf16.mxu1 %v3910_v53  ;;  %v315_v53 = vld [vmem:[#allocation3 + $0x600] sm:$0xff]  ;;  %v3930_v59 = vpack.c.bf16 %v322_v51, %v318_v50  ;;  %v352_v39 = vld [vmem:[#allocation3 + $0x728] sm:$0xff]  ;;  %v354_v43 = vld [vmem:[#allocation3 + $0x738] sm:$0xff] }
  0x79   :  { %806 = vmatmul.mubr.f32.gmra.mrb[6].mxu1 %v71_v56  ;;  %3785 = vmatpush1.bf16.msra.mxu0 %v3784_v57  ;;  %v3802_v56 = vpack.c.bf16 %v320_v47, %v316_v46  ;;  %v317_v57 = vld [vmem:[#allocation3 + $0x610] sm:$0xff]  ;;  %v343_v32 = vld [vmem:[#allocation3 + $0x6e0] sm:$0xff] }
  0x7a   :  { %3913 = vmatpush1.bf16.msra.mxu1 %v3912_v60  ;;  %489 = vmatprep.mubr.f32.mxu0 %v76_v63  ;;  %v324_v60 = vld [vmem:[#allocation3 + $0x648] sm:$0xff]  ;;  %v3932_v2 = vpack.c.bf16 %v321_v58, %v317_v57  ;;  %v103_v40 = vld [vmem:[%s6322_s0 + $0x160] sm:$0xff]  ;;  %v353_v50 = vld [vmem:[#allocation3 + $0x730] sm:$0xff] }
  0x7b   :  { %811 = vmatprep.mubr.f32.mxu1 %v76_v63  ;;  %3787 = vmatprep.subr.bf16.mxu0 %v3786_v0  ;;  %v3804_v63 = vpack.c.bf16 %v319_v54, %v315_v53  ;;  %v326_v0 = vld [vmem:[#allocation3 + $0x658] sm:$0xff]  ;;  %v104_v33 = vld [vmem:[%s6322_s0 + $0x168] sm:$0xff] }
  0x7c   :  { %490 = vmatmul.mubr.f32.gmra.mrb[8].mxu0 %v75_v6  ;;  %3915 = vmatprep.subr.bf16.mxu1 %v3914_v3  ;;  %v323_v3 = vld [vmem:[#allocation3 + $0x640] sm:$0xff]  ;;  %v3934_v9 = vpack.c.bf16 %v330_v1, %v326_v0  ;;  %v360_v53 = vld [vmem:[#allocation3 + $0x768] sm:$0xff]  ;;  %v362_v57 = vld [vmem:[#allocation3 + $0x778] sm:$0xff] }
  0x7d   :  { %812 = vmatmul.mubr.f32.gmra.mrb[8].mxu1 %v75_v6  ;;  %3789 = vmatpush1.bf16.msra.mxu0 %v3788_v7  ;;  %v3806_v6 = vpack.c.bf16 %v328_v61, %v324_v60  ;;  %v325_v7 = vld [vmem:[#allocation3 + $0x650] sm:$0xff]  ;;  %v351_v46 = vld [vmem:[#allocation3 + $0x720] sm:$0xff] }
  0x7e   :  { %3917 = vmatpush1.bf16.msra.mxu1 %v3916_v10  ;;  %495 = vmatprep.mubr.f32.mxu0 %v80_v13  ;;  %v332_v10 = vld [vmem:[#allocation3 + $0x688] sm:$0xff]  ;;  %v3936_v16 = vpack.c.bf16 %v329_v8, %v325_v7  ;;  %v107_v54 = vld [vmem:[%s6322_s0 + $0x180] sm:$0xff]  ;;  %v361_v0 = vld [vmem:[#allocation3 + $0x770] sm:$0xff] }
  0x7f   :  { %817 = vmatprep.mubr.f32.mxu1 %v80_v13  ;;  %3791 = vmatprep.subr.bf16.mxu0 %v3790_v14  ;;  %v3808_v13 = vpack.c.bf16 %v327_v4, %v323_v3  ;;  %v334_v14 = vld [vmem:[#allocation3 + $0x698] sm:$0xff]  ;;  %v108_v47 = vld [vmem:[%s6322_s0 + $0x188] sm:$0xff] }
  0x80   :  { %496 = vmatmul.mubr.f32.gmra.mrb[10].mxu0 %v79_v20  ;;  %3919 = vmatprep.subr.bf16.mxu1 %v3918_v17  ;;  %v331_v17 = vld [vmem:[#allocation3 + $0x680] sm:$0xff]  ;;  %v3938_v23 = vpack.c.bf16 %v338_v15, %v334_v14  ;;  %v368_v3 = vld [vmem:[#allocation3 + $0x7a8] sm:$0xff]  ;;  %v370_v7 = vld [vmem:[#allocation3 + $0x7b8] sm:$0xff] }
  0x81   :  { %818 = vmatmul.mubr.f32.gmra.mrb[10].mxu1 %v79_v20  ;;  %3793 = vmatpush1.bf16.msra.mxu0 %v3792_v21  ;;  %v3810_v20 = vpack.c.bf16 %v336_v11, %v332_v10  ;;  %v333_v21 = vld [vmem:[#allocation3 + $0x690] sm:$0xff]  ;;  %v359_v60 = vld [vmem:[#allocation3 + $0x760] sm:$0xff] }
  0x82   :  { %3921 = vmatpush1.bf16.msra.mxu1 %v3920_v24  ;;  %501 = vmatprep.mubr.f32.mxu0 %v84_v27  ;;  %v340_v24 = vld [vmem:[#allocation3 + $0x6c8] sm:$0xff]  ;;  %v3940_v30 = vpack.c.bf16 %v337_v22, %v333_v21  ;;  %v111_v4 = vld [vmem:[%s6322_s0 + $0x1a0] sm:$0xff]  ;;  %v369_v14 = vld [vmem:[#allocation3 + $0x7b0] sm:$0xff] }
  0x83   :  { %823 = vmatprep.mubr.f32.mxu1 %v84_v27  ;;  %3795 = vmatprep.subr.bf16.mxu0 %v3794_v28  ;;  %v3812_v27 = vpack.c.bf16 %v335_v18, %v331_v17  ;;  %v342_v28 = vld [vmem:[#allocation3 + $0x6d8] sm:$0xff]  ;;  %v112_v61 = vld [vmem:[%s6322_s0 + $0x1a8] sm:$0xff] }
  0x84   :  { %502 = vmatmul.mubr.f32.gmra.mrb[12].mxu0 %v83_v34  ;;  %3923 = vmatprep.subr.bf16.mxu1 %v3922_v31  ;;  %v339_v31 = vld [vmem:[#allocation3 + $0x6c0] sm:$0xff]  ;;  %v3942_v37 = vpack.c.bf16 %v346_v29, %v342_v28  ;;  %v376_v17 = vld [vmem:[#allocation3 + $0x7e8] sm:$0xff]  ;;  %v378_v21 = vld [vmem:[#allocation3 + $0x7f8] sm:$0xff] }
  0x85   :  { %824 = vmatmul.mubr.f32.gmra.mrb[12].mxu1 %v83_v34  ;;  %3797 = vmatpush1.bf16.msra.mxu0 %v3796_v35  ;;  %v3814_v34 = vpack.c.bf16 %v344_v25, %v340_v24  ;;  %v341_v35 = vld [vmem:[#allocation3 + $0x6d0] sm:$0xff]  ;;  %v367_v10 = vld [vmem:[#allocation3 + $0x7a0] sm:$0xff] }
  0x86   :  { %3925 = vmatpush1.bf16.msra.mxu1 %v3924_v38  ;;  %507 = vmatprep.mubr.f32.mxu0 %v88_v41  ;;  %v348_v38 = vld [vmem:[#allocation3 + $0x708] sm:$0xff]  ;;  %v3944_v44 = vpack.c.bf16 %v345_v36, %v341_v35  ;;  %v115_v18 = vld [vmem:[%s6322_s0 + $0x1c0] sm:$0xff]  ;;  %v377_v28 = vld [vmem:[#allocation3 + $0x7f0] sm:$0xff] }
  0x87   :  { %829 = vmatprep.mubr.f32.mxu1 %v88_v41  ;;  %3799 = vmatprep.subr.bf16.mxu0 %v3798_v42  ;;  %v3816_v41 = vpack.c.bf16 %v343_v32, %v339_v31  ;;  %v350_v42 = vld [vmem:[#allocation3 + $0x718] sm:$0xff]  ;;  %v116_v11 = vld [vmem:[%s6322_s0 + $0x1c8] sm:$0xff] }
  0x88   :  { %508 = vmatmul.mubr.f32.gmra.mrb[14].mxu0 %v87_v48  ;;  %3927 = vmatprep.subr.bf16.mxu1 %v3926_v45  ;;  %v347_v45 = vld [vmem:[#allocation3 + $0x700] sm:$0xff]  ;;  %v3946_v51 = vpack.c.bf16 %v354_v43, %v350_v42  ;;  %v1114_v31 = vld [vmem:[#allocation5 + $0x28] sm:$0xff]  ;;  %v1116_v35 = vld [vmem:[#allocation5 + $0x38] sm:$0xff] }
  0x89   :  { %830 = vmatmul.mubr.f32.gmra.mrb[14].mxu1 %v87_v48  ;;  %3801 = vmatpush1.bf16.msra.mxu0 %v3800_v49  ;;  %v3818_v48 = vpack.c.bf16 %v352_v39, %v348_v38  ;;  %v349_v49 = vld [vmem:[#allocation3 + $0x710] sm:$0xff]  ;;  %v375_v24 = vld [vmem:[#allocation3 + $0x7e0] sm:$0xff] }
  0x8a   :  { %3929 = vmatpush1.bf16.msra.mxu1 %v3928_v52  ;;  %513 = vmatprep.mubr.f32.mxu0 %v92_v55  ;;  %v356_v52 = vld [vmem:[#allocation3 + $0x748] sm:$0xff]  ;;  %v3948_v58 = vpack.c.bf16 %v353_v50, %v349_v49  ;;  %v119_v32 = vld [vmem:[%s6322_s0 + $0x1e0] sm:$0xff]  ;;  %v1115_v43 = vld [vmem:[#allocation5 + $0x30] sm:$0xff] }
  0x8b   :  { %835 = vmatprep.mubr.f32.mxu1 %v92_v55  ;;  %3803 = vmatprep.subr.bf16.mxu0 %v3802_v56  ;;  %v3820_v55 = vpack.c.bf16 %v351_v46, %v347_v45  ;;  %v358_v56 = vld [vmem:[#allocation3 + $0x758] sm:$0xff]  ;;  %v120_v25 = vld [vmem:[%s6322_s0 + $0x1e8] sm:$0xff]  ;;  %v61_v46 = vld [vmem:[%s6322_s0 + $0x10] sm:$0xff] }
  0x8c   :  { %514 = vmatmul.mubr.f32.gmra.mrb[16].mxu0 %v91_v62  ;;  %3931 = vmatprep.subr.bf16.mxu1 %v3930_v59  ;;  %v355_v59 = vld [vmem:[#allocation3 + $0x740] sm:$0xff]  ;;  %v3950_v1 = vpack.c.bf16 %v362_v57, %v358_v56  ;;  %v1122_v45 = vld [vmem:[#allocation5 + $0x68] sm:$0xff]  ;;  %v66_v49 = vld [vmem:[%s6322_s0 + $0x38] sm:$0xff] }
  0x8d   :  { %836 = vmatmul.mubr.f32.gmra.mrb[16].mxu1 %v91_v62  ;;  %3805 = vmatpush1.bf16.msra.mxu0 %v3804_v63  ;;  %v3822_v62 = vpack.c.bf16 %v360_v53, %v356_v52  ;;  %v357_v63 = vld [vmem:[#allocation3 + $0x750] sm:$0xff]  ;;  %v1109_v39 = vld [vmem:[#allocation5] sm:$0xff] }
  0x8e   :  { %3933 = vmatpush1.bf16.msra.mxu1 %v3932_v2  ;;  %519 = vmatprep.mubr.f32.mxu0 %v96_v5  ;;  %v364_v2 = vld [vmem:[#allocation3 + $0x788] sm:$0xff]  ;;  %v3952_v8 = vpack.c.bf16 %v361_v0, %v357_v63  ;;  %v1117_v53 = vld [vmem:[#allocation5 + $0x40] sm:$0xff]  ;;  %v1123_v57 = vld [vmem:[#allocation5 + $0x70] sm:$0xff] }
  0x8f   :  { %841 = vmatprep.mubr.f32.mxu1 %v96_v5  ;;  %3807 = vmatprep.subr.bf16.mxu0 %v3806_v6  ;;  %v3824_v5 = vpack.c.bf16 %v359_v60, %v355_v59  ;;  %v366_v6 = vld [vmem:[#allocation3 + $0x798] sm:$0xff]  ;;  %v1130_v59 = vld [vmem:[#allocation5 + $0xa8] sm:$0xff] }
  0x90   :  { %520 = vmatmul.mubr.f32.gmra.mrb[18].mxu0 %v95_v12  ;;  %3935 = vmatprep.subr.bf16.mxu1 %v3934_v9  ;;  %v363_v9 = vld [vmem:[#allocation3 + $0x780] sm:$0xff]  ;;  %v3954_v15 = vpack.c.bf16 %v370_v7, %v366_v6  ;;  %v65_v60 = vld [vmem:[%s6322_s0 + $0x30] sm:$0xff]  ;;  %v70_v63 = vld [vmem:[%s6322_s0 + $0x58] sm:$0xff] }
  0x91   :  { %842 = vmatmul.mubr.f32.gmra.mrb[18].mxu1 %v95_v12  ;;  %3809 = vmatpush1.bf16.msra.mxu0 %v3808_v13  ;;  %v3826_v12 = vpack.c.bf16 %v368_v3, %v364_v2  ;;  %v365_v13 = vld [vmem:[#allocation3 + $0x790] sm:$0xff]  ;;  %v1125_v3 = vld [vmem:[#allocation5 + $0x80] sm:$0xff] }
  0x92   :  { %3937 = vmatpush1.bf16.msra.mxu1 %v3936_v16  ;;  %525 = vmatprep.mubr.f32.mxu0 %v100_v19  ;;  %v372_v16 = vld [vmem:[#allocation3 + $0x7c8] sm:$0xff]  ;;  %v3956_v22 = vpack.c.bf16 %v369_v14, %v365_v13  ;;  %v1131_v7 = vld [vmem:[#allocation5 + $0xb0] sm:$0xff] }
  0x93   :  { %847 = vmatprep.mubr.f32.mxu1 %v100_v19  ;;  %3811 = vmatprep.subr.bf16.mxu0 %v3810_v20  ;;  %v3828_v19 = vpack.c.bf16 %v367_v10, %v363_v9  ;;  %v374_v20 = vld [vmem:[#allocation3 + $0x7d8] sm:$0xff]  ;;  %v1138_v9 = vld [vmem:[#allocation5 + $0xe8] sm:$0xff] }
  0x94   :  { %526 = vmatmul.mubr.f32.gmra.mrb[20].mxu0 %v99_v26  ;;  %3939 = vmatprep.subr.bf16.mxu1 %v3938_v23  ;;  %v371_v23 = vld [vmem:[#allocation3 + $0x7c0] sm:$0xff]  ;;  %v3958_v29 = vpack.c.bf16 %v378_v21, %v374_v20  ;;  %v69_v10 = vld [vmem:[%s6322_s0 + $0x50] sm:$0xff]  ;;  %v74_v13 = vld [vmem:[%s6322_s0 + $0x78] sm:$0xff] }
  0x95   :  { %848 = vmatmul.mubr.f32.gmra.mrb[20].mxu1 %v99_v26  ;;  %3813 = vmatpush1.bf16.msra.mxu0 %v3812_v27  ;;  %v3830_v26 = vpack.c.bf16 %v376_v17, %v372_v16  ;;  %v373_v27 = vld [vmem:[#allocation3 + $0x7d0] sm:$0xff]  ;;  %v1133_v17 = vld [vmem:[#allocation5 + $0xc0] sm:$0xff] }
  0x96   :  { %3941 = vmatpush1.bf16.msra.mxu1 %v3940_v30  ;;  %531 = vmatprep.mubr.f32.mxu0 %v104_v33  ;;  %v1110_v30 = vld [vmem:[#allocation5 + $0x8] sm:$0xff]  ;;  %v3960_v36 = vpack.c.bf16 %v377_v28, %v373_v27  ;;  %v1139_v21 = vld [vmem:[#allocation5 + $0xf0] sm:$0xff] }
  0x97   :  { %853 = vmatprep.mubr.f32.mxu1 %v104_v33  ;;  %3815 = vmatprep.subr.bf16.mxu0 %v3814_v34  ;;  %v3832_v33 = vpack.c.bf16 %v375_v24, %v371_v23  ;;  %v1112_v34 = vld [vmem:[#allocation5 + $0x18] sm:$0xff]  ;;  %v3962_v38 = vpack.c.bf16 %v1114_v31, %v1110_v30  ;;  %v1146_v23 = vld [vmem:[#allocation5 + $0x128] sm:$0xff]  ;;  %v1141_v31 = vld [vmem:[#allocation5 + $0x100] sm:$0xff] }
  0x98   :  { %532 = vmatmul.mubr.f32.gmra.mrb[22].mxu0 %v103_v40  ;;  %3943 = vmatprep.subr.bf16.mxu1 %v3942_v37  ;;  %v62_v37 = vld [vmem:[%s6322_s0 + $0x18] sm:$0xff]  ;;  %v4090_v42 = vpack.c.bf16 %v1116_v35, %v1112_v34  ;;  %v73_v24 = vld [vmem:[%s6322_s0 + $0x70] sm:$0xff] }
  0x99   :  { %854 = vmatmul.mubr.f32.gmra.mrb[22].mxu1 %v103_v40  ;;  %3817 = vmatpush1.bf16.msra.mxu0 %v3816_v41  ;;  %v1113_v40 = vld [vmem:[#allocation5 + $0x20] sm:$0xff]  ;;  %v1111_v41 = vld [vmem:[#allocation5 + $0x10] sm:$0xff] }
  0x9a   :  { %3945 = vmatpush1.bf16.msra.mxu1 %v3944_v44  ;;  %537 = vmatprep.mubr.f32.mxu0 %v108_v47  ;;  %v1118_v44 = vld [vmem:[#allocation5 + $0x48] sm:$0xff]  ;;  %v3964_v50 = vpack.c.bf16 %v1113_v40, %v1109_v39  ;;  %v78_v27 = vld [vmem:[%s6322_s0 + $0x98] sm:$0xff] }
  0x9b   :  { %859 = vmatprep.mubr.f32.mxu1 %v108_v47  ;;  %3819 = vmatprep.subr.bf16.mxu0 %v3818_v48  ;;  %v1120_v47 = vld [vmem:[#allocation5 + $0x58] sm:$0xff]  ;;  %v3966_v52 = vpack.c.bf16 %v1122_v45, %v1118_v44  ;;  %v1147_v35 = vld [vmem:[#allocation5 + $0x130] sm:$0xff]  ;;  %v1149_v45 = vld [vmem:[#allocation5 + $0x140] sm:$0xff] }
  0x9c   :  { %538 = vmatmul.mubr.f32.gmra.mrb[24].mxu0 %v107_v54  ;;  %3947 = vmatprep.subr.bf16.mxu1 %v3946_v51  ;;  %v1124_v48 = vld [vmem:[#allocation5 + $0x78] sm:$0xff]  ;;  %v4092_v51 = vpack.c.bf16 %v1115_v43, %v1111_v41 }
  0x9d   :  { %860 = vmatmul.mubr.f32.gmra.mrb[24].mxu1 %v107_v54  ;;  %3821 = vmatpush1.bf16.msra.mxu0 %v3820_v55  ;;  %v1121_v54 = vld [vmem:[#allocation5 + $0x60] sm:$0xff]  ;;  %v1119_v55 = vld [vmem:[#allocation5 + $0x50] sm:$0xff]  ;;  %v4094_v56 = vpack.c.bf16 %v1124_v48, %v1120_v47  ;;  %v1152_v39 = vld [vmem:[#allocation5 + $0x158] sm:$0xff] }
  0x9e   :  { %3949 = vmatpush1.bf16.msra.mxu1 %v3948_v58  ;;  %543 = vmatprep.mubr.f32.mxu0 %v112_v61  ;;  %v1126_v58 = vld [vmem:[#allocation5 + $0x88] sm:$0xff]  ;;  %v3968_v0 = vpack.c.bf16 %v1121_v54, %v1117_v53  ;;  %v1156_v40 = vld [vmem:[#allocation5 + $0x178] sm:$0xff]  ;;  %v1151_v47 = vld [vmem:[#allocation5 + $0x150] sm:$0xff] }
  0x9f   :  { %865 = vmatprep.mubr.f32.mxu1 %v112_v61  ;;  %3823 = vmatprep.subr.bf16.mxu0 %v3822_v62  ;;  %v1128_v61 = vld [vmem:[#allocation5 + $0x98] sm:$0xff]  ;;  %v3970_v2 = vpack.c.bf16 %v1130_v59, %v1126_v58  ;;  %v4110_v48 = vpack.c.bf16 %v1156_v40, %v1152_v39  ;;  %v1157_v59 = vld [vmem:[#allocation5 + $0x180] sm:$0xff]  ;;  %v1183_v39 = vld [vmem:[#allocation5 + $0x250] sm:$0xff] }
  0xa0   :  { %544 = vmatmul.mubr.f32.gmra.mrb[26].mxu0 %v111_v4  ;;  %3951 = vmatprep.subr.bf16.mxu1 %v3950_v1  ;;  %v1132_v62 = vld [vmem:[#allocation5 + $0xb8] sm:$0xff]  ;;  %v4096_v1 = vpack.c.bf16 %v1123_v57, %v1119_v55 }
  0xa1   :  { %866 = vmatmul.mubr.f32.gmra.mrb[26].mxu1 %v111_v4  ;;  %3825 = vmatpush1.bf16.msra.mxu0 %v3824_v5  ;;  %v1129_v4 = vld [vmem:[#allocation5 + $0xa0] sm:$0xff]  ;;  %v1127_v5 = vld [vmem:[#allocation5 + $0x90] sm:$0xff]  ;;  %v4098_v6 = vpack.c.bf16 %v1132_v62, %v1128_v61  ;;  %v1160_v53 = vld [vmem:[#allocation5 + $0x198] sm:$0xff] }
  0xa2   :  { %3953 = vmatpush1.bf16.msra.mxu1 %v3952_v8  ;;  %549 = vmatprep.mubr.f32.mxu0 %v116_v11  ;;  %v1134_v8 = vld [vmem:[#allocation5 + $0xc8] sm:$0xff]  ;;  %v3972_v14 = vpack.c.bf16 %v1129_v4, %v1125_v3  ;;  %v82_v41 = vld [vmem:[%s6322_s0 + $0xb8] sm:$0xff] }
  0xa3   :  { %871 = vmatprep.mubr.f32.mxu1 %v116_v11  ;;  %3827 = vmatprep.subr.bf16.mxu0 %v3826_v12  ;;  %v1136_v11 = vld [vmem:[#allocation5 + $0xd8] sm:$0xff]  ;;  %v3974_v16 = vpack.c.bf16 %v1138_v9, %v1134_v8  ;;  %v1159_v61 = vld [vmem:[#allocation5 + $0x190] sm:$0xff]  ;;  %v1165_v9 = vld [vmem:[#allocation5 + $0x1c0] sm:$0xff] }
  0xa4   :  { %550 = vmatmul.mubr.f32.gmra.mrb[28].mxu0 %v115_v18  ;;  %3955 = vmatprep.subr.bf16.mxu1 %v3954_v15  ;;  %v1140_v12 = vld [vmem:[#allocation5 + $0xf8] sm:$0xff]  ;;  %v4100_v15 = vpack.c.bf16 %v1131_v7, %v1127_v5 }
  0xa5   :  { %872 = vmatmul.mubr.f32.gmra.mrb[28].mxu1 %v115_v18  ;;  %3829 = vmatpush1.bf16.msra.mxu0 %v3828_v19  ;;  %v1137_v18 = vld [vmem:[#allocation5 + $0xe0] sm:$0xff]  ;;  %v1135_v19 = vld [vmem:[#allocation5 + $0xd0] sm:$0xff]  ;;  %v4102_v20 = vpack.c.bf16 %v1140_v12, %v1136_v11  ;;  %v1164_v54 = vld [vmem:[#allocation5 + $0x1b8] sm:$0xff] }
  0xa6   :  { %3957 = vmatpush1.bf16.msra.mxu1 %v3956_v22  ;;  %555 = vmatprep.mubr.f32.mxu0 %v120_v25  ;;  %v1142_v22 = vld [vmem:[#allocation5 + $0x108] sm:$0xff]  ;;  %v3976_v28 = vpack.c.bf16 %v1137_v18, %v1133_v17  ;;  %v86_v55 = vld [vmem:[%s6322_s0 + $0xd8] sm:$0xff]  ;;  %v4114_v62 = vpack.c.bf16 %v1164_v54, %v1160_v53 }
  0xa7   :  { %877 = vmatprep.mubr.f32.mxu1 %v120_v25  ;;  %3831 = vmatprep.subr.bf16.mxu0 %v3830_v26  ;;  %v1144_v25 = vld [vmem:[#allocation5 + $0x118] sm:$0xff]  ;;  %v3978_v30 = vpack.c.bf16 %v1146_v23, %v1142_v22  ;;  %v1167_v11 = vld [vmem:[#allocation5 + $0x1d0] sm:$0xff]  ;;  %v1173_v23 = vld [vmem:[#allocation5 + $0x200] sm:$0xff] }
  0xa8   :  { %556 = vmatmul.mubr.f32.gmra.mrb[30].mxu0 %v119_v32  ;;  %3959 = vmatprep.subr.bf16.mxu1 %v3958_v29  ;;  %v1148_v26 = vld [vmem:[#allocation5 + $0x138] sm:$0xff]  ;;  %v4104_v29 = vpack.c.bf16 %v1139_v21, %v1135_v19  ;;  %v1191_v53 = vld [vmem:[#allocation5 + $0x290] sm:$0xff] }
  0xa9   :  { %878 = vmatmul.mubr.f32.gmra.mrb[30].mxu1 %v119_v32  ;;  %3833 = vmatpush1.bf16.msra.mxu0 %v3832_v33  ;;  %v1145_v32 = vld [vmem:[#allocation5 + $0x120] sm:$0xff]  ;;  %v1143_v33 = vld [vmem:[#allocation5 + $0x110] sm:$0xff]  ;;  %v4106_v34 = vpack.c.bf16 %v1148_v26, %v1144_v25  ;;  %v1168_v3 = vld [vmem:[#allocation5 + $0x1d8] sm:$0xff] }
  0xaa   :  { %3961 = vmatpush1.bf16.msra.mxu1 %v3960_v36  ;;  %626 = vmatprep.mubr.f32.mxu0 %v62_v37  ;;  %v1150_v36 = vld [vmem:[#allocation5 + $0x148] sm:$0xff]  ;;  %v4108_v43 = vpack.c.bf16 %v1147_v35, %v1143_v33  ;;  %v1172_v4 = vld [vmem:[#allocation5 + $0x1f8] sm:$0xff]  ;;  %v1175_v25 = vld [vmem:[#allocation5 + $0x210] sm:$0xff] }
  0xab   :  { %948 = vmatprep.mubr.f32.mxu1 %v62_v37  ;;  %3963 = vmatprep.subr.bf16.mxu0 %v3962_v38  ;;  %v1154_v37 = vld [vmem:[#allocation5 + $0x168] sm:$0xff]  ;;  %v90_v5 = vld [vmem:[%s6322_s0 + $0xf8] sm:$0xff]  ;;  %v4118_v12 = vpack.c.bf16 %v1172_v4, %v1168_v3 }
  0xac   :  { %627 = vmatmul.mubr.f32.vlgmr.msra.gmra.mrb[0].mxu0 %v61_v46  ;;  %4091 = vmatprep.subr.bf16.mxu1 %v4090_v42  ;;  %v77_v38 = vld [vmem:[%s6322_s0 + $0x90] sm:$0xff]  ;;  %v3980_v42 = vpack.c.bf16 %v1145_v32, %v1141_v31  ;;  %v3982_v44 = vpack.c.bf16 %v1154_v37, %v1150_v36  ;;  %v1176_v17 = vld [vmem:[#allocation5 + $0x218] sm:$0xff]  ;;  %v1181_v37 = vld [vmem:[#allocation5 + $0x240] sm:$0xff] }
  0xad   :  { %949 = vmatmul.mubr.f32.vlgmr.msra.gmra.mrb[0].mxu1 %v61_v46  ;;  %632 = vmatprep.mubr.f32.mxu0 %v66_v49  ;;  %v1153_v46 = vld [vmem:[#allocation5 + $0x160] sm:$0xff]  ;;  %v1180_v18 = vld [vmem:[#allocation5 + $0x238] sm:$0xff]  ;;  %v1199_v3 = vld [vmem:[#allocation5 + $0x2d0] sm:$0xff] }
  0xae   :  { %954 = vmatprep.mubr.f32.mxu1 %v66_v49  ;;  %3965 = vmatpush1.bf16.msra.mxu0 %v3964_v50  ;;  %v1155_v49 = vld [vmem:[#allocation5 + $0x170] sm:$0xff]  ;;  %v1158_v50 = vld [vmem:[#allocation5 + $0x188] sm:$0xff]  ;;  %v4122_v26 = vpack.c.bf16 %v1180_v18, %v1176_v17  ;;  %v1184_v31 = vld [vmem:[#allocation5 + $0x258] sm:$0xff] }
  0xaf   :  { %4093 = vmatpush1.bf16.msra.mxu1 %v4092_v51  ;;  %3967 = vmatprep.subr.bf16.mxu0 %v3966_v52  ;;  %v1162_v51 = vld [vmem:[#allocation5 + $0x1a8] sm:$0xff]  ;;  %v4112_v57 = vpack.c.bf16 %v1155_v49, %v1151_v47  ;;  %v94_v19 = vld [vmem:[%s6322_s0 + $0x118] sm:$0xff] }
  0xb0   :  { %633 = vmatmul.mubr.f32.gmra.mrb[2].mxu0 %v65_v60  ;;  %4095 = vmatprep.subr.bf16.mxu1 %v4094_v56  ;;  %v81_v52 = vld [vmem:[%s6322_s0 + $0xb0] sm:$0xff]  ;;  %v3984_v56 = vpack.c.bf16 %v1153_v46, %v1149_v45  ;;  %v3986_v58 = vpack.c.bf16 %v1162_v51, %v1158_v50  ;;  %v1188_v32 = vld [vmem:[#allocation5 + $0x278] sm:$0xff]  ;;  %v1189_v51 = vld [vmem:[#allocation5 + $0x280] sm:$0xff] }
  0xb1   :  { %955 = vmatmul.mubr.f32.gmra.mrb[2].mxu1 %v65_v60  ;;  %638 = vmatprep.mubr.f32.mxu0 %v70_v63  ;;  %v1161_v60 = vld [vmem:[#allocation5 + $0x1a0] sm:$0xff]  ;;  %v98_v33 = vld [vmem:[%s6322_s0 + $0x138] sm:$0xff]  ;;  %v4126_v40 = vpack.c.bf16 %v1188_v32, %v1184_v31 }
  0xb2   :  { %960 = vmatprep.mubr.f32.mxu1 %v70_v63  ;;  %3969 = vmatpush1.bf16.msra.mxu0 %v3968_v0  ;;  %v1163_v63 = vld [vmem:[#allocation5 + $0x1b0] sm:$0xff]  ;;  %v1166_v0 = vld [vmem:[#allocation5 + $0x1c8] sm:$0xff]  ;;  %v1192_v45 = vld [vmem:[#allocation5 + $0x298] sm:$0xff] }
  0xb3   :  { %4097 = vmatpush1.bf16.msra.mxu1 %v4096_v1  ;;  %3971 = vmatprep.subr.bf16.mxu0 %v3970_v2  ;;  %v1170_v1 = vld [vmem:[#allocation5 + $0x1e8] sm:$0xff]  ;;  %v4116_v7 = vpack.c.bf16 %v1163_v63, %v1159_v61  ;;  %v1196_v46 = vld [vmem:[#allocation5 + $0x2b8] sm:$0xff]  ;;  %v1207_v17 = vld [vmem:[#allocation5 + $0x310] sm:$0xff] }
  0xb4   :  { %639 = vmatmul.mubr.f32.gmra.mrb[4].mxu0 %v69_v10  ;;  %4099 = vmatprep.subr.bf16.mxu1 %v4098_v6  ;;  %v85_v2 = vld [vmem:[%s6322_s0 + $0xd0] sm:$0xff]  ;;  %v3988_v6 = vpack.c.bf16 %v1161_v60, %v1157_v59  ;;  %v3990_v8 = vpack.c.bf16 %v1170_v1, %v1166_v0  ;;  %v102_v47 = vld [vmem:[%s6322_s0 + $0x158] sm:$0xff]  ;;  %v4130_v54 = vpack.c.bf16 %v1196_v46, %v1192_v45  ;;  %v1197_v1 = vld [vmem:[#allocation5 + $0x2c0] sm:$0xff] }
  0xb5   :  { %961 = vmatmul.mubr.f32.gmra.mrb[4].mxu1 %v69_v10  ;;  %644 = vmatprep.mubr.f32.mxu0 %v74_v13  ;;  %v1169_v10 = vld [vmem:[#allocation5 + $0x1e0] sm:$0xff]  ;;  %v1200_v59 = vld [vmem:[#allocation5 + $0x2d8] sm:$0xff]  ;;  %v1215_v31 = vld [vmem:[#allocation5 + $0x350] sm:$0xff] }
  0xb6   :  { %966 = vmatprep.mubr.f32.mxu1 %v74_v13  ;;  %3973 = vmatpush1.bf16.msra.mxu0 %v3972_v14  ;;  %v1171_v13 = vld [vmem:[#allocation5 + $0x1f0] sm:$0xff]  ;;  %v1174_v14 = vld [vmem:[#allocation5 + $0x208] sm:$0xff]  ;;  %v1204_v60 = vld [vmem:[#allocation5 + $0x2f8] sm:$0xff] }
  0xb7   :  { %4101 = vmatpush1.bf16.msra.mxu1 %v4100_v15  ;;  %3975 = vmatprep.subr.bf16.mxu0 %v3974_v16  ;;  %v1178_v15 = vld [vmem:[#allocation5 + $0x228] sm:$0xff]  ;;  %v4120_v21 = vpack.c.bf16 %v1171_v13, %v1167_v11  ;;  %v106_v61 = vld [vmem:[%s6322_s0 + $0x178] sm:$0xff]  ;;  %v4134_v4 = vpack.c.bf16 %v1204_v60, %v1200_v59  ;;  %v1233_v59 = vld [vmem:[#allocation5 + $0x3e0] sm:$0xff] }
  0xb8   :  { %645 = vmatmul.mubr.f32.gmra.mrb[6].mxu0 %v73_v24  ;;  %4103 = vmatprep.subr.bf16.mxu1 %v4102_v20  ;;  %v89_v16 = vld [vmem:[%s6322_s0 + $0xf0] sm:$0xff]  ;;  %v3992_v20 = vpack.c.bf16 %v1169_v10, %v1165_v9  ;;  %v3994_v22 = vpack.c.bf16 %v1178_v15, %v1174_v14  ;;  %v1208_v9 = vld [vmem:[#allocation5 + $0x318] sm:$0xff]  ;;  %v1205_v15 = vld [vmem:[#allocation5 + $0x300] sm:$0xff] }
  0xb9   :  { %967 = vmatmul.mubr.f32.gmra.mrb[6].mxu1 %v73_v24  ;;  %650 = vmatprep.mubr.f32.mxu0 %v78_v27  ;;  %v1177_v24 = vld [vmem:[#allocation5 + $0x220] sm:$0xff]  ;;  %v1212_v10 = vld [vmem:[#allocation5 + $0x338] sm:$0xff]  ;;  %v121_v46 = vld [vmem:[%s6322_s0 + $0x1f0] sm:$0xff] }
  0xba   :  { %972 = vmatprep.mubr.f32.mxu1 %v78_v27  ;;  %3977 = vmatpush1.bf16.msra.mxu0 %v3976_v28  ;;  %v1179_v27 = vld [vmem:[#allocation5 + $0x230] sm:$0xff]  ;;  %v1182_v28 = vld [vmem:[#allocation5 + $0x248] sm:$0xff]  ;;  %v4138_v18 = vpack.c.bf16 %v1212_v10, %v1208_v9  ;;  %v5068_v10 = vld [vmem:[%s6324_s2] sm:$0xf] }
  0xbb   :  { %4105 = vmatpush1.bf16.msra.mxu1 %v4104_v29  ;;  %3979 = vmatprep.subr.bf16.mxu0 %v3978_v30  ;;  %v1186_v29 = vld [vmem:[#allocation5 + $0x268] sm:$0xff]  ;;  %v4124_v35 = vpack.c.bf16 %v1179_v27, %v1175_v25  ;;  %v110_v11 = vld [vmem:[%s6322_s0 + $0x198] sm:$0xff] }
  0xbc   :  { %651 = vmatmul.mubr.f32.gmra.mrb[8].mxu0 %v77_v38  ;;  %4107 = vmatprep.subr.bf16.mxu1 %v4106_v34  ;;  %v93_v30 = vld [vmem:[%s6322_s0 + $0x110] sm:$0xff]  ;;  %v3996_v34 = vpack.c.bf16 %v1177_v24, %v1173_v23  ;;  %v3998_v36 = vpack.c.bf16 %v1186_v29, %v1182_v28  ;;  %v1216_v23 = vld [vmem:[#allocation5 + $0x358] sm:$0xff]  ;;  %v1213_v29 = vld [vmem:[#allocation5 + $0x340] sm:$0xff] }
  0xbd   :  { %973 = vmatmul.mubr.f32.gmra.mrb[8].mxu1 %v77_v38  ;;  %656 = vmatprep.mubr.f32.mxu0 %v82_v41  ;;  %v1185_v38 = vld [vmem:[#allocation5 + $0x260] sm:$0xff]  ;;  %v1220_v24 = vld [vmem:[#allocation5 + $0x378] sm:$0xff] }
  0xbe   :  { %978 = vmatprep.mubr.f32.mxu1 %v82_v41  ;;  %3981 = vmatpush1.bf16.msra.mxu0 %v3980_v42  ;;  %v1187_v41 = vld [vmem:[#allocation5 + $0x270] sm:$0xff]  ;;  %v1190_v42 = vld [vmem:[#allocation5 + $0x288] sm:$0xff]  ;;  %v4142_v32 = vpack.c.bf16 %v1220_v24, %v1216_v23 }
  0xbf   :  { %4109 = vmatpush1.bf16.msra.mxu1 %v4108_v43  ;;  %3983 = vmatprep.subr.bf16.mxu0 %v3982_v44  ;;  %v1194_v43 = vld [vmem:[#allocation5 + $0x2a8] sm:$0xff]  ;;  %v4128_v49 = vpack.c.bf16 %v1187_v41, %v1183_v39  ;;  %v114_v25 = vld [vmem:[%s6322_s0 + $0x1b8] sm:$0xff] }
  0xc0   :  { %657 = vmatmul.mubr.f32.gmra.mrb[10].mxu0 %v81_v52  ;;  %4111 = vmatprep.subr.bf16.mxu1 %v4110_v48  ;;  %v97_v44 = vld [vmem:[%s6322_s0 + $0x130] sm:$0xff]  ;;  %v4000_v48 = vpack.c.bf16 %v1185_v38, %v1181_v37  ;;  %v4002_v50 = vpack.c.bf16 %v1194_v43, %v1190_v42  ;;  %v1224_v37 = vld [vmem:[#allocation5 + $0x398] sm:$0xff] }
  0xc1   :  { %979 = vmatmul.mubr.f32.gmra.mrb[10].mxu1 %v81_v52  ;;  %662 = vmatprep.mubr.f32.mxu0 %v86_v55  ;;  %v1193_v52 = vld [vmem:[#allocation5 + $0x2a0] sm:$0xff]  ;;  %v1228_v38 = vld [vmem:[#allocation5 + $0x3b8] sm:$0xff] }
  0xc2   :  { %984 = vmatprep.mubr.f32.mxu1 %v86_v55  ;;  %3985 = vmatpush1.bf16.msra.mxu0 %v3984_v56  ;;  %v1195_v55 = vld [vmem:[#allocation5 + $0x2b0] sm:$0xff]  ;;  %v1198_v56 = vld [vmem:[#allocation5 + $0x2c8] sm:$0xff]  ;;  %v4146_v43 = vpack.c.bf16 %v1228_v38, %v1224_v37 }
  0xc3   :  { %4113 = vmatpush1.bf16.msra.mxu1 %v4112_v57  ;;  %3987 = vmatprep.subr.bf16.mxu0 %v3986_v58  ;;  %v1202_v57 = vld [vmem:[#allocation5 + $0x2e8] sm:$0xff]  ;;  %v4132_v63 = vpack.c.bf16 %v1195_v55, %v1191_v53  ;;  %v118_v39 = vld [vmem:[%s6322_s0 + $0x1d8] sm:$0xff] }
  0xc4   :  { %663 = vmatmul.mubr.f32.gmra.mrb[12].mxu0 %v85_v2  ;;  %4115 = vmatprep.subr.bf16.mxu1 %v4114_v62  ;;  %v101_v58 = vld [vmem:[%s6322_s0 + $0x150] sm:$0xff]  ;;  %v4004_v62 = vpack.c.bf16 %v1193_v52, %v1189_v51  ;;  %v4006_v0 = vpack.c.bf16 %v1202_v57, %v1198_v56  ;;  %v122_v45 = vld [vmem:[%s6322_s0 + $0x1f8] sm:$0xff] }
  0xc5   :  { %985 = vmatmul.mubr.f32.gmra.mrb[12].mxu1 %v85_v2  ;;  %668 = vmatprep.mubr.f32.mxu0 %v90_v5  ;;  %v1201_v2 = vld [vmem:[#allocation5 + $0x2e0] sm:$0xff]  ;;  %v1227_v51 = vld [vmem:[#allocation5 + $0x3b0] sm:$0xff]  ;;  %v1230_v53 = vld [vmem:[#allocation5 + $0x3c8] sm:$0xff] }
  0xc6   :  { %990 = vmatprep.mubr.f32.mxu1 %v90_v5  ;;  %3989 = vmatpush1.bf16.msra.mxu0 %v3988_v6  ;;  %v1203_v5 = vld [vmem:[#allocation5 + $0x2f0] sm:$0xff]  ;;  %v1206_v6 = vld [vmem:[#allocation5 + $0x308] sm:$0xff]  ;;  %v1232_v55 = vld [vmem:[#allocation5 + $0x3d8] sm:$0xff] }
  0xc7   :  { %4117 = vmatpush1.bf16.msra.mxu1 %v4116_v7  ;;  %3991 = vmatprep.subr.bf16.mxu0 %v3990_v8  ;;  %v1210_v7 = vld [vmem:[#allocation5 + $0x328] sm:$0xff]  ;;  %v4136_v13 = vpack.c.bf16 %v1203_v5, %v1199_v3  ;;  %v1236_v57 = vld [vmem:[#allocation5 + $0x3f8] sm:$0xff] }
  0xc8   :  { %669 = vmatmul.mubr.f32.gmra.mrb[14].mxu0 %v89_v16  ;;  %4119 = vmatprep.subr.bf16.mxu1 %v4118_v12  ;;  %v105_v8 = vld [vmem:[%s6322_s0 + $0x170] sm:$0xff]  ;;  %v4008_v12 = vpack.c.bf16 %v1201_v2, %v1197_v1  ;;  %v4010_v14 = vpack.c.bf16 %v1210_v7, %v1206_v6  ;;  %v4150_v60 = vpack.c.bf16 %v1236_v57, %v1232_v55  ;;  %v1240_v3 = vld [vmem:[#allocation5 + $0x418] sm:$0xff]  ;;  %v6332_v7 = vlaneseq }
  0xc9   :  { %991 = vmatmul.mubr.f32.gmra.mrb[14].mxu1 %v89_v16  ;;  %674 = vmatprep.mubr.f32.mxu0 %v94_v19  ;;  %v1209_v16 = vld [vmem:[#allocation5 + $0x320] sm:$0xff]  ;;  %v1238_v1 = vld [vmem:[#allocation5 + $0x408] sm:$0xff]  ;;  %v1244_v5 = vld [vmem:[#allocation5 + $0x438] sm:$0xff] }
  0xca   :  { %996 = vmatprep.mubr.f32.mxu1 %v94_v19  ;;  %3993 = vmatpush1.bf16.msra.mxu0 %v3992_v20  ;;  %v1211_v19 = vld [vmem:[#allocation5 + $0x330] sm:$0xff]  ;;  %v1214_v20 = vld [vmem:[#allocation5 + $0x348] sm:$0xff]  ;;  %v4154_v6 = vpack.c.bf16 %v1244_v5, %v1240_v3  ;;  %v1268_v3 = vld [vmem:[#allocation5 + $0x4f8] sm:$0xff] }
  0xcb   :  { %4121 = vmatpush1.bf16.msra.mxu1 %v4120_v21  ;;  %3995 = vmatprep.subr.bf16.mxu0 %v3994_v22  ;;  %v1218_v21 = vld [vmem:[#allocation5 + $0x368] sm:$0xff]  ;;  %v4140_v27 = vpack.c.bf16 %v1211_v19, %v1207_v17 }
  0xcc   :  { %675 = vmatmul.mubr.f32.gmra.mrb[16].mxu0 %v93_v30  ;;  %4123 = vmatprep.subr.bf16.mxu1 %v4122_v26  ;;  %v109_v22 = vld [vmem:[%s6322_s0 + $0x190] sm:$0xff]  ;;  %v4012_v26 = vpack.c.bf16 %v1209_v16, %v1205_v15  ;;  %v4014_v28 = vpack.c.bf16 %v1218_v21, %v1214_v20  ;;  %v1237_v15 = vld [vmem:[#allocation5 + $0x400] sm:$0xff] }
  0xcd   :  { %997 = vmatmul.mubr.f32.gmra.mrb[16].mxu1 %v93_v30  ;;  %680 = vmatprep.mubr.f32.mxu0 %v98_v33  ;;  %v1217_v30 = vld [vmem:[#allocation5 + $0x360] sm:$0xff]  ;;  %v1242_v2 = vld [vmem:[#allocation5 + $0x428] sm:$0xff]  ;;  %v1239_v20 = vld [vmem:[#allocation5 + $0x410] sm:$0xff] }
  0xce   :  { %1002 = vmatprep.mubr.f32.mxu1 %v98_v33  ;;  %3997 = vmatpush1.bf16.msra.mxu0 %v3996_v34  ;;  %v1219_v33 = vld [vmem:[#allocation5 + $0x370] sm:$0xff]  ;;  %v1222_v34 = vld [vmem:[#allocation5 + $0x388] sm:$0xff]  ;;  %v1241_v16 = vld [vmem:[#allocation5 + $0x420] sm:$0xff] }
  0xcf   :  { %4125 = vmatpush1.bf16.msra.mxu1 %v4124_v35  ;;  %3999 = vmatprep.subr.bf16.mxu0 %v3998_v36  ;;  %v1226_v35 = vld [vmem:[#allocation5 + $0x3a8] sm:$0xff]  ;;  %v4144_v41 = vpack.c.bf16 %v1219_v33, %v1215_v31  ;;  %v1243_v21 = vld [vmem:[#allocation5 + $0x430] sm:$0xff]  ;;  %v1249_v33 = vld [vmem:[#allocation5 + $0x460] sm:$0xff] }
  0xd0   :  { %681 = vmatmul.mubr.f32.gmra.mrb[18].mxu0 %v97_v44  ;;  %4127 = vmatprep.subr.bf16.mxu1 %v4126_v40  ;;  %v113_v36 = vld [vmem:[%s6322_s0 + $0x1b0] sm:$0xff]  ;;  %v4016_v40 = vpack.c.bf16 %v1217_v30, %v1213_v29  ;;  %v4018_v42 = vpack.c.bf16 %v1226_v35, %v1222_v34  ;;  %v4028_v30 = vpack.c.bf16 %v1241_v16, %v1237_v15  ;;  %v1261_v15 = vld [vmem:[#allocation5 + $0x4c0] sm:$0xff] }
  0xd1   :  { %1003 = vmatmul.mubr.f32.gmra.mrb[18].mxu1 %v97_v44  ;;  %686 = vmatprep.mubr.f32.mxu0 %v102_v47  ;;  %v117_v44 = vld [vmem:[%s6322_s0 + $0x1d0] sm:$0xff]  ;;  %v4156_v31 = vpack.c.bf16 %v1243_v21, %v1239_v20  ;;  %v1265_v16 = vld [vmem:[#allocation5 + $0x4e0] sm:$0xff] }
  0xd2   :  { %1008 = vmatprep.mubr.f32.mxu1 %v102_v47  ;;  %4001 = vmatpush1.bf16.msra.mxu0 %v4000_v48  ;;  %v1221_v47 = vld [vmem:[#allocation5 + $0x380] sm:$0xff] }
  0xd3   :  { %4129 = vmatpush1.bf16.msra.mxu1 %v4128_v49  ;;  %4003 = vmatprep.subr.bf16.mxu0 %v4002_v50  ;;  %v1225_v48 = vld [vmem:[#allocation5 + $0x3a0] sm:$0xff]  ;;  %v1223_v49 = vld [vmem:[#allocation5 + $0x390] sm:$0xff] }
  0xd4   :  { %687 = vmatmul.mubr.f32.gmra.mrb[20].mxu0 %v101_v58  ;;  %4131 = vmatprep.subr.bf16.mxu1 %v4130_v54  ;;  %v4020_v50 = vpack.c.bf16 %v1225_v48, %v1221_v47  ;;  %v4148_v52 = vpack.c.bf16 %v1227_v51, %v1223_v49  ;;  %v1234_v54 = vld [vmem:[#allocation5 + $0x3e8] sm:$0xff]  ;;  %v1260_v47 = vld [vmem:[#allocation5 + $0x4b8] sm:$0xff] }
  0xd5   :  { %1009 = vmatmul.mubr.f32.gmra.mrb[20].mxu1 %v101_v58  ;;  %692 = vmatprep.mubr.f32.mxu0 %v106_v61  ;;  %v4022_v56 = vpack.c.bf16 %v1234_v54, %v1230_v53  ;;  %v1229_v58 = vld [vmem:[#allocation5 + $0x3c0] sm:$0xff] }
  0xd6   :  { %1014 = vmatprep.mubr.f32.mxu1 %v106_v61  ;;  %4005 = vmatpush1.bf16.msra.mxu0 %v4004_v62  ;;  %v4024_v61 = vpack.c.bf16 %v1233_v59, %v1229_v58  ;;  %v1231_v62 = vld [vmem:[#allocation5 + $0x3d0] sm:$0xff]  ;;  %v1257_v53 = vld [vmem:[#allocation5 + $0x4a0] sm:$0xff] }
  0xd7   :  { %4133 = vmatpush1.bf16.msra.mxu1 %v4132_v63  ;;  %4007 = vmatprep.subr.bf16.mxu0 %v4006_v0  ;;  %v1235_v63 = vld [vmem:[#allocation5 + $0x3f0] sm:$0xff] }
  0xd8   :  { %693 = vmatmul.mubr.f32.gmra.mrb[22].mxu0 %v105_v8  ;;  %4135 = vmatprep.subr.bf16.mxu1 %v4134_v4  ;;  %v4152_v0 = vpack.c.bf16 %v1235_v63, %v1231_v62  ;;  %v4026_v4 = vpack.c.bf16 %v1242_v2, %v1238_v1  ;;  %v1262_v62 = vld [vmem:[#allocation5 + $0x4c8] sm:$0xff]  ;;  %v1264_v2 = vld [vmem:[#allocation5 + $0x4d8] sm:$0xff] }
  0xd9   :  { %1015 = vmatmul.mubr.f32.gmra.mrb[22].mxu1 %v105_v8  ;;  %698 = vmatprep.mubr.f32.mxu0 %v110_v11  ;;  %v5060_v8 = vshrl.u32 %v6332_v7, 7  ;;  %v1266_v1 = vld [vmem:[#allocation5 + $0x4e8] sm:$0xff] }
  0xda   :  { %1020 = vmatprep.mubr.f32.mxu1 %v110_v11  ;;  %4009 = vmatpush1.bf16.msra.mxu0 %v4008_v12  ;;  %v1310_v7 = vld [vmem:[#allocation5 + $0x648] sm:$0xff] }
  0xdb   :  { %4137 = vmatpush1.bf16.msra.mxu1 %v4136_v13  ;;  %4011 = vmatprep.subr.bf16.mxu0 %v4010_v14  ;;  %6388 = vst [vmem:[#allocation9_spill] sm:$0xff] %v5060_v8  ;;  %v5063_v9 = vsub.s32 0, %v5060_v8  ;;  %v5071_v11 = vsub.s32 1, %v5060_v8 }
  0xdc   :  { %699 = vmatmul.mubr.f32.gmra.mrb[24].mxu0 %v109_v22  ;;  %4139 = vmatprep.subr.bf16.mxu1 %v4138_v18 }
  0xdd   :  { %1021 = vmatmul.mubr.f32.gmra.mrb[24].mxu1 %v109_v22  ;;  %704 = vmatprep.mubr.f32.mxu0 %v114_v25  ;;  %v5075_v12 = vrot.slane %v5068_v10, %v5063_v9  ;;  %v5079_v13 = vrot.slane %v5068_v10, %v5071_v11  ;;  %v1246_v22 = vld [vmem:[#allocation5 + $0x448] sm:$0xff] }
  0xde   :  { %1026 = vmatprep.mubr.f32.mxu1 %v114_v25  ;;  %4013 = vmatpush1.bf16.msra.mxu0 %v4012_v26  ;;  %v1250_v25 = vld [vmem:[#allocation5 + $0x468] sm:$0xff]  ;;  %v1248_v26 = vld [vmem:[#allocation5 + $0x458] sm:$0xff] }
  0xdf   :  { %4141 = vmatpush1.bf16.msra.mxu1 %v4140_v27  ;;  %4015 = vmatprep.subr.bf16.mxu0 %v4014_v28  ;;  %v1252_v27 = vld [vmem:[#allocation5 + $0x478] sm:$0xff]  ;;  %v4030_v38 = vpack.c.bf16 %v1250_v25, %v1246_v22  ;;  %v4038_v22 = vpack.c.bf16 %v1266_v1, %v1262_v62  ;;  %v1263_v25 = vld [vmem:[#allocation5 + $0x4d0] sm:$0xff]  ;;  %v1277_v1 = vld [vmem:[#allocation5 + $0x540] sm:$0xff] }
  0xe0   :  { %705 = vmatmul.mubr.f32.gmra.mrb[26].mxu0 %v113_v36  ;;  %4143 = vmatprep.subr.bf16.mxu1 %v4142_v32  ;;  %v1245_v32 = vld [vmem:[#allocation5 + $0x440] sm:$0xff] }
  0xe1   :  { %1027 = vmatmul.mubr.f32.gmra.mrb[26].mxu1 %v113_v36  ;;  %710 = vmatprep.mubr.f32.mxu0 %v118_v39 }
  0xe2   :  { %1032 = vmatprep.mubr.f32.mxu1 %v118_v39  ;;  %4017 = vmatpush1.bf16.msra.mxu0 %v4016_v40  ;;  %v4158_v39 = vpack.c.bf16 %v1252_v27, %v1248_v26  ;;  %v1247_v40 = vld [vmem:[#allocation5 + $0x450] sm:$0xff]  ;;  %v1270_v27 = vld [vmem:[#allocation5 + $0x508] sm:$0xff] }
  0xe3   :  { %4145 = vmatpush1.bf16.msra.mxu1 %v4144_v41  ;;  %4019 = vmatprep.subr.bf16.mxu0 %v4018_v42  ;;  %v1251_v41 = vld [vmem:[#allocation5 + $0x470] sm:$0xff]  ;;  %v1254_v42 = vld [vmem:[#allocation5 + $0x488] sm:$0xff] }
  0xe4   :  { %711 = vmatmul.mubr.f32.gmra.mrb[28].mxu0 %v117_v44  ;;  %4147 = vmatprep.subr.bf16.mxu1 %v4146_v43  ;;  %v4160_v51 = vpack.c.bf16 %v1251_v41, %v1247_v40  ;;  %v1267_v26 = vld [vmem:[#allocation5 + $0x4f0] sm:$0xff]  ;;  %v1269_v40 = vld [vmem:[#allocation5 + $0x500] sm:$0xff] }
  0xe5   :  { %1033 = vmatmul.mubr.f32.gmra.mrb[28].mxu1 %v117_v44  ;;  %716 = vmatprep.mubr.f32.mxu0 %v122_v45  ;;  %v1273_v41 = vld [vmem:[#allocation5 + $0x520] sm:$0xff] }
  0xe6   :  { %1038 = vmatprep.mubr.f32.mxu1 %v122_v45  ;;  %4021 = vmatpush1.bf16.msra.mxu0 %v4020_v50  ;;  %v1258_v45 = vld [vmem:[#allocation5 + $0x4a8] sm:$0xff]  ;;  %v4032_v50 = vpack.c.bf16 %v1249_v33, %v1245_v32  ;;  %v1272_v32 = vld [vmem:[#allocation5 + $0x518] sm:$0xff]  ;;  %v4044_v62 = vpack.c.bf16 %v1273_v41, %v1269_v40 }
  0xe7   :  { %4149 = vmatpush1.bf16.msra.mxu1 %v4148_v52  ;;  %4023 = vmatprep.subr.bf16.mxu0 %v4022_v56  ;;  %v1253_v52 = vld [vmem:[#allocation5 + $0x480] sm:$0xff]  ;;  %v4034_v58 = vpack.c.bf16 %v1258_v45, %v1254_v42  ;;  %v1276_v33 = vld [vmem:[#allocation5 + $0x538] sm:$0xff] }
  0xe8   :  { %717 = vmatmul.mubr.f32.gmra.mrb[30].mxu0 %v121_v46  ;;  %4151 = vmatprep.subr.bf16.mxu1 %v4150_v60  ;;  %v1255_v60 = vld [vmem:[#allocation5 + $0x490] sm:$0xff] }
  0xe9   :  { %1039 = vmatmul.mubr.f32.gmra.mrb[30].mxu1 %v121_v46  ;;  %v1256_v46 = vld [vmem:[#allocation5 + $0x498] sm:$0xff] }
  0xea   :  { %4025 = vmatpush1.bf16.msra.mxu0 %v4024_v61  ;;  %v4162_v59 = vpack.c.bf16 %v1260_v47, %v1256_v46  ;;  %v1259_v61 = vld [vmem:[#allocation5 + $0x4b0] sm:$0xff] }
  0xeb   :  { %4153 = vmatpush1.bf16.msra.mxu1 %v4152_v0  ;;  %4027 = vmatprep.subr.bf16.mxu0 %v4026_v4 }
  0xec   :  { %4155 = vmatprep.subr.bf16.mxu1 %v4154_v6  ;;  %v4036_v6 = vpack.c.bf16 %v1257_v53, %v1253_v52  ;;  %v1278_v52 = vld [vmem:[#allocation5 + $0x548] sm:$0xff] }
 0x17f   :  { %v628_v14 = vpop.f32.mrb[0].mxu0 }
 0x180   :  { %v4218_v17 = vadd.f32 %v628_v14, %v5075_v12  ;;  %v5082_v18 = vpop.f32.mrb[0].mxu1  ;;  %v630_v19 = vpop.f32.mrb[1].mxu0  ;;  %v4164_v14 = vpack.c.bf16 %v1259_v61, %v1255_v60 }
 0x181   :  { %v4219_v23 = vadd.f32 %v630_v19, %v5079_v13  ;;  %v5085_v24 = vpop.f32.mrb[1].mxu1 }
 0x182   :  { %v5089_v34 = vmax.f32 %v4218_v17, 0.0 }
 0x183   :  { %v5087_v28 = vmax.f32 %v4219_v23, 0.0  ;;  %v634_v29 = vpop.f32.mrb[2].mxu0  ;;  %v4166_v23 = vpack.c.bf16 %v1268_v3, %v1264_v2  ;;  %v1281_v2 = vld [vmem:[#allocation5 + $0x560] sm:$0xff] }
 0x184   :  { %6390 = vst [vmem:[#allocation11_spill] sm:$0xff] %v5089_v34  ;;  %v4220_v35 = vadd.f32 %v634_v29, %v5075_v12  ;;  %v5092_v36 = vpop.f32.mrb[2].mxu1  ;;  %v636_v37 = vpop.f32.mrb[3].mxu0 }
 0x185   :  { %6389 = vst [vmem:[#allocation10_spill] sm:$0xff] %v5087_v28  ;;  %v4221_v43 = vadd.f32 %v636_v37, %v5079_v13  ;;  %v5095_v44 = vpop.f32.mrb[3].mxu1  ;;  %1451 = vmatprep.mubr.f32.mxu0 %v5087_v28  ;;  %1773 = vmatprep.mubr.f32.mxu1 %v5087_v28  ;;  %v1355_v28 = vld [vmem:[#allocation5 + $0x7b0] sm:$0xff] }
 0x186   :  { %1452 = vmatmul.mubr.f32.vlgmr.msra.gmra.mrb[32].mxu0 %v5089_v34  ;;  %1774 = vmatmul.mubr.f32.vlgmr.msra.gmra.mrb[32].mxu1 %v5089_v34  ;;  %v5103_v54 = vmax.f32 %v4220_v35, 0.0  ;;  %v1358_v34 = vld [vmem:[#allocation5 + $0x7c8] sm:$0xff] }
 0x187   :  { %v5101_v48 = vmax.f32 %v4221_v43, 0.0  ;;  %v640_v49 = vpop.f32.mrb[4].mxu0  ;;  %4029 = vmatpush1.bf16.msra.mxu0 %v4028_v30  ;;  %4157 = vmatpush1.bf16.msra.mxu1 %v4156_v31  ;;  %v1274_v31 = vld [vmem:[#allocation5 + $0x528] sm:$0xff] }
 0x188   :  { %6392 = vst [vmem:[#allocation13_spill] sm:$0xff] %v5103_v54  ;;  %v4222_v55 = vadd.f32 %v640_v49, %v5075_v12  ;;  %v5106_v56 = vpop.f32.mrb[4].mxu1  ;;  %v642_v57 = vpop.f32.mrb[5].mxu0  ;;  %4031 = vmatprep.subr.bf16.mxu0 %v4030_v38  ;;  %4159 = vmatprep.subr.bf16.mxu1 %v4158_v39  ;;  %v4040_v38 = vpack.c.bf16 %v1265_v16, %v1261_v15 }
 0x189   :  { %6391 = vst [vmem:[#allocation12_spill] sm:$0xff] %v5101_v48  ;;  %v4223_v63 = vadd.f32 %v642_v57, %v5079_v13  ;;  %v5109_v0 = vpop.f32.mrb[5].mxu1  ;;  %1457 = vmatprep.mubr.f32.mxu0 %v5101_v48  ;;  %1779 = vmatprep.mubr.f32.mxu1 %v5101_v48  ;;  %v4168_v39 = vpack.c.bf16 %v1267_v26, %v1263_v25  ;;  %v1282_v57 = vld [vmem:[#allocation5 + $0x568] sm:$0xff] }
 0x18a   :  { %1458 = vmatmul.mubr.f32.gmra.mrb[34].mxu0 %v5103_v54  ;;  %1780 = vmatmul.mubr.f32.gmra.mrb[34].mxu1 %v5103_v54  ;;  %v5117_v17 = vmax.f32 %v4222_v55, 0.0  ;;  %v4042_v47 = vpack.c.bf16 %v1274_v31, %v1270_v27  ;;  %v4170_v49 = vpack.c.bf16 %v1276_v33, %v1272_v32  ;;  %v4046_v15 = vpack.c.bf16 %v1282_v57, %v1278_v52  ;;  %v1290_v26 = vld [vmem:[#allocation5 + $0x5a8] sm:$0xff]  ;;  %v1288_v27 = vld [vmem:[#allocation5 + $0x598] sm:$0xff] }
 0x18b   :  { %v5115_v4 = vmax.f32 %v4223_v63, 0.0  ;;  %v646_v5 = vpop.f32.mrb[6].mxu0  ;;  %4033 = vmatpush1.bf16.msra.mxu0 %v4032_v50  ;;  %4161 = vmatpush1.bf16.msra.mxu1 %v4160_v51  ;;  %v1271_v50 = vld [vmem:[#allocation5 + $0x510] sm:$0xff]  ;;  %v4048_v33 = vpack.c.bf16 %v1281_v2, %v1277_v1  ;;  %v1294_v52 = vld [vmem:[#allocation5 + $0x5c8] sm:$0xff] }
 0x18c   :  { %6394 = vst [vmem:[#allocation15_spill] sm:$0xff] %v5117_v17  ;;  %v4224_v19 = vadd.f32 %v646_v5, %v5075_v12  ;;  %v5120_v20 = vpop.f32.mrb[6].mxu1  ;;  %v648_v21 = vpop.f32.mrb[7].mxu0  ;;  %4035 = vmatprep.subr.bf16.mxu0 %v4034_v58  ;;  %4163 = vmatprep.subr.bf16.mxu1 %v4162_v59  ;;  %v1275_v51 = vld [vmem:[#allocation5 + $0x530] sm:$0xff]  ;;  %v1280_v58 = vld [vmem:[#allocation5 + $0x558] sm:$0xff] }
 0x18d   :  { %6393 = vst [vmem:[#allocation14_spill] sm:$0xff] %v5115_v4  ;;  %v4225_v29 = vadd.f32 %v648_v21, %v5079_v13  ;;  %v5123_v30 = vpop.f32.mrb[7].mxu1  ;;  %1463 = vmatprep.mubr.f32.mxu0 %v5115_v4  ;;  %1785 = vmatprep.mubr.f32.mxu1 %v5115_v4  ;;  %v1284_v59 = vld [vmem:[#allocation5 + $0x578] sm:$0xff]  ;;  %v4172_v63 = vpack.c.bf16 %v1275_v51, %v1271_v50  ;;  %v1283_v21 = vld [vmem:[#allocation5 + $0x570] sm:$0xff] }
 0x18e   :  { %1464 = vmatmul.mubr.f32.gmra.mrb[36].mxu0 %v5117_v17  ;;  %1786 = vmatmul.mubr.f32.gmra.mrb[36].mxu1 %v5117_v17  ;;  %v5131_v42 = vmax.f32 %v4224_v19, 0.0  ;;  %v4174_v16 = vpack.c.bf16 %v1284_v59, %v1280_v58  ;;  %v1279_v19 = vld [vmem:[#allocation5 + $0x550] sm:$0xff]  ;;  %v1298_v58 = vld [vmem:[#allocation5 + $0x5e8] sm:$0xff]  ;;  %v1296_v59 = vld [vmem:[#allocation5 + $0x5d8] sm:$0xff] }
 0x18f   :  { %v5129_v35 = vmax.f32 %v4225_v29, 0.0  ;;  %v652_v37 = vpop.f32.mrb[8].mxu0  ;;  %4037 = vmatpush1.bf16.msra.mxu0 %v4036_v6  ;;  %4165 = vmatpush1.bf16.msra.mxu1 %v4164_v14  ;;  %v1292_v29 = vld [vmem:[#allocation5 + $0x5b8] sm:$0xff]  ;;  %v1287_v50 = vld [vmem:[#allocation5 + $0x590] sm:$0xff]  ;;  %v1350_v17 = vld [vmem:[#allocation5 + $0x788] sm:$0xff] }
 0x190   :  { %6396 = vst [vmem:[#allocation17_spill] sm:$0xff] %v5131_v42  ;;  %v4226_v43 = vadd.f32 %v652_v37, %v5075_v12  ;;  %v5134_v45 = vpop.f32.mrb[8].mxu1  ;;  %v654_v46 = vpop.f32.mrb[9].mxu0  ;;  %4039 = vmatprep.subr.bf16.mxu0 %v4038_v22  ;;  %4167 = vmatprep.subr.bf16.mxu1 %v4166_v23  ;;  %v1286_v22 = vld [vmem:[#allocation5 + $0x588] sm:$0xff]  ;;  %v4176_v37 = vpack.c.bf16 %v1283_v21, %v1279_v19  ;;  %v1291_v51 = vld [vmem:[#allocation5 + $0x5b0] sm:$0xff] }
 0x191   :  { %6395 = vst [vmem:[#allocation16_spill] sm:$0xff] %v5129_v35  ;;  %v4227_v53 = vadd.f32 %v654_v46, %v5079_v13  ;;  %v5137_v55 = vpop.f32.mrb[9].mxu1  ;;  %1469 = vmatprep.mubr.f32.mxu0 %v5129_v35  ;;  %1791 = vmatprep.mubr.f32.mxu1 %v5129_v35  ;;  %v4180_v2 = vpack.c.bf16 %v1291_v51, %v1287_v50  ;;  %v1301_v50 = vld [vmem:[#allocation5 + $0x600] sm:$0xff]  ;;  %v1339_v35 = vld [vmem:[#allocation5 + $0x730] sm:$0xff] }
 0x192   :  { %1470 = vmatmul.mubr.f32.gmra.mrb[38].mxu0 %v5131_v42  ;;  %1792 = vmatmul.mubr.f32.gmra.mrb[38].mxu1 %v5131_v42  ;;  %v5145_v3 = vmax.f32 %v4226_v43, 0.0  ;;  %v1305_v51 = vld [vmem:[#allocation5 + $0x620] sm:$0xff]  ;;  %v1342_v42 = vld [vmem:[#allocation5 + $0x748] sm:$0xff]  ;;  %v1347_v4 = vld [vmem:[#allocation5 + $0x770] sm:$0xff] }
 0x193   :  { %v5143_v60 = vmax.f32 %v4227_v53, 0.0  ;;  %v658_v61 = vpop.f32.mrb[10].mxu0  ;;  %4041 = vmatpush1.bf16.msra.mxu0 %v4040_v38  ;;  %4169 = vmatpush1.bf16.msra.mxu1 %v4168_v39  ;;  %v1285_v38 = vld [vmem:[#allocation5 + $0x580] sm:$0xff] }
 0x194   :  { %6398 = vst [vmem:[#allocation19_spill] sm:$0xff] %v5145_v3  ;;  %v4228_v5 = vadd.f32 %v658_v61, %v5075_v12  ;;  %v5148_v6 = vpop.f32.mrb[10].mxu1  ;;  %v660_v14 = vpop.f32.mrb[11].mxu0  ;;  %4043 = vmatprep.subr.bf16.mxu0 %v4042_v47  ;;  %4171 = vmatprep.subr.bf16.mxu1 %v4170_v49  ;;  %v1289_v39 = vld [vmem:[#allocation5 + $0x5a0] sm:$0xff]  ;;  %v4050_v47 = vpack.c.bf16 %v1290_v26, %v1286_v22  ;;  %v1300_v61 = vld [vmem:[#allocation5 + $0x5f8] sm:$0xff]  ;;  %v1295_v26 = vld [vmem:[#allocation5 + $0x5d0] sm:$0xff] }
 0x195   :  { %6397 = vst [vmem:[#allocation18_spill] sm:$0xff] %v5143_v60  ;;  %v4229_v23 = vadd.f32 %v660_v14, %v5079_v13  ;;  %v5151_v25 = vpop.f32.mrb[11].mxu1  ;;  %1475 = vmatprep.mubr.f32.mxu0 %v5143_v60  ;;  %1797 = vmatprep.mubr.f32.mxu1 %v5143_v60  ;;  %v4178_v49 = vpack.c.bf16 %v1292_v29, %v1288_v27  ;;  %v1297_v14 = vld [vmem:[#allocation5 + $0x5e0] sm:$0xff]  ;;  %v1299_v27 = vld [vmem:[#allocation5 + $0x5f0] sm:$0xff]  ;;  %v1302_v29 = vld [vmem:[#allocation5 + $0x608] sm:$0xff] }
 0x196   :  { %1476 = vmatmul.mubr.f32.gmra.mrb[40].mxu0 %v5145_v3  ;;  %1798 = vmatmul.mubr.f32.gmra.mrb[40].mxu1 %v5145_v3  ;;  %v5159_v40 = vmax.f32 %v4228_v5, 0.0  ;;  %v4052_v1 = vpack.c.bf16 %v1289_v39, %v1285_v38  ;;  %v1293_v5 = vld [vmem:[#allocation5 + $0x5c0] sm:$0xff]  ;;  %v4054_v22 = vpack.c.bf16 %v1298_v58, %v1294_v52  ;;  %v1304_v38 = vld [vmem:[#allocation5 + $0x618] sm:$0xff]  ;;  %v1331_v60 = vld [vmem:[#allocation5 + $0x6f0] sm:$0xff] }
 0x197   :  { %v5157_v31 = vmax.f32 %v4229_v23, 0.0  ;;  %v664_v32 = vpop.f32.mrb[12].mxu0  ;;  %4045 = vmatpush1.bf16.msra.mxu0 %v4044_v62  ;;  %4173 = vmatpush1.bf16.msra.mxu1 %v4172_v63  ;;  %v4182_v23 = vpack.c.bf16 %v1300_v61, %v1296_v59  ;;  %v1308_v39 = vld [vmem:[#allocation5 + $0x638] sm:$0xff]  ;;  %v1334_v3 = vld [vmem:[#allocation5 + $0x708] sm:$0xff] }
 0x198   :  { %6400 = vst [vmem:[#allocation21_spill] sm:$0xff] %v5159_v40  ;;  %v4230_v41 = vadd.f32 %v664_v32, %v5075_v12  ;;  %v5162_v43 = vpop.f32.mrb[12].mxu1  ;;  %v666_v46 = vpop.f32.mrb[13].mxu0  ;;  %4047 = vmatprep.subr.bf16.mxu0 %v4046_v15  ;;  %4175 = vmatprep.subr.bf16.mxu1 %v4174_v16 }
 0x199   :  { %6399 = vst [vmem:[#allocation20_spill] sm:$0xff] %v5157_v31  ;;  %v4231_v53 = vadd.f32 %v666_v46, %v5079_v13  ;;  %v5165_v57 = vpop.f32.mrb[13].mxu1  ;;  %1481 = vmatprep.mubr.f32.mxu0 %v5157_v31  ;;  %1803 = vmatprep.mubr.f32.mxu1 %v5157_v31  ;;  %v1323_v31 = vld [vmem:[#allocation5 + $0x6b0] sm:$0xff] }
 0x19a   :  { %1482 = vmatmul.mubr.f32.gmra.mrb[42].mxu0 %v5159_v40  ;;  %1804 = vmatmul.mubr.f32.gmra.mrb[42].mxu1 %v5159_v40  ;;  %v5173_v15 = vmax.f32 %v4230_v41, 0.0  ;;  %v1326_v40 = vld [vmem:[#allocation5 + $0x6c8] sm:$0xff] }
 0x19b   :  { %v5171_v62 = vmax.f32 %v4231_v53, 0.0  ;;  %v670_v63 = vpop.f32.mrb[14].mxu0  ;;  %4049 = vmatpush1.bf16.msra.mxu0 %v4048_v33  ;;  %4177 = vmatpush1.bf16.msra.mxu1 %v4176_v37  ;;  %v1306_v37 = vld [vmem:[#allocation5 + $0x628] sm:$0xff] }
 0x19c   :  { %6402 = vst [vmem:[#allocation23_spill] sm:$0xff] %v5173_v15  ;;  %v4232_v16 = vadd.f32 %v670_v63, %v5075_v12  ;;  %v5176_v19 = vpop.f32.mrb[14].mxu1  ;;  %v672_v21 = vpop.f32.mrb[15].mxu0  ;;  %4051 = vmatprep.subr.bf16.mxu0 %v4050_v47  ;;  %4179 = vmatprep.subr.bf16.mxu1 %v4178_v49  ;;  %v4056_v47 = vpack.c.bf16 %v1297_v14, %v1293_v5  ;;  %v1314_v5 = vld [vmem:[#allocation5 + $0x668] sm:$0xff]  ;;  %v1312_v14 = vld [vmem:[#allocation5 + $0x658] sm:$0xff] }
 0x19d   :  { %6401 = vst [vmem:[#allocation22_spill] sm:$0xff] %v5171_v62  ;;  %v4233_v32 = vadd.f32 %v672_v21, %v5079_v13  ;;  %v5179_v33 = vpop.f32.mrb[15].mxu1  ;;  %1487 = vmatprep.mubr.f32.mxu0 %v5171_v62  ;;  %1809 = vmatprep.mubr.f32.mxu1 %v5171_v62  ;;  %v4184_v49 = vpack.c.bf16 %v1299_v27, %v1295_v26  ;;  %v1303_v21 = vld [vmem:[#allocation5 + $0x610] sm:$0xff] }
 0x19e   :  { %1488 = vmatmul.mubr.f32.gmra.mrb[44].mxu0 %v5173_v15  ;;  %1810 = vmatmul.mubr.f32.gmra.mrb[44].mxu1 %v5173_v15  ;;  %v5187_v52 = vmax.f32 %v4232_v16, 0.0  ;;  %v4058_v61 = vpack.c.bf16 %v1306_v37, %v1302_v29  ;;  %v4186_v63 = vpack.c.bf16 %v1308_v39, %v1304_v38  ;;  %v1316_v16 = vld [vmem:[#allocation5 + $0x678] sm:$0xff]  ;;  %v4060_v26 = vpack.c.bf16 %v1305_v51, %v1301_v50  ;;  %v1309_v29 = vld [vmem:[#allocation5 + $0x640] sm:$0xff]  ;;  %v1315_v62 = vld [vmem:[#allocation5 + $0x670] sm:$0xff] }
 0x19f   :  { %v5185_v41 = vmax.f32 %v4233_v32, 0.0  ;;  %v676_v46 = vpop.f32.mrb[16].mxu0  ;;  %4053 = vmatpush1.bf16.msra.mxu0 %v4052_v1  ;;  %4181 = vmatpush1.bf16.msra.mxu1 %v4180_v2  ;;  %v1307_v32 = vld [vmem:[#allocation5 + $0x630] sm:$0xff]  ;;  %v1313_v37 = vld [vmem:[#allocation5 + $0x660] sm:$0xff]  ;;  %v1318_v15 = vld [vmem:[#allocation5 + $0x688] sm:$0xff] }
 0x1a0   :  { %6404 = vst [vmem:[#allocation25_spill] sm:$0xff] %v5187_v52  ;;  %v4234_v53 = vadd.f32 %v676_v46, %v5075_v12  ;;  %v5190_v58 = vpop.f32.mrb[16].mxu1  ;;  %v678_v59 = vpop.f32.mrb[17].mxu0  ;;  %4055 = vmatprep.subr.bf16.mxu0 %v4054_v22  ;;  %4183 = vmatprep.subr.bf16.mxu1 %v4182_v23  ;;  %v4188_v27 = vpack.c.bf16 %v1307_v32, %v1303_v21  ;;  %v1322_v50 = vld [vmem:[#allocation5 + $0x6a8] sm:$0xff]  ;;  %v1320_v51 = vld [vmem:[#allocation5 + $0x698] sm:$0xff]  ;;  %v1317_v32 = vld [vmem:[#allocation5 + $0x680] sm:$0xff] }
 0x1a1   :  { %6403 = vst [vmem:[#allocation24_spill] sm:$0xff] %v5185_v41  ;;  %v4235_v1 = vadd.f32 %v678_v59, %v5079_v13  ;;  %v5193_v2 = vpop.f32.mrb[17].mxu1  ;;  %1493 = vmatprep.mubr.f32.mxu0 %v5185_v41  ;;  %1815 = vmatprep.mubr.f32.mxu1 %v5185_v41  ;;  %v4062_v41 = vpack.c.bf16 %v1314_v5, %v1310_v7  ;;  %v1321_v5 = vld [vmem:[#allocation5 + $0x6a0] sm:$0xff] }
 0x1a2   :  { %1494 = vmatmul.mubr.f32.gmra.mrb[46].mxu0 %v5187_v52  ;;  %1816 = vmatmul.mubr.f32.gmra.mrb[46].mxu1 %v5187_v52  ;;  %v5201_v38 = vmax.f32 %v4234_v53, 0.0  ;;  %v4190_v52 = vpack.c.bf16 %v1316_v16, %v1312_v14  ;;  %v1324_v53 = vld [vmem:[#allocation5 + $0x6b8] sm:$0xff] }
 0x1a3   :  { %v5199_v22 = vmax.f32 %v4235_v1, 0.0  ;;  %v682_v23 = vpop.f32.mrb[18].mxu0  ;;  %4057 = vmatpush1.bf16.msra.mxu0 %v4056_v47  ;;  %4185 = vmatpush1.bf16.msra.mxu1 %v4184_v49  ;;  %v1311_v1 = vld [vmem:[#allocation5 + $0x650] sm:$0xff] }
 0x1a4   :  { %6406 = vst [vmem:[#allocation27_spill] sm:$0xff] %v5201_v38  ;;  %v4236_v39 = vadd.f32 %v682_v23, %v5075_v12  ;;  %v5204_v46 = vpop.f32.mrb[18].mxu1  ;;  %v684_v59 = vpop.f32.mrb[19].mxu0  ;;  %4059 = vmatprep.subr.bf16.mxu0 %v4058_v61  ;;  %4187 = vmatprep.subr.bf16.mxu1 %v4186_v63  ;;  %v4064_v63 = vpack.c.bf16 %v1313_v37, %v1309_v29  ;;  %v1328_v29 = vld [vmem:[#allocation5 + $0x6d8] sm:$0xff] }
 0x1a5   :  { %6405 = vst [vmem:[#allocation26_spill] sm:$0xff] %v5199_v22  ;;  %v4237_v47 = vadd.f32 %v684_v59, %v5079_v13  ;;  %v5207_v49 = vpop.f32.mrb[19].mxu1  ;;  %1499 = vmatprep.mubr.f32.mxu0 %v5199_v22  ;;  %1821 = vmatprep.mubr.f32.mxu1 %v5199_v22  ;;  %v4192_v21 = vpack.c.bf16 %v1315_v62, %v1311_v1  ;;  %v1330_v62 = vld [vmem:[#allocation5 + $0x6e8] sm:$0xff]  ;;  %v1332_v37 = vld [vmem:[#allocation5 + $0x6f8] sm:$0xff]  ;;  %v1325_v1 = vld [vmem:[#allocation5 + $0x6c0] sm:$0xff] }
 0x1a6   :  { %1500 = vmatmul.mubr.f32.gmra.mrb[48].mxu0 %v5201_v38  ;;  %1822 = vmatmul.mubr.f32.gmra.mrb[48].mxu1 %v5201_v38  ;;  %v5215_v14 = vmax.f32 %v4236_v39, 0.0  ;;  %v4066_v22 = vpack.c.bf16 %v1322_v50, %v1318_v15  ;;  %v4194_v38 = vpack.c.bf16 %v1324_v53, %v1320_v51  ;;  %v1329_v50 = vld [vmem:[#allocation5 + $0x6e0] sm:$0xff] }
 0x1a7   :  { %v5213_v7 = vmax.f32 %v4237_v47, 0.0  ;;  %v688_v61 = vpop.f32.mrb[20].mxu0  ;;  %4061 = vmatpush1.bf16.msra.mxu0 %v4060_v26  ;;  %4189 = vmatpush1.bf16.msra.mxu1 %v4188_v27  ;;  %v1319_v47 = vld [vmem:[#allocation5 + $0x690] sm:$0xff] }
 0x1a8   :  { %6408 = vst [vmem:[#allocation29_spill] sm:$0xff] %v5215_v14  ;;  %v4238_v16 = vadd.f32 %v688_v61, %v5075_v12  ;;  %v5218_v23 = vpop.f32.mrb[20].mxu1  ;;  %v690_v59 = vpop.f32.mrb[21].mxu0  ;;  %4063 = vmatprep.subr.bf16.mxu0 %v4062_v41  ;;  %4191 = vmatprep.subr.bf16.mxu1 %v4190_v52  ;;  %v4068_v52 = vpack.c.bf16 %v1321_v5, %v1317_v32  ;;  %v1336_v32 = vld [vmem:[#allocation5 + $0x718] sm:$0xff] }
 0x1a9   :  { %6407 = vst [vmem:[#allocation28_spill] sm:$0xff] %v5213_v7  ;;  %v4239_v26 = vadd.f32 %v690_v59, %v5079_v13  ;;  %v5221_v27 = vpop.f32.mrb[21].mxu1  ;;  %1505 = vmatprep.mubr.f32.mxu0 %v5213_v7  ;;  %1827 = vmatprep.mubr.f32.mxu1 %v5213_v7  ;;  %v4196_v39 = vpack.c.bf16 %v1323_v31, %v1319_v47  ;;  %v1338_v31 = vld [vmem:[#allocation5 + $0x728] sm:$0xff]  ;;  %v1340_v5 = vld [vmem:[#allocation5 + $0x738] sm:$0xff]  ;;  %v1333_v47 = vld [vmem:[#allocation5 + $0x700] sm:$0xff] }
 0x1aa   :  { %1506 = vmatmul.mubr.f32.gmra.mrb[50].mxu0 %v5215_v14  ;;  %1828 = vmatmul.mubr.f32.gmra.mrb[50].mxu1 %v5215_v14  ;;  %v5229_v51 = vmax.f32 %v4238_v16, 0.0  ;;  %v4070_v7 = vpack.c.bf16 %v1330_v62, %v1326_v40  ;;  %v4198_v14 = vpack.c.bf16 %v1332_v37, %v1328_v29  ;;  %v1337_v62 = vld [vmem:[#allocation5 + $0x720] sm:$0xff] }
 0x1ab   :  { %v5227_v15 = vmax.f32 %v4239_v26, 0.0  ;;  %v694_v41 = vpop.f32.mrb[22].mxu0  ;;  %4065 = vmatpush1.bf16.msra.mxu0 %v4064_v63  ;;  %4193 = vmatpush1.bf16.msra.mxu1 %v4192_v21  ;;  %v1327_v26 = vld [vmem:[#allocation5 + $0x6d0] sm:$0xff] }
 0x1ac   :  { %6410 = vst [vmem:[#allocation31_spill] sm:$0xff] %v5229_v51  ;;  %v4240_v53 = vadd.f32 %v694_v41, %v5075_v12  ;;  %v5232_v61 = vpop.f32.mrb[22].mxu1  ;;  %v696_v59 = vpop.f32.mrb[23].mxu0  ;;  %4067 = vmatprep.subr.bf16.mxu0 %v4066_v22  ;;  %4195 = vmatprep.subr.bf16.mxu1 %v4194_v38  ;;  %v4072_v38 = vpack.c.bf16 %v1329_v50, %v1325_v1  ;;  %v1344_v1 = vld [vmem:[#allocation5 + $0x758] sm:$0xff] }
 0x1ad   :  { %6409 = vst [vmem:[#allocation30_spill] sm:$0xff] %v5227_v15  ;;  %v4241_v63 = vadd.f32 %v696_v59, %v5079_v13  ;;  %v5235_v21 = vpop.f32.mrb[23].mxu1  ;;  %1511 = vmatprep.mubr.f32.mxu0 %v5227_v15  ;;  %1833 = vmatprep.mubr.f32.mxu1 %v5227_v15  ;;  %v4200_v16 = vpack.c.bf16 %v1331_v60, %v1327_v26  ;;  %v1346_v60 = vld [vmem:[#allocation5 + $0x768] sm:$0xff]  ;;  %v1348_v50 = vld [vmem:[#allocation5 + $0x778] sm:$0xff]  ;;  %v1341_v26 = vld [vmem:[#allocation5 + $0x740] sm:$0xff] }
 0x1ae   :  { %1512 = vmatmul.mubr.f32.gmra.mrb[52].mxu0 %v5229_v51  ;;  %1834 = vmatmul.mubr.f32.gmra.mrb[52].mxu1 %v5229_v51  ;;  %v5243_v29 = vmax.f32 %v4240_v53, 0.0  ;;  %v4074_v15 = vpack.c.bf16 %v1338_v31, %v1334_v3  ;;  %v4202_v51 = vpack.c.bf16 %v1340_v5, %v1336_v32  ;;  %v1345_v31 = vld [vmem:[#allocation5 + $0x760] sm:$0xff] }
 0x1af   :  { %v5241_v40 = vmax.f32 %v4241_v63, 0.0  ;;  %v700_v22 = vpop.f32.mrb[24].mxu0  ;;  %4069 = vmatpush1.bf16.msra.mxu0 %v4068_v52  ;;  %4197 = vmatpush1.bf16.msra.mxu1 %v4196_v39  ;;  %v1335_v63 = vld [vmem:[#allocation5 + $0x710] sm:$0xff] }
 0x1b0   :  { %6412 = vst [vmem:[#allocation33_spill] sm:$0xff] %v5243_v29  ;;  %v4242_v37 = vadd.f32 %v700_v22, %v5075_v12  ;;  %v5246_v41 = vpop.f32.mrb[24].mxu1  ;;  %v702_v59 = vpop.f32.mrb[25].mxu0  ;;  %4071 = vmatprep.subr.bf16.mxu0 %v4070_v7  ;;  %4199 = vmatprep.subr.bf16.mxu1 %v4198_v14  ;;  %v4076_v14 = vpack.c.bf16 %v1337_v62, %v1333_v47  ;;  %v1354_v47 = vld [vmem:[#allocation5 + $0x7a8] sm:$0xff]  ;;  %v1352_v62 = vld [vmem:[#allocation5 + $0x798] sm:$0xff] }
 0x1b1   :  { %6411 = vst [vmem:[#allocation32_spill] sm:$0xff] %v5241_v40  ;;  %v4243_v52 = vadd.f32 %v702_v59, %v5079_v13  ;;  %v5249_v39 = vpop.f32.mrb[25].mxu1  ;;  %1517 = vmatprep.mubr.f32.mxu0 %v5241_v40  ;;  %1839 = vmatprep.mubr.f32.mxu1 %v5241_v40  ;;  %v4204_v53 = vpack.c.bf16 %v1339_v35, %v1335_v63 }
 0x1b2   :  { %1518 = vmatmul.mubr.f32.gmra.mrb[54].mxu0 %v5243_v29  ;;  %1840 = vmatmul.mubr.f32.gmra.mrb[54].mxu1 %v5243_v29  ;;  %v5257_v32 = vmax.f32 %v4242_v37, 0.0  ;;  %v4078_v40 = vpack.c.bf16 %v1346_v60, %v1342_v42  ;;  %v4206_v29 = vpack.c.bf16 %v1348_v50, %v1344_v1  ;;  %v5273_v42 = vsub.s32 2, %v5060_v8  ;;  %v1349_v1 = vld [vmem:[#allocation5 + $0x780] sm:$0xff] }
 0x1b3   :  { %v5255_v3 = vmax.f32 %v4243_v52, 0.0  ;;  %v706_v7 = vpop.f32.mrb[26].mxu0  ;;  %4073 = vmatpush1.bf16.msra.mxu0 %v4072_v38  ;;  %4201 = vmatpush1.bf16.msra.mxu1 %v4200_v16  ;;  %v1343_v52 = vld [vmem:[#allocation5 + $0x750] sm:$0xff]  ;;  %v5263_v38 = vsub.s32 3, %v5060_v8  ;;  %v4080_v63 = vpack.c.bf16 %v1345_v31, %v1341_v26  ;;  %v1353_v50 = vld [vmem:[#allocation5 + $0x7a0] sm:$0xff]  ;;  %v1362_v26 = vld [vmem:[#allocation5 + $0x7e8] sm:$0xff] }
 0x1b4   :  { %6414 = vst [vmem:[#allocation35_spill] sm:$0xff] %v5257_v32  ;;  %v4244_v5 = vadd.f32 %v706_v7, %v5075_v12  ;;  %v5260_v22 = vpop.f32.mrb[26].mxu1  ;;  %v708_v59 = vpop.f32.mrb[27].mxu0  ;;  %4075 = vmatprep.subr.bf16.mxu0 %v4074_v15  ;;  %4203 = vmatprep.subr.bf16.mxu1 %v4202_v51  ;;  %v1356_v15 = vld [vmem:[#allocation5 + $0x7b8] sm:$0xff]  ;;  %v4208_v60 = vpack.c.bf16 %v1347_v4, %v1343_v52  ;;  %v1361_v8 = vld [vmem:[#allocation5 + $0x7e0] sm:$0xff] }
 0x1b5   :  { %6413 = vst [vmem:[#allocation34_spill] sm:$0xff] %v5255_v3  ;;  %v4245_v35 = vadd.f32 %v708_v59, %v5079_v13  ;;  %v5266_v16 = vpop.f32.mrb[27].mxu1  ;;  %1523 = vmatprep.mubr.f32.mxu0 %v5255_v3  ;;  %1845 = vmatprep.mubr.f32.mxu1 %v5255_v3  ;;  %v4210_v54 = vpack.c.bf16 %v1356_v15, %v1352_v62 }
 0x1b6   :  { %1524 = vmatmul.mubr.f32.gmra.mrb[56].mxu0 %v5257_v32  ;;  %1846 = vmatmul.mubr.f32.gmra.mrb[56].mxu1 %v5257_v32  ;;  %v5277_v7 = vmax.f32 %v4244_v5, 0.0  ;;  %v4082_v32 = vpack.c.bf16 %v1354_v47, %v1350_v17  ;;  %v5295_v17 = vrot.slane %v5068_v10, %v5273_v42  ;;  %v4084_v5 = vpack.c.bf16 %v1353_v50, %v1349_v1 }
 0x1b7   :  { %v5275_v51 = vmax.f32 %v4245_v35, 0.0  ;;  %v712_v37 = vpop.f32.mrb[28].mxu0  ;;  %4077 = vmatpush1.bf16.msra.mxu0 %v4076_v14  ;;  %4205 = vmatpush1.bf16.msra.mxu1 %v4204_v53  ;;  %v1351_v35 = vld [vmem:[#allocation5 + $0x790] sm:$0xff]  ;;  %v5284_v14 = vrot.slane %v5068_v10, %v5263_v38  ;;  %v1357_v10 = vld [vmem:[#allocation5 + $0x7c0] sm:$0xff] }
 0x1b8   :  { %6416 = vst [vmem:[#allocation37_spill] sm:$0xff] %v5277_v7  ;;  %v4246_v59 = vadd.f32 %v712_v37, %v5075_v12  ;;  %v5280_v3 = vpop.f32.mrb[28].mxu1  ;;  %v714_v48 = vpop.f32.mrb[29].mxu0  ;;  %4079 = vmatprep.subr.bf16.mxu0 %v4078_v40  ;;  %4207 = vmatprep.subr.bf16.mxu1 %v4206_v29  ;;  %v1360_v40 = vld [vmem:[#allocation5 + $0x7d8] sm:$0xff]  ;;  %v4212_v52 = vpack.c.bf16 %v1355_v28, %v1351_v35  ;;  %v1363_v28 = vld [vmem:[#allocation5 + $0x7f0] sm:$0xff] }
 0x1b9   :  { %6415 = vst [vmem:[#allocation36_spill] sm:$0xff] %v5275_v51  ;;  %v4247_v4 = vadd.f32 %v714_v48, %v5079_v13  ;;  %v5287_v53 = vpop.f32.mrb[29].mxu1  ;;  %1529 = vmatprep.mubr.f32.mxu0 %v5275_v51  ;;  %1851 = vmatprep.mubr.f32.mxu1 %v5275_v51  ;;  %v1364_v29 = vld [vmem:[#allocation5 + $0x7f8] sm:$0xff]  ;;  %v4086_v51 = vpack.c.bf16 %v1362_v26, %v1358_v34 }
 0x1ba   :  { %1530 = vmatmul.mubr.f32.gmra.mrb[58].mxu0 %v5277_v7  ;;  %1852 = vmatmul.mubr.f32.gmra.mrb[58].mxu1 %v5277_v7  ;;  %v5299_v47 = vmax.f32 %v4246_v59, 0.0  ;;  %v4214_v7 = vpack.c.bf16 %v1364_v29, %v1360_v40  ;;  %v4253_v50 = vadd.f32 %v5095_v44, %v5284_v14  ;;  %v4254_v59 = vadd.f32 %v5106_v56, %v5295_v17 }
 0x1bb   :  { %v5297_v31 = vmax.f32 %v4247_v4, 0.0  ;;  %v718_v48 = vpop.f32.mrb[30].mxu0  ;;  %4081 = vmatpush1.bf16.msra.mxu0 %v4080_v63  ;;  %4209 = vmatpush1.bf16.msra.mxu1 %v4208_v60  ;;  %v4251_v4 = vadd.f32 %v5085_v24, %v5284_v14  ;;  %v4257_v35 = vadd.f32 %v5123_v30, %v5284_v14  ;;  %v4256_v26 = vadd.f32 %v5120_v20, %v5295_v17 }
 0x1bc   :  { %6418 = vst [vmem:[#allocation39_spill] sm:$0xff] %v5299_v47  ;;  %v4248_v62 = vadd.f32 %v718_v48, %v5075_v12  ;;  %v5302_v15 = vpop.f32.mrb[30].mxu1  ;;  %v720_v37 = vpop.f32.mrb[31].mxu0  ;;  %4083 = vmatprep.subr.bf16.mxu0 %v4082_v32  ;;  %4211 = vmatprep.subr.bf16.mxu1 %v4210_v54  ;;  %v1359_v12 = vld [vmem:[#allocation5 + $0x7d0] sm:$0xff]  ;;  %v4088_v54 = vpack.c.bf16 %v1361_v8, %v1357_v10  ;;  %v5333_v44 = vmax.f32 %v4253_v50, 0.0 }
 0x1bd   :  { %6417 = vst [vmem:[#allocation38_spill] sm:$0xff] %v5297_v31  ;;  %v4249_v63 = vadd.f32 %v720_v37, %v5079_v13  ;;  %v5307_v60 = vpop.f32.mrb[31].mxu1  ;;  %1535 = vmatprep.mubr.f32.mxu0 %v5297_v31  ;;  %1857 = vmatprep.mubr.f32.mxu1 %v5297_v31  ;;  %v4250_v13 = vadd.f32 %v5082_v18, %v5295_v17  ;;  %v5319_v1 = vmax.f32 %v4251_v4, 0.0  ;;  %v5357_v56 = vmax.f32 %v4257_v35, 0.0 }
 0x1be   :  { %1536 = vmatmul.mubr.f32.gmra.mrb[60].mxu0 %v5299_v47  ;;  %1858 = vmatmul.mubr.f32.gmra.mrb[60].mxu1 %v5299_v47  ;;  %v5317_v24 = vmax.f32 %v4248_v62, 0.0  ;;  %v4216_v32 = vpack.c.bf16 %v1363_v28, %v1359_v12  ;;  %v4252_v18 = vadd.f32 %v5092_v36, %v5295_v17  ;;  %v4259_v40 = vadd.f32 %v5137_v55, %v5284_v14 }
 0x1bf   :  { %v5313_v34 = vmax.f32 %v4249_v63, 0.0  ;;  %4085 = vmatpush1.bf16.msra.mxu0 %v4084_v5  ;;  %4213 = vmatpush1.bf16.msra.mxu1 %v4212_v52  ;;  %v5328_v8 = vmax.f32 %v4250_v13, 0.0  ;;  %v5364_v30 = vmax.f32 %v4256_v26, 0.0  ;;  %v4258_v29 = vadd.f32 %v5134_v45, %v5295_v17 }
 0x1c0   :  { %6420 = vst [vmem:[#allocation41_spill] sm:$0xff] %v5317_v24  ;;  %4087 = vmatprep.subr.bf16.mxu0 %v4086_v51  ;;  %4215 = vmatprep.subr.bf16.mxu1 %v4214_v7  ;;  %v4255_v51 = vadd.f32 %v5109_v0, %v5284_v14  ;;  %v5340_v7 = vmax.f32 %v4252_v18, 0.0  ;;  %v5352_v0 = vmax.f32 %v4254_v59, 0.0  ;;  %v5369_v20 = vmax.f32 %v4259_v40, 0.0 }
 0x1c1   :  { %6419 = vst [vmem:[#allocation40_spill] sm:$0xff] %v5313_v34  ;;  %1541 = vmatprep.mubr.f32.mxu0 %v5313_v34  ;;  %1863 = vmatprep.mubr.f32.mxu1 %v5313_v34  ;;  %v4261_v48 = vadd.f32 %v5151_v25, %v5284_v14  ;;  %v5376_v55 = vmax.f32 %v4258_v29, 0.0  ;;  %v4260_v5 = vadd.f32 %v5148_v6, %v5295_v17 }
 0x1c2   :  { %1542 = vmatmul.mubr.f32.gmra.mrb[62].mxu0 %v5317_v24  ;;  %1864 = vmatmul.mubr.f32.gmra.mrb[62].mxu1 %v5317_v24  ;;  %v5345_v36 = vmax.f32 %v4255_v51, 0.0  ;;  %v4263_v52 = vadd.f32 %v5165_v57, %v5284_v14  ;;  %v4262_v62 = vadd.f32 %v5162_v43, %v5295_v17  ;;  %v4265_v37 = vadd.f32 %v5179_v33, %v5284_v14 }
 0x1c3   :  { %4089 = vmatpush1.bf16.msra.mxu0 %v4088_v54  ;;  %1612 = vmatprep.mubr.f32.mxu0 %v5319_v1  ;;  %v5381_v45 = vmax.f32 %v4261_v48, 0.0  ;;  %v5388_v25 = vmax.f32 %v4260_v5, 0.0  ;;  %v4264_v10 = vadd.f32 %v5176_v19, %v5295_v17  ;;  %v4267_v4 = vadd.f32 %v5193_v2, %v5284_v14 }
 0x1c4   :  { %4217 = vmatpush1.bf16.msra.mxu1 %v4216_v32  ;;  %1934 = vmatprep.mubr.f32.mxu1 %v5319_v1  ;;  %v5393_v6 = vmax.f32 %v4263_v52, 0.0  ;;  %v5400_v57 = vmax.f32 %v4262_v62, 0.0  ;;  %v5405_v43 = vmax.f32 %v4265_v37, 0.0  ;;  %v4266_v63 = vadd.f32 %v5190_v58, %v5295_v17 }
 0x1c5   :  { %6421 = vst [vmem:[#allocation42_spill] sm:$0xff] %v5381_v45  ;;  %v5412_v33 = vmax.f32 %v4264_v10, 0.0  ;;  %v5417_v19 = vmax.f32 %v4267_v4, 0.0  ;;  %v4269_v12 = vadd.f32 %v5207_v49, %v5284_v14  ;;  %v4268_v28 = vadd.f32 %v5204_v46, %v5295_v17 }
 0x1c6   :  { %1613 = vmatmul.mubr.f32.vlgmr.msra.gmra.mrb[32].mxu0 %v5328_v8  ;;  %6422 = vst [vmem:[#allocation43_spill] sm:$0xff] %v5393_v6  ;;  %6423 = vst [vmem:[#allocation44_spill] sm:$0xff] %v5400_v57  ;;  %v5424_v2 = vmax.f32 %v4266_v63, 0.0  ;;  %v4271_v54 = vadd.f32 %v5221_v27, %v5284_v14  ;;  %v4270_v13 = vadd.f32 %v5218_v23, %v5295_v17 }
 0x1c7   :  { %1935 = vmatmul.mubr.f32.vlgmr.msra.gmra.mrb[32].mxu1 %v5328_v8  ;;  %1618 = vmatprep.mubr.f32.mxu0 %v5333_v44  ;;  %6424 = vst [vmem:[#allocation45_spill] sm:$0xff] %v5405_v43  ;;  %6425 = vst [vmem:[#allocation46_spill] sm:$0xff] %v5412_v33  ;;  %v5429_v58 = vmax.f32 %v4269_v12, 0.0  ;;  %v5436_v49 = vmax.f32 %v4268_v28, 0.0  ;;  %v4273_v32 = vadd.f32 %v5235_v21, %v5284_v14 }
 0x1c8   :  { %1940 = vmatprep.mubr.f32.mxu1 %v5333_v44  ;;  %6426 = vst [vmem:[#allocation47_spill] sm:$0xff] %v5417_v19  ;;  %6427 = vst [vmem:[#allocation48_spill] sm:$0xff] %v5424_v2  ;;  %v5441_v46 = vmax.f32 %v4271_v54, 0.0  ;;  %v5448_v27 = vmax.f32 %v4270_v13, 0.0  ;;  %v4272_v50 = vadd.f32 %v5232_v61, %v5295_v17  ;;  %v4275_v18 = vadd.f32 %v5249_v39, %v5284_v14 }
 0x1c9   :  { %6428 = vst [vmem:[#allocation49_spill] sm:$0xff] %v5429_v58  ;;  %6429 = vst [vmem:[#allocation50_spill] sm:$0xff] %v5436_v49  ;;  %v5453_v23 = vmax.f32 %v4273_v32, 0.0  ;;  %v4274_v51 = vadd.f32 %v5246_v41, %v5295_v17  ;;  %v4277_v59 = vadd.f32 %v5266_v16, %v5284_v14  ;;  %v4276_v35 = vadd.f32 %v5260_v22, %v5295_v17 }
 0x1ca   :  { %1619 = vmatmul.mubr.f32.gmra.mrb[34].mxu0 %v5340_v7  ;;  %6430 = vst [vmem:[#allocation51_spill] sm:$0xff] %v5441_v46  ;;  %6431 = vst [vmem:[#allocation52_spill] sm:$0xff] %v5448_v27  ;;  %v5460_v21 = vmax.f32 %v4272_v50, 0.0  ;;  %v5465_v61 = vmax.f32 %v4275_v18, 0.0  ;;  %v4279_v26 = vadd.f32 %v5287_v53, %v5284_v14  ;;  %v4278_v40 = vadd.f32 %v5280_v3, %v5295_v17 }
 0x1cb   :  { %1941 = vmatmul.mubr.f32.gmra.mrb[34].mxu1 %v5340_v7  ;;  %1624 = vmatprep.mubr.f32.mxu0 %v5345_v36  ;;  %6432 = vst [vmem:[#allocation53_spill] sm:$0xff] %v5453_v23  ;;  %v5472_v39 = vmax.f32 %v4274_v51, 0.0  ;;  %v5477_v41 = vmax.f32 %v4277_v59, 0.0  ;;  %v5484_v16 = vmax.f32 %v4276_v35, 0.0  ;;  %v4281_v29 = vadd.f32 %v5307_v60, %v5284_v14 }
 0x1cc   :  { %1946 = vmatprep.mubr.f32.mxu1 %v5345_v36  ;;  %6433 = vst [vmem:[#allocation54_spill] sm:$0xff] %v5460_v21  ;;  %6434 = vst [vmem:[#allocation55_spill] sm:$0xff] %v5465_v61  ;;  %v5489_v22 = vmax.f32 %v4279_v26, 0.0  ;;  %v5496_v53 = vmax.f32 %v4278_v40, 0.0  ;;  %v4280_v48 = vadd.f32 %v5302_v15, %v5295_v17  ;;  %v4789_v60 = vmov 0  }
 0x1cd   :  { %6435 = vst [vmem:[#allocation56_spill] sm:$0xff] %v5472_v39  ;;  %6436 = vst [vmem:[#allocation57_spill] sm:$0xff] %v5477_v41  ;;  %v5501_v3 = vmax.f32 %v4281_v29, 0.0  ;;  %4479 = vset.pattern.permute.xlu0 %v4789_v60  ;;  %4480 = vset.pattern.permute.xlu1 %v4789_v60  ;;  %v1365_v17 = vld [vmem:[%s6326_s4] sm:$0xf] }
 0x1ce   :  { %1625 = vmatmul.mubr.f32.gmra.mrb[36].mxu0 %v5352_v0  ;;  %6437 = vst [vmem:[#allocation58_spill] sm:$0xff] %v5484_v16  ;;  %6438 = vst [vmem:[#allocation59_spill] sm:$0xff] %v5489_v22  ;;  %v5506_v14 = vmax.f32 %v4280_v48, 0.0  ;;  %v5515_v15 = vrot.slane %v1365_v17, %v5273_v42  ;;  %v5518_v5 = vrot.slane %v1365_v17, %v5263_v38 }
 0x1cf   :  { %1947 = vmatmul.mubr.f32.gmra.mrb[36].mxu1 %v5352_v0  ;;  %1630 = vmatprep.mubr.f32.mxu0 %v5357_v56  ;;  %6439 = vst [vmem:[#allocation60_spill] sm:$0xff] %v5496_v53  ;;  %6440 = vst [vmem:[#allocation61_spill] sm:$0xff] %v5501_v3  ;;  %v5521_v62 = vrot.slane %v1365_v17, %v5063_v9  ;;  %v5526_v54 = vrot.slane %v1365_v17, %v5071_v11 }
 0x1d0   :  { %1952 = vmatprep.mubr.f32.mxu1 %v5357_v56  ;;  %6441 = vst [vmem:[#allocation62_spill] sm:$0xff] %v5506_v14 }
 0x1d2   :  { %1631 = vmatmul.mubr.f32.gmra.mrb[38].mxu0 %v5364_v30 }
 0x1d3   :  { %1953 = vmatmul.mubr.f32.gmra.mrb[38].mxu1 %v5364_v30  ;;  %1636 = vmatprep.mubr.f32.mxu0 %v5369_v20 }
 0x1d4   :  { %1958 = vmatprep.mubr.f32.mxu1 %v5369_v20 }
 0x1d6   :  { %1637 = vmatmul.mubr.f32.gmra.mrb[40].mxu0 %v5376_v55 }
 0x1d7   :  { %1959 = vmatmul.mubr.f32.gmra.mrb[40].mxu1 %v5376_v55  ;;  %1642 = vmatprep.mubr.f32.mxu0 %v5381_v45 }
 0x1d8   :  { %1964 = vmatprep.mubr.f32.mxu1 %v5381_v45 }
 0x1da   :  { %1643 = vmatmul.mubr.f32.gmra.mrb[42].mxu0 %v5388_v25 }
 0x1db   :  { %1965 = vmatmul.mubr.f32.gmra.mrb[42].mxu1 %v5388_v25  ;;  %1648 = vmatprep.mubr.f32.mxu0 %v5393_v6 }
 0x1dc   :  { %1970 = vmatprep.mubr.f32.mxu1 %v5393_v6 }
 0x1de   :  { %1649 = vmatmul.mubr.f32.gmra.mrb[44].mxu0 %v5400_v57 }
 0x1df   :  { %1971 = vmatmul.mubr.f32.gmra.mrb[44].mxu1 %v5400_v57  ;;  %1654 = vmatprep.mubr.f32.mxu0 %v5405_v43 }
 0x1e0   :  { %1976 = vmatprep.mubr.f32.mxu1 %v5405_v43 }
 0x1e2   :  { %1655 = vmatmul.mubr.f32.gmra.mrb[46].mxu0 %v5412_v33 }
 0x1e3   :  { %1977 = vmatmul.mubr.f32.gmra.mrb[46].mxu1 %v5412_v33  ;;  %1660 = vmatprep.mubr.f32.mxu0 %v5417_v19 }
 0x1e4   :  { %1982 = vmatprep.mubr.f32.mxu1 %v5417_v19 }
 0x1e6   :  { %1661 = vmatmul.mubr.f32.gmra.mrb[48].mxu0 %v5424_v2 }
 0x1e7   :  { %1983 = vmatmul.mubr.f32.gmra.mrb[48].mxu1 %v5424_v2  ;;  %1666 = vmatprep.mubr.f32.mxu0 %v5429_v58 }
 0x1e8   :  { %1988 = vmatprep.mubr.f32.mxu1 %v5429_v58 }
 0x1ea   :  { %1667 = vmatmul.mubr.f32.gmra.mrb[50].mxu0 %v5436_v49 }
 0x1eb   :  { %1989 = vmatmul.mubr.f32.gmra.mrb[50].mxu1 %v5436_v49  ;;  %1672 = vmatprep.mubr.f32.mxu0 %v5441_v46 }
 0x1ec   :  { %1994 = vmatprep.mubr.f32.mxu1 %v5441_v46 }
 0x1ee   :  { %1673 = vmatmul.mubr.f32.gmra.mrb[52].mxu0 %v5448_v27 }
 0x1ef   :  { %1995 = vmatmul.mubr.f32.gmra.mrb[52].mxu1 %v5448_v27  ;;  %1678 = vmatprep.mubr.f32.mxu0 %v5453_v23 }
 0x1f0   :  { %2000 = vmatprep.mubr.f32.mxu1 %v5453_v23 }
 0x1f2   :  { %1679 = vmatmul.mubr.f32.gmra.mrb[54].mxu0 %v5460_v21 }
 0x1f3   :  { %2001 = vmatmul.mubr.f32.gmra.mrb[54].mxu1 %v5460_v21  ;;  %1684 = vmatprep.mubr.f32.mxu0 %v5465_v61 }
 0x1f4   :  { %2006 = vmatprep.mubr.f32.mxu1 %v5465_v61 }
 0x1f6   :  { %1685 = vmatmul.mubr.f32.gmra.mrb[56].mxu0 %v5472_v39 }
 0x1f7   :  { %2007 = vmatmul.mubr.f32.gmra.mrb[56].mxu1 %v5472_v39  ;;  %1690 = vmatprep.mubr.f32.mxu0 %v5477_v41 }
 0x1f8   :  { %2012 = vmatprep.mubr.f32.mxu1 %v5477_v41 }
 0x1fa   :  { %1691 = vmatmul.mubr.f32.gmra.mrb[58].mxu0 %v5484_v16 }
 0x1fb   :  { %2013 = vmatmul.mubr.f32.gmra.mrb[58].mxu1 %v5484_v16  ;;  %1696 = vmatprep.mubr.f32.mxu0 %v5489_v22 }
 0x1fc   :  { %2018 = vmatprep.mubr.f32.mxu1 %v5489_v22 }
 0x1fe   :  { %1697 = vmatmul.mubr.f32.gmra.mrb[60].mxu0 %v5496_v53 }
 0x1ff   :  { %2019 = vmatmul.mubr.f32.gmra.mrb[60].mxu1 %v5496_v53  ;;  %1702 = vmatprep.mubr.f32.mxu0 %v5501_v3 }
 0x200   :  { %2024 = vmatprep.mubr.f32.mxu1 %v5501_v3 }
 0x202   :  { %1703 = vmatmul.mubr.f32.gmra.mrb[62].mxu0 %v5506_v14 }
 0x203   :  { %2025 = vmatmul.mubr.f32.gmra.mrb[62].mxu1 %v5506_v14 }
 0x299   :  { %v1614_v52 = vpop.f32.mrb[32].mxu0 }
 0x29a   :  { %v1936_v37 = vpop.f32.mrb[32].mxu1  ;;  %v1616_v10 = vpop.f32.mrb[33].mxu0  ;;  %v4282_v32 = vadd.f32 %v1614_v52, %v5521_v62 }
 0x29b   :  { %v4314_v4 = vadd.f32 %v1936_v37, %v5515_v15  ;;  %v1938_v63 = vpop.f32.mrb[33].mxu1  ;;  %v4283_v40 = vadd.f32 %v1616_v10, %v5526_v54 }
 0x29c   :  { %v4315_v12 = vadd.f32 %v1938_v63, %v5518_v5 }
 0x29d   :  { %v3673_v28 = vmul.f32 -1.442695, %v4314_v4  ;;  %v1620_v13 = vpop.f32.mrb[34].mxu0 }
 0x29e   :  { %v3674_v50 = vmul.f32 -1.442695, %v4315_v12  ;;  %v1942_v18 = vpop.f32.mrb[34].mxu1  ;;  %v1622_v51 = vpop.f32.mrb[35].mxu0  ;;  %v4284_v60 = vadd.f32 %v1620_v13, %v5521_v62 }
 0x29f   :  { %4481 = vpow2.f32 %v3673_v28  ;;  %v4316_v59 = vadd.f32 %v1942_v18, %v5515_v15  ;;  %v1944_v35 = vpop.f32.mrb[35].mxu1  ;;  %v4285_v28 = vadd.f32 %v1622_v51, %v5526_v54 }
 0x2a0   :  { %4483 = vpow2.f32 %v3674_v50  ;;  %v4317_v26 = vadd.f32 %v1944_v35, %v5518_v5 }
 0x2a1   :  { %v3675_v29 = vmul.f32 -1.442695, %v4316_v59  ;;  %v1626_v48 = vpop.f32.mrb[36].mxu0  ;;  %4485 = vtanh.f32 %v4282_v32 }
 0x2a2   :  { %v3676_v17 = vmul.f32 -1.442695, %v4317_v26  ;;  %v1948_v37 = vpop.f32.mrb[36].mxu1  ;;  %v1628_v52 = vpop.f32.mrb[37].mxu0  ;;  %v4286_v32 = vadd.f32 %v1626_v48, %v5521_v62 }
 0x2a3   :  { %4487 = vpow2.f32 %v3675_v29  ;;  %v4318_v4 = vadd.f32 %v1948_v37, %v5515_v15  ;;  %v1950_v63 = vpop.f32.mrb[37].mxu1 }
 0x2a4   :  { %4489 = vpow2.f32 %v3676_v17  ;;  %v4319_v12 = vadd.f32 %v1950_v63, %v5518_v5 }
 0x2a5   :  { %4491 = vtanh.f32 %v4283_v40  ;;  %v3677_v50 = vmul.f32 -1.442695, %v4318_v4  ;;  %v1632_v10 = vpop.f32.mrb[38].mxu0 }
 0x2a6   :  { %4493 = vtanh.f32 %v4284_v60  ;;  %v3678_v18 = vmul.f32 -1.442695, %v4319_v12  ;;  %v1954_v13 = vpop.f32.mrb[38].mxu1  ;;  %v1634_v59 = vpop.f32.mrb[39].mxu0 }
 0x2a7   :  { %4495 = vpow2.f32 %v3677_v50  ;;  %v4320_v35 = vadd.f32 %v1954_v13, %v5515_v15  ;;  %v1956_v26 = vpop.f32.mrb[39].mxu1  ;;  %v4287_v50 = vadd.f32 %v1628_v52, %v5526_v54 }
 0x2a8   :  { %4497 = vpow2.f32 %v3678_v18  ;;  %v4321_v29 = vadd.f32 %v1956_v26, %v5518_v5 }
 0x2a9   :  { %v4482_v17 = vpop.eup %4481  ;;  %4499 = vtanh.f32 %v4285_v28  ;;  %v3679_v40 = vmul.f32 -1.442695, %v4320_v35  ;;  %v1638_v37 = vpop.f32.mrb[40].mxu0 }
 0x2aa   :  { %v4484_v51 = vpop.eup %4483  ;;  %v2159_v4 = vadd.f32 1.0, %v4482_v17  ;;  %4501 = vtanh.f32 %v4286_v32  ;;  %v3680_v60 = vmul.f32 -1.442695, %v4321_v29  ;;  %v1960_v63 = vpop.f32.mrb[40].mxu1 }
 0x2ab   :  { %v5539_v48 = vpop.f32.mrb[41].mxu0  ;;  %v2160_v12 = vadd.f32 1.0, %v4484_v51  ;;  %4503 = vpow2.f32 %v3679_v40  ;;  %v4322_v13 = vadd.f32 %v1960_v63, %v5515_v15  ;;  %v1962_v18 = vpop.f32.mrb[41].mxu1  ;;  %v4288_v63 = vadd.f32 %v1632_v10, %v5521_v62 }
 0x2ac   :  { %v4486_v3 = vpop.eup %4485  ;;  %4505 = vrcp.f32 %v2159_v4  ;;  %v4323_v29 = vadd.f32 %v1962_v18, %v5518_v5 }
 0x2ad   :  { %v4488_v26 = vpop.eup %4487  ;;  %4507 = vrcp.f32 %v2160_v12  ;;  %v5543_v28 = vpop.f32.mrb[42].mxu0  ;;  %v3681_v32 = vmul.f32 -1.442695, %v4322_v13 }
 0x2ae   :  { %v4490_v35 = vpop.eup %4489  ;;  %v2161_v17 = vadd.f32 1.0, %v4488_v26  ;;  %4509 = vpow2.f32 %v3680_v60  ;;  %v1966_v14 = vpop.f32.mrb[42].mxu1  ;;  %v2287_v60 = vld [vmem:[%s6327_s5] sm:$0x3] }
 0x2af   :  { %v5546_v51 = vpop.f32.mrb[43].mxu0  ;;  %v4492_v52 = vpop.eup %4491  ;;  %v2162_v40 = vadd.f32 1.0, %v4490_v35  ;;  %4511 = vtanh.f32 %v4287_v50  ;;  %v4324_v24 = vadd.f32 %v1966_v14, %v5515_v15  ;;  %v3682_v35 = vmul.f32 -1.442695, %v4323_v29 }
 0x2b0   :  { %v1968_v34 = vpop.f32.mrb[43].mxu1  ;;  %v4494_v4 = vpop.eup %4493  ;;  %4513 = vrcp.f32 %v2161_v17  ;;  %v4289_v17 = vadd.f32 %v1634_v59, %v5526_v54  ;;  %v5567_v29 = vrot.slane %v2287_v60, %v5071_v11  ;;  %v4290_v59 = vadd.f32 %v1638_v37, %v5521_v62 }
 0x2b1   :  { %v4496_v12 = vpop.eup %4495  ;;  %4515 = vrcp.f32 %v2162_v40  ;;  %v5550_v26 = vpop.f32.mrb[44].mxu0  ;;  %v4325_v31 = vadd.f32 %v1968_v34, %v5518_v5  ;;  %v3683_v41 = vmul.f32 -1.442695, %v4324_v24 }
 0x2b2   :  { %v4498_v13 = vpop.eup %4497  ;;  %v2163_v18 = vadd.f32 1.0, %v4496_v12  ;;  %4517 = vpow2.f32 %v3681_v32  ;;  %v1972_v50 = vpop.f32.mrb[44].mxu1  ;;  %v5564_v32 = vrot.slane %v2287_v60, %v5063_v9  ;;  %v4291_v60 = vadd.f32 %v5539_v48, %v5526_v54 }
 0x2b3   :  { %v5555_v22 = vpop.f32.mrb[45].mxu0  ;;  %v4500_v10 = vpop.eup %4499  ;;  %v2164_v53 = vadd.f32 1.0, %v4498_v13  ;;  %4519 = vtanh.f32 %v4288_v63  ;;  %v3684_v23 = vmul.f32 -1.442695, %v4325_v31  ;;  %v4292_v31 = vadd.f32 %v5543_v28, %v5521_v62 }
 0x2b4   :  { %v1974_v40 = vpop.f32.mrb[45].mxu1  ;;  %v5558_v14 = vpop.eup %4501  ;;  %4521 = vrcp.f32 %v2163_v18  ;;  %v4326_v18 = vadd.f32 %v1972_v50, %v5515_v15  ;;  %v4293_v28 = vadd.f32 %v5546_v51, %v5526_v54 }
 0x2b5   :  { %v4504_v47 = vpop.eup %4503  ;;  %4523 = vrcp.f32 %v2164_v53  ;;  %v5561_v12 = vpop.f32.mrb[46].mxu0  ;;  %v4327_v37 = vadd.f32 %v1974_v40, %v5518_v5 }
 0x2b6   :  { %v4506_v63 = vpop.eup %4505  ;;  %v2165_v13 = vadd.f32 1.0, %v4504_v47  ;;  %4525 = vpow2.f32 %v3682_v35  ;;  %v1978_v16 = vpop.f32.mrb[46].mxu1 }
 0x2b7   :  { %v5571_v34 = vpop.f32.mrb[47].mxu0  ;;  %v4508_v53 = vpop.eup %4507  ;;  %4527 = vtanh.f32 %v4289_v17  ;;  %v2255_v61 = vmul.f32 %v4506_v63, %v4486_v3  ;;  %v3685_v17 = vmul.f32 -1.442695, %v4326_v18  ;;  %v4328_v40 = vadd.f32 %v1978_v16, %v5515_v15 }
 0x2b8   :  { %v1980_v24 = vpop.f32.mrb[47].mxu1  ;;  %v4510_v39 = vpop.eup %4509  ;;  %4529 = vrcp.f32 %v2165_v13  ;;  %v2256_v21 = vmul.f32 %v4508_v53, %v4492_v52  ;;  %v3686_v46 = vmul.f32 -1.442695, %v4327_v37 }
 0x2b9   :  { %v4512_v47 = vpop.eup %4511  ;;  %v2166_v43 = vadd.f32 1.0, %v4510_v39  ;;  %4531 = vpow2.f32 %v3683_v41  ;;  %v5576_v35 = vpop.f32.mrb[48].mxu0  ;;  %v2299_v50 = vmul.f32 %v5564_v32, %v2255_v61  ;;  %v3687_v51 = vmul.f32 -1.442695, %v4328_v40 }
 0x2ba   :  { %v4514_v33 = vpop.eup %4513  ;;  %4533 = vtanh.f32 %v4290_v59  ;;  %v1984_v3 = vpop.f32.mrb[48].mxu1  ;;  %v2300_v13 = vmul.f32 %v5567_v29, %v2256_v21 }
 0x2bb   :  { %v5579_v63 = vpop.f32.mrb[49].mxu0  ;;  %v4516_v48 = vpop.eup %4515  ;;  %4535 = vrcp.f32 %v2166_v43  ;;  %v2257_v41 = vmul.f32 %v4514_v33, %v4494_v4 }
 0x2bc   :  { %v1986_v39 = vpop.f32.mrb[49].mxu1  ;;  %v4518_v52 = vpop.eup %4517  ;;  %4537 = vpow2.f32 %v3684_v23  ;;  %v2331_v61 = vadd.f32 %v2300_v13, %v2299_v50  ;;  %v2258_v53 = vmul.f32 %v4516_v48, %v4500_v10  ;;  %v4294_v10 = vadd.f32 %v5550_v26, %v5521_v62 }
 0x2bd   :  { %v4520_v59 = vpop.eup %4519  ;;  %v2167_v18 = vadd.f32 1.0, %v4518_v52  ;;  %4539 = vtanh.f32 %v4291_v60  ;;  %v5585_v27 = vpop.f32.mrb[50].mxu0  ;;  %v2301_v21 = vmul.f32 %v5564_v32, %v2257_v41  ;;  %v4329_v60 = vadd.f32 %v1980_v24, %v5518_v5 }
 0x2be   :  { %v4522_v43 = vpop.eup %4521  ;;  %4541 = vpow2.f32 %v3685_v17  ;;  %v1990_v33 = vpop.f32.mrb[50].mxu1  ;;  %2332 = vadd.xlane.f32.xlu0 %v2331_v61  ;;  %v2302_v16 = vmul.f32 %v5567_v29, %v2258_v53  ;;  %v4330_v61 = vadd.f32 %v1984_v3, %v5515_v15 }
 0x2bf   :  { %v5590_v23 = vpop.f32.mrb[51].mxu0  ;;  %v4524_v4 = vpop.eup %4523  ;;  %4543 = vrcp.f32 %v2167_v18  ;;  %v2259_v50 = vmul.f32 %v4522_v43, %v5558_v14 }
 0x2c0   :  { %v1992_v37 = vpop.f32.mrb[51].mxu1  ;;  %v4526_v13 = vpop.eup %4525  ;;  %4545 = vtanh.f32 %v4292_v31  ;;  %v2334_v17 = vadd.f32 %v2302_v16, %v2301_v21  ;;  %v2260_v48 = vmul.f32 %v4524_v4, %v4512_v47  ;;  %v3688_v47 = vmul.f32 -1.442695, %v4329_v60 }
 0x2c1   :  { %v4528_v41 = vpop.eup %4527  ;;  %v2168_v52 = vadd.f32 1.0, %v4526_v13  ;;  %4547 = vpow2.f32 %v3686_v46  ;;  %v5598_v53 = vpop.f32.mrb[52].mxu0  ;;  %v2303_v18 = vmul.f32 %v5564_v32, %v2259_v50  ;;  %v4295_v16 = vadd.f32 %v5555_v22, %v5526_v54 }
 0x2c2   :  { %v4530_v26 = vpop.eup %4529  ;;  %4549 = vtanh.f32 %v4293_v28  ;;  %v5601_v24 = vpop.f32.mrb[52].mxu1  ;;  %2335 = vadd.xlane.f32.xlu0 %v2334_v17  ;;  %v2304_v31 = vmul.f32 %v5567_v29, %v2260_v48  ;;  %v4296_v50 = vadd.f32 %v5561_v12, %v5521_v62  ;;  %v3689_v13 = vmul.f32 -1.442695, %v4330_v61 }
 0x2c3   :  { %v5603_v14 = vpop.f32.mrb[53].mxu0  ;;  %v4532_v40 = vpop.eup %4531  ;;  %4551 = vrcp.f32 %v2168_v52  ;;  %v2261_v46 = vmul.f32 %v4530_v26, %v4520_v59  ;;  %v4331_v17 = vadd.f32 %v1986_v39, %v5518_v5 }
 0x2c4   :  { %v5606_v21 = vpop.f32.mrb[53].mxu1  ;;  %v4534_v3 = vpop.eup %4533  ;;  %v2169_v43 = vadd.f32 1.0, %v4532_v40  ;;  %4553 = vpow2.f32 %v3687_v51  ;;  %v2337_v28 = vadd.f32 %v2304_v31, %v2303_v18  ;;  %v4332_v40 = vadd.f32 %v1990_v33, %v5515_v15 }
 0x2c5   :  { %v4536_v4 = vpop.eup %4535  ;;  %4555 = vtanh.f32 %v4294_v10  ;;  %v1680_v48 = vpop.f32.mrb[54].mxu0  ;;  %v2305_v51 = vmul.f32 %v5564_v32, %v2261_v46 }
 0x2c6   :  { %v4538_v60 = vpop.eup %4537  ;;  %4557 = vrcp.f32 %v2169_v43  ;;  %v5614_v59 = vadd.f32 %v1680_v48, %v5521_v62  ;;  %v2002_v52 = vpop.f32.mrb[54].mxu1  ;;  %2338 = vadd.xlane.f32.xlu0 %v2337_v28  ;;  %v2262_v22 = vmul.f32 %v4536_v4, %v4528_v41 }
 0x2c7   :  { %v1682_v26 = vpop.f32.mrb[55].mxu0  ;;  %v4540_v18 = vpop.eup %4539  ;;  %v2170_v10 = vadd.f32 1.0, %v4538_v60  ;;  %4559 = vpow2.f32 %v3688_v47  ;;  %v5618_v12 = vadd.f32 %v2002_v52, %v5515_v15  ;;  %v3690_v47 = vmul.f32 -1.442695, %v4331_v17 }
 0x2c8   :  { %v5621_v39 = vadd.f32 %v1682_v26, %v5526_v54  ;;  %v2004_v61 = vpop.f32.mrb[55].mxu1  ;;  %v4542_v31 = vpop.eup %4541  ;;  %4561 = vtanh.f32 %v4295_v16  ;;  %v2306_v41 = vmul.f32 %v5567_v29, %v2262_v22  ;;  %v4333_v60 = vadd.f32 %v1992_v37, %v5518_v5 }
 0x2c9   :  { %v5625_v43 = vadd.f32 %v2004_v61, %v5518_v5  ;;  %v4544_v46 = vpop.eup %4543  ;;  %4563 = vrcp.f32 %v2170_v10  ;;  %v2171_v28 = vadd.f32 1.0, %v4542_v31  ;;  %v1686_v4 = vpop.f32.mrb[56].mxu0  ;;  %v3691_v37 = vmul.f32 -1.442695, %v4332_v40 }
 0x2ca   :  { %v4546_v48 = vpop.eup %4545  ;;  %4565 = vpow2.f32 %v3689_v13  ;;  %v5630_v52 = vadd.f32 %v1686_v4, %v5521_v62  ;;  %v2008_v16 = vpop.f32.mrb[56].mxu1  ;;  %v2340_v26 = vadd.f32 %v2306_v41, %v2305_v51  ;;  %v2263_v10 = vmul.f32 %v4544_v46, %v4534_v3 }
 0x2cb   :  { %v1688_v33 = vpop.f32.mrb[57].mxu0  ;;  %v4548_v6 = vpop.eup %4547  ;;  %4567 = vrcp.f32 %v2171_v28  ;;  %v5633_v61 = vadd.f32 %v2008_v16, %v5515_v15  ;;  %v4297_v41 = vadd.f32 %v5571_v34, %v5526_v54  ;;  %v4334_v28 = vadd.f32 %v5601_v24, %v5515_v15 }
 0x2cc   :  { %v5636_v22 = vadd.f32 %v1688_v33, %v5526_v54  ;;  %v2010_v17 = vpop.f32.mrb[57].mxu1  ;;  %v4550_v31 = vpop.eup %4549  ;;  %v2172_v13 = vadd.f32 1.0, %v4548_v6  ;;  %4569 = vtanh.f32 %v4296_v50  ;;  %2341 = vadd.xlane.f32.xlu0 %v2340_v26  ;;  %v2307_v40 = vmul.f32 %v5564_v32, %v2263_v10 }
 0x2cd   :  { %v5639_v4 = vadd.f32 %v2010_v17, %v5518_v5  ;;  %v4552_v51 = vpop.eup %4551  ;;  %4571 = vpow2.f32 %v3690_v47  ;;  %v1692_v16 = vpop.f32.mrb[58].mxu0  ;;  %v3692_v57 = vmul.f32 -1.442695, %v4333_v60  ;;  %v4299_v60 = vadd.f32 %v5579_v63, %v5526_v54 }
 0x2ce   :  { %v4554_v33 = vpop.eup %4553  ;;  %4573 = vrcp.f32 %v2172_v13  ;;  %v5646_v3 = vadd.f32 %v1692_v16, %v5521_v62  ;;  %v2014_v6 = vpop.f32.mrb[58].mxu1  ;;  %v2264_v50 = vmul.f32 %v4552_v51, %v4540_v18  ;;  %v4298_v13 = vadd.f32 %v5576_v35, %v5521_v62 }
 0x2cf   :  { %v1694_v46 = vpop.f32.mrb[59].mxu0  ;;  %v4556_v26 = vpop.eup %4555  ;;  %v2173_v17 = vadd.f32 1.0, %v4554_v33  ;;  %v5650_v34 = vadd.f32 %v2014_v6, %v5515_v15  ;;  %4575 = vpow2.f32 %v3691_v37  ;;  %v4335_v16 = vadd.f32 %v5606_v21, %v5518_v5 }
 0x2d0   :  { %v5653_v47 = vadd.f32 %v1694_v46, %v5526_v54  ;;  %v2016_v24 = vpop.f32.mrb[59].mxu1  ;;  %v4558_v58 = vpop.eup %4557  ;;  %v2308_v18 = vmul.f32 %v5567_v29, %v2264_v50  ;;  %v3693_v35 = vmul.f32 -1.442695, %v4334_v28 }
 0x2d1   :  { %v5659_v10 = vadd.f32 %v2016_v24, %v5518_v5  ;;  %v4560_v51 = vpop.eup %4559  ;;  %4577 = vrcp.f32 %v2173_v17  ;;  %v1698_v33 = vpop.f32.mrb[60].mxu0  ;;  %v2265_v6 = vmul.f32 %v4558_v58, %v4546_v48 }
 0x2d2   :  { %v4562_v46 = vpop.eup %4561  ;;  %4579 = vtanh.f32 %v4297_v41  ;;  %v2174_v49 = vadd.f32 1.0, %v4560_v51  ;;  %v2343_v37 = vadd.f32 %v2308_v18, %v2307_v40  ;;  %v2020_v19 = vpop.f32.mrb[60].mxu1  ;;  %v5666_v24 = vadd.f32 %v1698_v33, %v5521_v62 }
 0x2d3   :  { %v1700_v50 = vpop.f32.mrb[61].mxu0  ;;  %v4564_v2 = vpop.eup %4563  ;;  %4581 = vpow2.f32 %v3692_v57  ;;  %v5669_v17 = vadd.f32 %v2020_v19, %v5515_v15  ;;  %v2309_v63 = vmul.f32 %v5564_v32, %v2265_v6  ;;  %v4300_v19 = vadd.f32 %v5585_v27, %v5521_v62 }
 0x2d4   :  { %v2022_v21 = vpop.f32.mrb[61].mxu1  ;;  %v4566_v45 = vpop.eup %4565  ;;  %4583 = vrcp.f32 %v2174_v49  ;;  %2344 = vadd.xlane.f32.xlu0 %v2343_v37  ;;  %v2266_v58 = vmul.f32 %v4564_v2, %v4550_v31  ;;  %v5673_v48 = vadd.f32 %v1700_v50, %v5526_v54  ;;  %v3694_v40 = vmul.f32 -1.442695, %v4335_v16 }
 0x2d5   :  { %v5676_v41 = vadd.f32 %v2022_v21, %v5518_v5  ;;  %v4568_v57 = vpop.eup %4567  ;;  %4585 = vtanh.f32 %v4298_v13  ;;  %v2175_v28 = vadd.f32 1.0, %v4566_v45  ;;  %v1704_v18 = vpop.f32.mrb[62].mxu0  ;;  %v3695_v49 = vmul.f32 -1.442695, %v5618_v12 }
 0x2d6   :  { %v4570_v51 = vpop.eup %4569  ;;  %4587 = vpow2.f32 %v3693_v35  ;;  %v2310_v2 = vmul.f32 %v5567_v29, %v2266_v58  ;;  %v5683_v31 = vadd.f32 %v1704_v18, %v5521_v62  ;;  %v2026_v33 = vpop.f32.mrb[62].mxu1  ;;  %v2267_v13 = vmul.f32 %v4568_v57, %v4556_v26 }
 0x2d7   :  { %v1706_v6 = vpop.f32.mrb[63].mxu0  ;;  %v4572_v37 = vpop.eup %4571  ;;  %4589 = vrcp.f32 %v2175_v28  ;;  %v5686_v45 = vadd.f32 %v2026_v33, %v5515_v15  ;;  %v4301_v15 = vadd.f32 %v5590_v23, %v5526_v54 }
 0x2d8   :  { %v5689_v27 = vadd.f32 %v1706_v6, %v5526_v54  ;;  %v2028_v16 = vpop.f32.mrb[63].mxu1  ;;  %v4574_v35 = vpop.eup %4573  ;;  %4591 = vtanh.f32 %v4299_v60  ;;  %v2176_v12 = vadd.f32 1.0, %v4572_v37  ;;  %v2346_v50 = vadd.f32 %v2310_v2, %v2309_v63 }
 0x2d9   :  { %v5692_v21 = vadd.f32 %v2028_v16, %v5518_v5  ;;  %4593 = vpow2.f32 %v3694_v40  ;;  %v2268_v58 = vmul.f32 %v4574_v35, %v4562_v46  ;;  %v2311_v18 = vmul.f32 %v5564_v32, %v2267_v13  ;;  %v4576_v28 = vpop.eup %4575 }
 0x2da   :  { %4595 = vrcp.f32 %v2176_v12  ;;  %2347 = vadd.xlane.f32.xlu0 %v2346_v50  ;;  %v2177_v57 = vadd.f32 1.0, %v4576_v28  ;;  %v3696_v60 = vmul.f32 -1.442695, %v5625_v43  ;;  %v4302_v46 = vadd.f32 %v5598_v53, %v5521_v62 }
 0x2db   :  { %v4578_v26 = vpop.eup %4577  ;;  %4597 = vtanh.f32 %v4300_v19  ;;  %v2312_v63 = vmul.f32 %v5567_v29, %v2268_v58  ;;  %v3697_v37 = vmul.f32 -1.442695, %v5633_v61  ;;  %v3698_v53 = vmul.f32 -1.442695, %v5639_v4 }
 0x2dc   :  { %v4580_v2 = vpop.eup %4579  ;;  %4599 = vpow2.f32 %v3695_v49  ;;  %v2269_v5 = vmul.f32 %v4578_v26, %v4570_v51  ;;  %v4303_v51 = vadd.f32 %v5603_v14, %v5526_v54 }
 0x2dd   :  { %v4582_v40 = vpop.eup %4581  ;;  %4601 = vrcp.f32 %v2177_v57  ;;  %v2349_v33 = vadd.f32 %v2312_v63, %v2311_v18  ;;  %v3700_v63 = vmul.f32 -1.442695, %v5659_v10 }
 0x2de   :  { %v4584_v6 = vpop.eup %4583  ;;  %4603 = vtanh.f32 %v4301_v15  ;;  %v2178_v23 = vadd.f32 1.0, %v4582_v40  ;;  %v2313_v13 = vmul.f32 %v5564_v32, %v2269_v5  ;;  %v3699_v15 = vmul.f32 -1.442695, %v5650_v34 }
 0x2df   :  { %v4586_v19 = vpop.eup %4585  ;;  %4605 = vpow2.f32 %v3696_v60  ;;  %2350 = vadd.xlane.f32.xlu0 %v2349_v33  ;;  %v2270_v43 = vmul.f32 %v4584_v6, %v4580_v2 }
 0x2e0   :  { %v4588_v16 = vpop.eup %4587  ;;  %4607 = vrcp.f32 %v2178_v23  ;;  %v3701_v23 = vmul.f32 -1.442695, %v5669_v17 }
 0x2e1   :  { %v4590_v49 = vpop.eup %4589  ;;  %4609 = vtanh.f32 %v4302_v46  ;;  %v2179_v62 = vadd.f32 1.0, %v4588_v16  ;;  %v2314_v35 = vmul.f32 %v5567_v29, %v2270_v43  ;;  %v3702_v16 = vmul.f32 -1.442695, %v5676_v41 }
 0x2e2   :  { %v4592_v12 = vpop.eup %4591  ;;  %4611 = vpow2.f32 %v3697_v37  ;;  %v2271_v61 = vmul.f32 %v4590_v49, %v4586_v19 }
 0x2e3   :  { %v4594_v50 = vpop.eup %4593  ;;  %4613 = vrcp.f32 %v2179_v62  ;;  %v2352_v58 = vadd.f32 %v2314_v35, %v2313_v13 }
 0x2e4   :  { %v4596_v18 = vpop.eup %4595  ;;  %4615 = vtanh.f32 %v4303_v51  ;;  %v2180_v28 = vadd.f32 1.0, %v4594_v50  ;;  %v2315_v14 = vmul.f32 %v5564_v32, %v2271_v61 }
 0x2e5   :  { %v4598_v26 = vpop.eup %4597  ;;  %4617 = vpow2.f32 %v3698_v53  ;;  %2353 = vadd.xlane.f32.xlu0 %v2352_v58  ;;  %v2272_v54 = vmul.f32 %v4596_v18, %v4592_v12  ;;  %v3703_v12 = vmul.f32 -1.442695, %v5686_v45 }
 0x2e6   :  { %v4600_v4 = vpop.eup %4599  ;;  %4619 = vrcp.f32 %v2180_v28  ;;  %v3704_v28 = vmul.f32 -1.442695, %v5692_v21  ;;  %v3705_v21 = vld [vmem:[#allocation2] ss:$0 sm:$0xff] }
 0x2e7   :  { %v4602_v57 = vpop.eup %4601  ;;  %4621 = vtanh.f32 %v5614_v59  ;;  %v2181_v60 = vadd.f32 1.0, %v4600_v4  ;;  %v2316_v2 = vmul.f32 %v5567_v29, %v2272_v54 }
 0x2e8   :  { %v4604_v5 = vpop.eup %4603  ;;  %4623 = vpow2.f32 %v3699_v15  ;;  %v2273_v40 = vmul.f32 %v4602_v57, %v4598_v26 }
 0x2e9   :  { %v4606_v34 = vpop.eup %4605  ;;  %4625 = vrcp.f32 %v2181_v60  ;;  %v2355_v46 = vadd.f32 %v2316_v2, %v2315_v14 }
 0x2ea   :  { %v4608_v33 = vpop.eup %4607  ;;  %4627 = vtanh.f32 %v5621_v39  ;;  %v2182_v6 = vadd.f32 1.0, %v4606_v34  ;;  %v2317_v10 = vmul.f32 %v5564_v32, %v2273_v40 }
 0x2eb   :  { %v4610_v37 = vpop.eup %4609  ;;  %4629 = vpow2.f32 %v3700_v63  ;;  %2356 = vadd.xlane.f32.xlu1 %v2355_v46  ;;  %v2274_v59 = vmul.f32 %v4608_v33, %v4604_v5 }
 0x2ec   :  { %v4612_v19 = vpop.eup %4611  ;;  %4631 = vrcp.f32 %v2182_v6 }
 0x2ed   :  { %v4614_v43 = vpop.eup %4613  ;;  %4633 = vtanh.f32 %v5630_v52  ;;  %v2183_v13 = vadd.f32 1.0, %v4612_v19  ;;  %v2318_v51 = vmul.f32 %v5567_v29, %v2274_v59 }
 0x2ee   :  { %v4616_v39 = vpop.eup %4615  ;;  %4635 = vpow2.f32 %v3701_v23  ;;  %v2275_v49 = vmul.f32 %v4614_v43, %v4610_v37 }
 0x2ef   :  { %v4618_v17 = vpop.eup %4617  ;;  %4637 = vrcp.f32 %v2183_v13  ;;  %v2358_v62 = vadd.f32 %v2318_v51, %v2317_v10 }
 0x2f0   :  { %v4620_v53 = vpop.eup %4619  ;;  %4639 = vtanh.f32 %v5636_v22  ;;  %v2184_v35 = vadd.f32 1.0, %v4618_v17  ;;  %v2319_v41 = vmul.f32 %v5564_v32, %v2275_v49 }
 0x2f1   :  { %v4622_v61 = vpop.eup %4621  ;;  %4641 = vpow2.f32 %v3702_v16  ;;  %2359 = vadd.xlane.f32.xlu1 %v2358_v62  ;;  %v2276_v52 = vmul.f32 %v4620_v53, %v4616_v39 }
 0x2f2   :  { %v4624_v50 = vpop.eup %4623  ;;  %4643 = vrcp.f32 %v2184_v35 }
 0x2f3   :  { %v4626_v58 = vpop.eup %4625  ;;  %4645 = vtanh.f32 %v5646_v3  ;;  %v2185_v18 = vadd.f32 1.0, %v4624_v50  ;;  %v2320_v15 = vmul.f32 %v5567_v29, %v2276_v52 }
 0x2f4   :  { %v4628_v22 = vpop.eup %4627  ;;  %4647 = vpow2.f32 %v3703_v12  ;;  %v2277_v26 = vmul.f32 %v4626_v58, %v4622_v61 }
 0x2f5   :  { %v4630_v45 = vpop.eup %4629  ;;  %4649 = vrcp.f32 %v2185_v18  ;;  %v2361_v54 = vadd.f32 %v2320_v15, %v2319_v41 }
 0x2f6   :  { %v4632_v14 = vpop.eup %4631  ;;  %4651 = vtanh.f32 %v5653_v47  ;;  %v2186_v4 = vadd.f32 1.0, %v4630_v45  ;;  %v2321_v3 = vmul.f32 %v5564_v32, %v2277_v26 }
 0x2f7   :  { %v4634_v57 = vpop.eup %4633  ;;  %4653 = vpow2.f32 %v3704_v28  ;;  %2362 = vadd.xlane.f32.xlu1 %v2361_v54  ;;  %v2278_v60 = vmul.f32 %v4632_v14, %v4628_v22 }
 0x2f8   :  { %v4636_v63 = vpop.eup %4635  ;;  %4655 = vrcp.f32 %v2186_v4 }
 0x2f9   :  { %v4638_v2 = vpop.eup %4637  ;;  %v2187_v5 = vadd.f32 1.0, %v4636_v63  ;;  %v2322_v40 = vmul.f32 %v5567_v29, %v2278_v60  ;;  %4657 = vtanh.f32 %v5666_v24 }
 0x2fa   :  { %v4640_v34 = vpop.eup %4639  ;;  %v2279_v46 = vmul.f32 %v4638_v2, %v4634_v57 }
 0x2fb   :  { %v4642_v33 = vpop.eup %4641  ;;  %4659 = vrcp.f32 %v2187_v5  ;;  %v2364_v47 = vadd.f32 %v2322_v40, %v2321_v3  ;;  %2386 = vperm.xlu0 %4479, %v3705_v21  }
 0x2fc   :  { %v4644_v6 = vpop.eup %4643  ;;  %v2188_v23 = vadd.f32 1.0, %v4642_v33  ;;  %4661 = vtanh.f32 %v5673_v48  ;;  %v2323_v10 = vmul.f32 %v5564_v32, %v2279_v46  ;;  %v6442_v46 = vlaneseq }
 0x2fd   :  { %v4646_v37 = vpop.eup %4645  ;;  %2365 = vadd.xlane.f32.xlu1 %v2364_v47  ;;  %v2280_v59 = vmul.f32 %v4644_v6, %v4640_v34 }
 0x2fe   :  { %v4648_v19 = vpop.eup %4647  ;;  %4663 = vrcp.f32 %v2188_v23  ;;  %v2422_v33 = vand.u32 127, %v6442_v46  ;;  %v6443_v23 = vld [vmem:[#allocation9_spill] sm:$0xff] }
 0x2ff   :  { %v4650_v43 = vpop.eup %4649  ;;  %v2189_v13 = vadd.f32 1.0, %v4648_v19  ;;  %v2324_v24 = vmul.f32 %v5567_v29, %v2280_v59  ;;  %4665 = vtanh.f32 %v5683_v31 }
 0x300   :  { %v4652_v16 = vpop.eup %4651  ;;  %v2281_v51 = vmul.f32 %v4650_v43, %v4646_v37  ;;  %v5741_v37 = vsub.s32 %v2422_v33, %v6443_v23 }
 0x301   :  { %v4654_v39 = vpop.eup %4653  ;;  %4667 = vrcp.f32 %v2189_v13  ;;  %v2367_v49 = vadd.f32 %v2324_v24, %v2323_v10 }
 0x302   :  { %v4656_v17 = vpop.eup %4655  ;;  %v2190_v62 = vadd.f32 1.0, %v4654_v39  ;;  %4669 = vtanh.f32 %v5689_v27  ;;  %v2325_v53 = vmul.f32 %v5564_v32, %v2281_v51 }
 0x303   :  { %2368 = vadd.xlane.f32.xlu1 %v2367_v49  ;;  %v2282_v48 = vmul.f32 %v4656_v17, %v4652_v16  ;;  %v4658_v35 = vpop.eup %4657 }
 0x304   :  { %4671 = vrcp.f32 %v2190_v62 }
 0x305   :  { %v4660_v12 = vpop.eup %4659  ;;  %v2326_v61 = vmul.f32 %v5567_v29, %v2282_v48 }
 0x306   :  { %v2283_v52 = vmul.f32 %v4660_v12, %v4658_v35  ;;  %v4662_v41 = vpop.eup %4661 }
 0x307   :  { %v2370_v31 = vadd.f32 %v2326_v61, %v2325_v53 }
 0x308   :  { %v4664_v50 = vpop.eup %4663  ;;  %v2327_v18 = vmul.f32 %v5564_v32, %v2283_v52 }
 0x309   :  { %2371 = vadd.xlane.f32.xlu1 %v2370_v31  ;;  %v2284_v58 = vmul.f32 %v4664_v50, %v4662_v41  ;;  %v4666_v28 = vpop.eup %4665 }
 0x30b   :  { %v4668_v15 = vpop.eup %4667  ;;  %v2328_v27 = vmul.f32 %v5567_v29, %v2284_v58 }
 0x30c   :  { %v2285_v22 = vmul.f32 %v4668_v15, %v4666_v28  ;;  %v4670_v26 = vpop.eup %4669 }
 0x30d   :  { %v2373_v45 = vadd.f32 %v2328_v27, %v2327_v18 }
 0x30e   :  { %v4672_v54 = vpop.eup %4671  ;;  %v2329_v4 = vmul.f32 %v5564_v32, %v2285_v22 }
 0x30f   :  { %2374 = vadd.xlane.f32.xlu1 %v2373_v45  ;;  %v2286_v14 = vmul.f32 %v4672_v54, %v4670_v26 }
 0x311   :  { %v2330_v57 = vmul.f32 %v5567_v29, %v2286_v14 }
 0x313   :  { %v2376_v60 = vadd.f32 %v2330_v57, %v2329_v4 }
 0x315   :  { %2377 = vadd.xlane.f32.xlu1 %v2376_v60 }
 0x34b   :  { %v2333_v3 = vpop.xlane.xlu0 %2332 }
 0x34f   :  { %v2336_v63 = vpop.xlane.xlu0 %2335 }
 0x353   :  { %v2339_v21 = vpop.xlane.xlu0 %2338 }
 0x359   :  { %v2342_v2 = vpop.xlane.xlu0 %2341 }
 0x361   :  { %v2345_v5 = vpop.xlane.xlu0 %2344 }
 0x367   :  { %v2348_v40 = vpop.xlane.xlu0 %2347 }
 0x36c   :  { %v2351_v34 = vpop.xlane.xlu0 %2350 }
 0x372   :  { %v2354_v47 = vpop.xlane.xlu0 %2353 }
 0x378   :  { %v2357_v6 = vpop.xlane.xlu1 %2356 }
 0x37a   :  { %v2387_v59 = vpop.permute.xlu0 %2386 }
 0x37b   :  { %v5743_v32 = vadd.f32 %v2387_v59, %v2333_v3  ;;  %v5745_v29 = vadd.f32 %v2387_v59, %v2336_v63  ;;  %v5747_v10 = vadd.f32 %v2387_v59, %v2339_v21  ;;  %v5749_v19 = vadd.f32 %v2387_v59, %v2342_v2 }
 0x37c   :  { %v5751_v43 = vadd.f32 %v2387_v59, %v2345_v5  ;;  %v5753_v13 = vadd.f32 %v2387_v59, %v2348_v40  ;;  %v5759_v39 = vadd.f32 %v2387_v59, %v2351_v34  ;;  %v5763_v17 = vadd.f32 %v2387_v59, %v2354_v47 }
 0x37d   :  { %v2426_v24 = vrot.slane %v5743_v32, %v5741_v37  ;;  %v2430_v16 = vrot.slane %v5745_v29, %v5741_v37  ;;  %v2434_v49 = vrot.slane %v5747_v10, %v5741_v37  ;;  %v2438_v62 = vrot.slane %v5749_v19, %v5741_v37 }
 0x37e   :  { %v2360_v51 = vpop.xlane.xlu1 %2359  ;;  %v2442_v53 = vrot.slane %v5751_v43, %v5741_v37  ;;  %v2446_v12 = vrot.slane %v5753_v13, %v5741_v37  ;;  %v2450_v52 = vrot.slane %v5759_v39, %v5741_v37  ;;  %v2454_v31 = vrot.slane %v5763_v17, %v5741_v37 }
 0x37f   :  { %v2488_v48 = vsel %vm2487_vm0, %v2430_v16, %v2426_v24  ;;  %v5787_v45 = vadd.f32 %v2387_v59, %v2357_v6  ;;  %v5789_v54 = vadd.f32 %v2387_v59, %v2360_v51 }
 0x380   :  { %v2490_v35 = vsel %vm2489_vm1, %v2434_v49, %v2488_v48 }
 0x381   :  { %v2492_v61 = vsel %vm2491_vm2, %v2438_v62, %v2490_v35  ;;  %v2458_v3 = vrot.slane %v5787_v45, %v5741_v37  ;;  %v2462_v63 = vrot.slane %v5789_v54, %v5741_v37 }
 0x382   :  { %v2494_v41 = vsel %vm2493_vm3, %v2442_v53, %v2492_v61 }
 0x383   :  { %v2496_v50 = vsel %vm2495_vm4, %v2446_v12, %v2494_v41  ;;  %v2501_v46 = vsel %vm2487_vm0, %v2462_v63, %v2458_v3 }
 0x384   :  { %v2363_v58 = vpop.xlane.xlu1 %2362  ;;  %v2498_v18 = vsel %vm2497_vm5, %v2450_v52, %v2496_v50  ;;  %v5838_v50 = vsub.s32 5, %v6443_v23 }
 0x385   :  { %v2500_v28 = vsel %vm2499_vm6, %v2454_v31, %v2498_v18  ;;  %v5791_v14 = vadd.f32 %v2387_v59, %v2363_v58 }
 0x386   :  { %v2511_v15 = vsel %vm2510_vm7, %v2500_v28, -inf  ;;  %3657 = vst.msk [vmem:[%s6331_s9] sm:$0xff] %vm2510_vm7, %v2500_v28 }
 0x387   :  { %2512 = vmax.xlane.f32.xlu1 %v2511_v15  ;;  %v2466_v2 = vrot.slane %v5791_v14, %v5741_v37 }
 0x389   :  { %v2502_v47 = vsel %vm2489_vm1, %v2466_v2, %v2501_v46 }
 0x38a   :  { %v2366_v27 = vpop.xlane.xlu1 %2365 }
 0x38b   :  { %v5793_v4 = vadd.f32 %v2387_v59, %v2366_v27 }
 0x38d   :  { %v2470_v40 = vrot.slane %v5793_v4, %v5741_v37 }
 0x38f   :  { %v2503_v16 = vsel %vm2491_vm2, %v2470_v40, %v2502_v47 }
 0x390   :  { %v2369_v22 = vpop.xlane.xlu1 %2368 }
 0x391   :  { %v5795_v57 = vadd.f32 %v2387_v59, %v2369_v22 }
 0x393   :  { %v2474_v34 = vrot.slane %v5795_v57, %v5741_v37 }
 0x395   :  { %v2504_v49 = vsel %vm2493_vm3, %v2474_v34, %v2503_v16  ;;  %v5852_v34 = vsub.s32 7, %v6443_v23 }
 0x396   :  { %v2372_v26 = vpop.xlane.xlu1 %2371 }
 0x397   :  { %v5801_v21 = vadd.f32 %v2387_v59, %v2372_v26  ;;  %v5846_v26 = vsub.s32 6, %v6443_v23 }
 0x399   :  { %v2478_v33 = vrot.slane %v5801_v21, %v5741_v37 }
 0x39b   :  { %v2505_v48 = vsel %vm2495_vm4, %v2478_v33, %v2504_v49 }
 0x39c   :  { %v2375_v60 = vpop.xlane.xlu1 %2374 }
 0x39d   :  { %v5805_v5 = vadd.f32 %v2387_v59, %v2375_v60 }
 0x39f   :  { %v2482_v6 = vrot.slane %v5805_v5, %v5741_v37 }
 0x3a1   :  { %v2506_v53 = vsel %vm2497_vm5, %v2482_v6, %v2505_v48 }
 0x3a2   :  { %v2378_v24 = vpop.xlane.xlu1 %2377 }
 0x3a3   :  { %v5818_v51 = vadd.f32 %v2387_v59, %v2378_v24  ;;  %v5832_v59 = vsub.s32 4, %v6443_v23 }
 0x3a5   :  { %v2486_v62 = vrot.slane %v5818_v51, %v5741_v37 }
 0x3a7   :  { %v2507_v35 = vsel %vm2499_vm6, %v2486_v62, %v2506_v53 }
 0x3a8   :  { %v2514_v12 = vsel %vm2510_vm7, %v2507_v35, -inf  ;;  %3658 = vst.msk [vmem:[%s6331_s9 + $0x8] sm:$0xff] %vm2510_vm7, %v2507_v35 }
 0x3a9   :  { %2515 = vmax.xlane.f32.xlu1 %v2514_v12 }
 0x414   :  { %v2513_v61 = vpop.xlane.xlu1 %2512 }
 0x415   :  { %v2522_v52 = vrot.slane %v2513_v61, %v5063_v9  ;;  %v2526_v41 = vrot.slane %v2513_v61, %v5071_v11  ;;  %v2534_v31 = vrot.slane %v2513_v61, %v5263_v38  ;;  %v2538_v58 = vrot.slane %v2513_v61, %v5832_v59 }
 0x416   :  { %v2530_v18 = vrot.slane %v2513_v61, %v5273_v42  ;;  %v2542_v60 = vrot.slane %v2513_v61, %v5838_v50  ;;  %v2550_v33 = vrot.slane %v2513_v61, %v5852_v34 }
 0x417   :  { %v2599_v28 = vsub.f32 %v5743_v32, %v2522_v52  ;;  %v2600_v15 = vsub.f32 %v5745_v29, %v2526_v41  ;;  %v2602_v27 = vsub.f32 %v5749_v19, %v2534_v31  ;;  %v2603_v3 = vsub.f32 %v5751_v43, %v2538_v58 }
 0x418   :  { %v2601_v2 = vsub.f32 %v5747_v10, %v2530_v18  ;;  %v2546_v32 = vrot.slane %v2513_v61, %v5846_v26  ;;  %v2604_v29 = vsub.f32 %v5753_v13, %v2542_v60  ;;  %v2606_v23 = vsub.f32 %v5763_v17, %v2550_v33 }
 0x419   :  { %v2615_v22 = vmul.f32 1.442695, %v2599_v28  ;;  %v2621_v63 = vmul.f32 1.442695, %v2602_v27  ;;  %v2617_v40 = vmul.f32 1.442695, %v2600_v15 }
 0x41a   :  { %v2623_v19 = vmul.f32 1.442695, %v2603_v3  ;;  %v2619_v46 = vmul.f32 1.442695, %v2601_v2  ;;  %v2605_v43 = vsub.f32 %v5759_v39, %v2546_v32  ;;  %v2625_v47 = vmul.f32 1.442695, %v2604_v29 }
 0x41b   :  { %4673 = vpow2.f32 %v2615_v22  ;;  %v2629_v16 = vmul.f32 1.442695, %v2606_v23 }
 0x41c   :  { %4675 = vpow2.f32 %v2621_v63  ;;  %v2627_v6 = vmul.f32 1.442695, %v2605_v43 }
 0x41d   :  { %4677 = vpow2.f32 %v2617_v40 }
 0x41e   :  { %4679 = vpow2.f32 %v2623_v19 }
 0x41f   :  { %4681 = vpow2.f32 %v2619_v46 }
 0x420   :  { %4683 = vpow2.f32 %v2625_v47 }
 0x421   :  { %4685 = vpow2.f32 %v2627_v6 }
 0x422   :  { %4687 = vpow2.f32 %v2629_v16 }
 0x425   :  { %v5858_v10 = vpop.eup %4673 }
 0x426   :  { %2664 = vperm.xlu1 %4480, %v5858_v10   ;;  %v5862_v13 = vpop.eup %4675 }
 0x427   :  { %v5864_v24 = vpop.eup %4677  ;;  %2673 = vperm.xlu0 %4479, %v5862_v13  }
 0x428   :  { %v5868_v39 = vpop.eup %4679 }
 0x429   :  { %v5870_v49 = vpop.eup %4681 }
 0x42a   :  { %2667 = vperm.xlu1 %4480, %v5864_v24   ;;  %v5874_v17 = vpop.eup %4683 }
 0x42b   :  { %2676 = vperm.xlu0 %4479, %v5868_v39   ;;  %v5877_v62 = vpop.eup %4685 }
 0x42c   :  { %v5882_v12 = vpop.eup %4687 }
 0x42e   :  { %2670 = vperm.xlu1 %4480, %v5870_v49  }
 0x42f   :  { %2679 = vperm.xlu0 %4479, %v5874_v17  }
 0x433   :  { %2682 = vperm.xlu0 %4479, %v5877_v62  }
 0x436   :  { %v2516_v48 = vpop.xlane.xlu1 %2515 }
 0x437   :  { %v2554_v53 = vrot.slane %v2516_v48, %v5063_v9  ;;  %v2558_v35 = vrot.slane %v2516_v48, %v5071_v11  ;;  %v2562_v61 = vrot.slane %v2516_v48, %v5273_v42  ;;  %2685 = vperm.xlu0 %4479, %v5882_v12   ;;  %v2566_v58 = vrot.slane %v2516_v48, %v5263_v38 }
 0x438   :  { %v2570_v15 = vrot.slane %v2516_v48, %v5832_v59  ;;  %v2574_v60 = vrot.slane %v2516_v48, %v5838_v50 }
 0x439   :  { %v2607_v52 = vsub.f32 %v5787_v45, %v2554_v53  ;;  %v2608_v41 = vsub.f32 %v5789_v54, %v2558_v35  ;;  %v2609_v18 = vsub.f32 %v5791_v14, %v2562_v61  ;;  %v2610_v27 = vsub.f32 %v5793_v4, %v2566_v58 }
 0x43a   :  { %v2611_v45 = vsub.f32 %v5795_v57, %v2570_v15  ;;  %v2578_v14 = vrot.slane %v2516_v48, %v5846_v26  ;;  %v2612_v63 = vsub.f32 %v5801_v21, %v2574_v60  ;;  %v2582_v4 = vrot.slane %v2516_v48, %v5852_v34 }
 0x43b   :  { %v2631_v31 = vmul.f32 1.442695, %v2607_v52  ;;  %v2633_v28 = vmul.f32 1.442695, %v2608_v41  ;;  %v2635_v22 = vmul.f32 1.442695, %v2609_v18 }
 0x43c   :  { %v2637_v54 = vmul.f32 1.442695, %v2610_v27  ;;  %v2639_v2 = vmul.f32 1.442695, %v2611_v45  ;;  %v2613_v57 = vsub.f32 %v5805_v5, %v2578_v14  ;;  %v2641_v32 = vmul.f32 1.442695, %v2612_v63 }
 0x43d   :  { %4689 = vpow2.f32 %v2631_v31  ;;  %v2614_v19 = vsub.f32 %v5818_v51, %v2582_v4 }
 0x43e   :  { %4691 = vpow2.f32 %v2633_v28  ;;  %v2643_v21 = vmul.f32 1.442695, %v2613_v57 }
 0x43f   :  { %4693 = vpow2.f32 %v2635_v22  ;;  %v2645_v33 = vmul.f32 1.442695, %v2614_v19 }
 0x440   :  { %4695 = vpow2.f32 %v2637_v54 }
 0x441   :  { %4697 = vpow2.f32 %v2639_v2 }
 0x442   :  { %4699 = vpow2.f32 %v2641_v32 }
 0x443   :  { %4701 = vpow2.f32 %v2643_v21 }
 0x444   :  { %4703 = vpow2.f32 %v2645_v33 }
 0x447   :  { %v5894_v3 = vpop.eup %4689 }
 0x448   :  { %2688 = vperm.xlu1 %4480, %v5894_v3   ;;  %v5899_v40 = vpop.eup %4691 }
 0x449   :  { %v5904_v29 = vpop.eup %4693 }
 0x44a   :  { %v5908_v46 = vpop.eup %4695 }
 0x44b   :  { %v5911_v43 = vpop.eup %4697 }
 0x44c   :  { %2691 = vperm.xlu1 %4480, %v5899_v40   ;;  %v5914_v5 = vpop.eup %4699 }
 0x44d   :  { %v5917_v47 = vpop.eup %4701 }
 0x44e   :  { %v5920_v51 = vpop.eup %4703 }
 0x450   :  { %2694 = vperm.xlu1 %4480, %v5904_v29  }
 0x454   :  { %2697 = vperm.xlu1 %4480, %v5908_v46  }
 0x458   :  { %2700 = vperm.xlu1 %4480, %v5911_v43  }
 0x45c   :  { %2703 = vperm.xlu1 %4480, %v5914_v5  }
 0x460   :  { %2706 = vperm.xlu1 %4480, %v5917_v47  }
 0x464   :  { %2709 = vperm.xlu1 %4480, %v5920_v51  }
 0x4a5   :  { %v2665_v23 = vpop.permute.xlu1 %2664 }
 0x4a6   :  { %v2674_v6 = vpop.permute.xlu0 %2673  ;;  %v2714_v35 = vrot.slane %v2665_v23, %v5741_v37 }
 0x4a7   :  { %v2726_v41 = vrot.slane %v2674_v6, %v5741_v37 }
 0x4a9   :  { %v2668_v16 = vpop.permute.xlu1 %2667 }
 0x4aa   :  { %v2718_v48 = vrot.slane %v2668_v16, %v5741_v37  ;;  %v2677_v53 = vpop.permute.xlu0 %2676 }
 0x4ab   :  { %v2730_v15 = vrot.slane %v2677_v53, %v5741_v37 }
 0x4ac   :  { %v2775_v31 = vsel %vm2487_vm0, %v2718_v48, %v2714_v35 }
 0x4ad   :  { %v2671_v61 = vpop.permute.xlu1 %2670 }
 0x4ae   :  { %v2722_v52 = vrot.slane %v2671_v61, %v5741_v37  ;;  %v2680_v58 = vpop.permute.xlu0 %2679 }
 0x4af   :  { %v2734_v60 = vrot.slane %v2680_v58, %v5741_v37 }
 0x4b0   :  { %v2776_v18 = vsel %vm2489_vm1, %v2722_v52, %v2775_v31 }
 0x4b1   :  { %v2777_v28 = vsel %vm2491_vm2, %v2726_v41, %v2776_v18 }
 0x4b2   :  { %v2683_v27 = vpop.permute.xlu0 %2682  ;;  %v2778_v22 = vsel %vm2493_vm3, %v2730_v15, %v2777_v28 }
 0x4b3   :  { %v2738_v45 = vrot.slane %v2683_v27, %v5741_v37  ;;  %v2779_v54 = vsel %vm2495_vm4, %v2734_v60, %v2778_v22 }
 0x4b5   :  { %v2780_v2 = vsel %vm2497_vm5, %v2738_v45, %v2779_v54 }
 0x4b6   :  { %v2686_v14 = vpop.permute.xlu0 %2685 }
 0x4b7   :  { %v2742_v63 = vrot.slane %v2686_v14, %v5741_v37 }
 0x4b9   :  { %v2781_v4 = vsel %vm2499_vm6, %v2742_v63, %v2780_v2 }
 0x4ba   :  { %v2791_v57 = vsel %vm2510_vm7, %v2781_v4, 0.0 }
 0x4bb   :  { %2792 = vadd.xlane.f32.xlu0 %v2791_v57 }
 0x4c7   :  { %v2689_v32 = vpop.permute.xlu1 %2688 }
 0x4c8   :  { %v2746_v53 = vrot.slane %v2689_v32, %v5741_v37 }
 0x4cb   :  { %v2692_v19 = vpop.permute.xlu1 %2691 }
 0x4cc   :  { %v2750_v16 = vrot.slane %v2692_v19, %v5741_v37 }
 0x4ce   :  { %v2782_v41 = vsel %vm2487_vm0, %v2750_v16, %v2746_v53 }
 0x4cf   :  { %v2695_v21 = vpop.permute.xlu1 %2694 }
 0x4d0   :  { %v2754_v48 = vrot.slane %v2695_v21, %v5741_v37 }
 0x4d2   :  { %v2783_v58 = vsel %vm2489_vm1, %v2754_v48, %v2782_v41 }
 0x4d3   :  { %v2698_v33 = vpop.permute.xlu1 %2697 }
 0x4d4   :  { %v2758_v35 = vrot.slane %v2698_v33, %v5741_v37 }
 0x4d6   :  { %v2784_v28 = vsel %vm2491_vm2, %v2758_v35, %v2783_v58 }
 0x4d7   :  { %v2701_v23 = vpop.permute.xlu1 %2700 }
 0x4d8   :  { %v2762_v61 = vrot.slane %v2701_v23, %v5741_v37 }
 0x4da   :  { %v2785_v15 = vsel %vm2493_vm3, %v2762_v61, %v2784_v28 }
 0x4db   :  { %v2704_v6 = vpop.permute.xlu1 %2703 }
 0x4dc   :  { %v2766_v31 = vrot.slane %v2704_v6, %v5741_v37 }
 0x4de   :  { %v2786_v22 = vsel %vm2495_vm4, %v2766_v31, %v2785_v15 }
 0x4df   :  { %v2707_v52 = vpop.permute.xlu1 %2706 }
 0x4e0   :  { %v2770_v18 = vrot.slane %v2707_v52, %v5741_v37 }
 0x4e2   :  { %v2787_v45 = vsel %vm2497_vm5, %v2770_v18, %v2786_v22 }
 0x4e3   :  { %v2710_v27 = vpop.permute.xlu1 %2709 }
 0x4e4   :  { %v2774_v60 = vrot.slane %v2710_v27, %v5741_v37 }
 0x4e6   :  { %v2788_v54 = vsel %vm2499_vm6, %v2774_v60, %v2787_v45 }
 0x4e7   :  { %v2794_v14 = vsel %vm2510_vm7, %v2788_v54, 0.0 }
 0x4e8   :  { %2795 = vadd.xlane.f32.xlu1 %v2794_v14 }
 0x548   :  { %v2793_v63 = vpop.xlane.xlu0 %2792 }
 0x549   :  { %v2802_v2 = vrot.slane %v2793_v63, %v5063_v9  ;;  %v2806_v4 = vrot.slane %v2793_v63, %v5071_v11  ;;  %v2810_v57 = vrot.slane %v2793_v63, %v5273_v42  ;;  %v2814_v32 = vrot.slane %v2793_v63, %v5263_v38 }
 0x54a   :  { %v2818_v19 = vrot.slane %v2793_v63, %v5832_v59  ;;  %v2822_v33 = vrot.slane %v2793_v63, %v5838_v50  ;;  %v2826_v28 = vrot.slane %v2793_v63, %v5846_v26 }
 0x54b   :  { %4705 = vrcp.f32 %v2802_v2 }
 0x54c   :  { %4707 = vrcp.f32 %v2806_v4 }
 0x54d   :  { %4709 = vrcp.f32 %v2810_v57 }
 0x54e   :  { %4711 = vrcp.f32 %v2814_v32 }
 0x54f   :  { %4713 = vrcp.f32 %v2818_v19  ;;  %v6445_v19 = vld [vmem:[#allocation10_spill] sm:$0xff] }
 0x550   :  { %4715 = vrcp.f32 %v2822_v33  ;;  %v6446_v33 = vld [vmem:[#allocation13_spill] sm:$0xff] }
 0x555   :  { %v4706_v21 = vpop.eup %4705 }
 0x556   :  { %v4708_v23 = vpop.eup %4707  ;;  %v2880_v6 = vmul.f32 %v4706_v21, %v5858_v10 }
 0x557   :  { %v4710_v16 = vpop.eup %4709  ;;  %v2882_v48 = vmul.f32 %v4708_v23, %v5864_v24  ;;  %v6447_v23 = vld [vmem:[#allocation12_spill] sm:$0xff] }
 0x558   :  { %2913 = vperm.xlu0 %4479, %v2880_v6   ;;  %v2884_v53 = vmul.f32 %v4710_v16, %v5870_v49  ;;  %v4712_v35 = vpop.eup %4711 }
 0x559   :  { %2918 = vperm.xlu1 %4480, %v2882_v48   ;;  %v2886_v61 = vmul.f32 %v4712_v35, %v5862_v13  ;;  %v4714_v52 = vpop.eup %4713 }
 0x55a   :  { %v2888_v41 = vmul.f32 %v4714_v52, %v5868_v39  ;;  %v4716_v31 = vpop.eup %4715  ;;  %v2830_v39 = vrot.slane %v2793_v63, %v5852_v34 }
 0x55b   :  { %v2890_v10 = vmul.f32 %v4716_v31, %v5874_v17 }
 0x55c   :  { %2923 = vperm.xlu0 %4479, %v2884_v53  }
 0x560   :  { %2928 = vperm.xlu0 %4479, %v2886_v61  }
 0x564   :  { %2933 = vperm.xlu0 %4479, %v2888_v41  }
 0x568   :  { %2938 = vperm.xlu0 %4479, %v2890_v10  }
 0x575   :  { %v2796_v58 = vpop.xlane.xlu1 %2795 }
 0x576   :  { %v2838_v24 = vrot.slane %v2796_v58, %v5071_v11  ;;  %v2834_v18 = vrot.slane %v2796_v58, %v5063_v9  ;;  %v2842_v49 = vrot.slane %v2796_v58, %v5273_v42  ;;  %v2846_v13 = vrot.slane %v2796_v58, %v5263_v38 }
 0x577   :  { %v2850_v17 = vrot.slane %v2796_v58, %v5832_v59  ;;  %v2854_v9 = vrot.slane %v2796_v58, %v5838_v50  ;;  %v2858_v38 = vrot.slane %v2796_v58, %v5846_v26  ;;  %v2862_v50 = vrot.slane %v2796_v58, %v5852_v34 }
 0x578   :  { %4717 = vrcp.f32 %v2838_v24 }
 0x579   :  { %4719 = vrcp.f32 %v2834_v18 }
 0x57a   :  { %4721 = vrcp.f32 %v2842_v49 }
 0x57b   :  { %4723 = vrcp.f32 %v2826_v28 }
 0x57c   :  { %4725 = vrcp.f32 %v2846_v13 }
 0x57d   :  { %4727 = vrcp.f32 %v2830_v39 }
 0x57e   :  { %4729 = vrcp.f32 %v2850_v17 }
 0x57f   :  { %4731 = vrcp.f32 %v2854_v9 }
 0x580   :  { %4733 = vrcp.f32 %v2858_v38 }
 0x581   :  { %4735 = vrcp.f32 %v2862_v50 }
 0x582   :  { %v4718_v15 = vpop.eup %4717 }
 0x583   :  { %v4720_v11 = vpop.eup %4719  ;;  %v2898_v42 = vmul.f32 %v4718_v15, %v5899_v40 }
 0x584   :  { %v4722_v27 = vpop.eup %4721  ;;  %v2896_v22 = vmul.f32 %v4720_v11, %v5894_v3 }
 0x585   :  { %v4724_v60 = vpop.eup %4723  ;;  %2958 = vperm.xlu1 %4480, %v2898_v42   ;;  %v2900_v45 = vmul.f32 %v4722_v27, %v5904_v29 }
 0x586   :  { %2953 = vperm.xlu0 %4479, %v2896_v22   ;;  %v4726_v59 = vpop.eup %4725  ;;  %v2892_v54 = vmul.f32 %v4724_v60, %v5877_v62 }
 0x587   :  { %v4728_v14 = vpop.eup %4727  ;;  %v2902_v40 = vmul.f32 %v4726_v59, %v5908_v46 }
 0x588   :  { %v4730_v3 = vpop.eup %4729  ;;  %v2894_v63 = vmul.f32 %v4728_v14, %v5882_v12  ;;  %v6444_v12 = vld [vmem:[#allocation11_spill] sm:$0xff] }
 0x589   :  { %2963 = vperm.xlu1 %4480, %v2900_v45   ;;  %v2904_v26 = vmul.f32 %v4730_v3, %v5911_v43  ;;  %v4732_v29 = vpop.eup %4731 }
 0x58a   :  { %2943 = vperm.xlu0 %4479, %v2892_v54   ;;  %v2906_v62 = vmul.f32 %v4732_v29, %v5914_v5  ;;  %v4734_v2 = vpop.eup %4733  ;;  %v6448_v29 = vld [vmem:[#allocation15_spill] sm:$0xff] }
 0x58b   :  { %v2908_v4 = vmul.f32 %v4734_v2, %v5917_v47  ;;  %v4736_v57 = vpop.eup %4735  ;;  %v6449_v2 = vld [vmem:[#allocation14_spill] sm:$0xff] }
 0x58c   :  { %v2910_v34 = vmul.f32 %v4736_v57, %v5920_v51 }
 0x58d   :  { %2968 = vperm.xlu1 %4480, %v2902_v40  }
 0x58e   :  { %2948 = vperm.xlu0 %4479, %v2894_v63  }
 0x591   :  { %2973 = vperm.xlu1 %4480, %v2904_v26  }
 0x595   :  { %2978 = vperm.xlu1 %4480, %v2906_v62  }
 0x599   :  { %2983 = vperm.xlu1 %4480, %v2908_v4  }
 0x59d   :  { %2988 = vperm.xlu1 %4480, %v2910_v34  }
 0x5d7   :  { %v5987_v46 = vpop.permute.xlu0 %2913 }
 0x5d8   :  { %v2991_v32 = vmul.f32 %v5987_v46, %v6444_v12  ;;  %v2992_v43 = vmul.f32 %v5987_v46, %v6445_v19  ;;  %v2993_v5 = vmul.f32 %v5987_v46, %v5328_v8  ;;  %v2994_v21 = vmul.f32 %v5987_v46, %v5319_v1  ;;  %v5997_v47 = vpop.permute.xlu1 %2918 }
 0x5d9   :  { %v2995_v51 = vmul.f32 %v5997_v47, %v6446_v33  ;;  %v2996_v6 = vmul.f32 %v5997_v47, %v6447_v23  ;;  %v2997_v16 = vmul.f32 %v5997_v47, %v5340_v7  ;;  %v2998_v8 = vmul.f32 %v5997_v47, %v5333_v44 }
 0x5da   :  { %v3055_v48 = vrot.slane %v2991_v32, 4  ;;  %v3061_v53 = vrot.slane %v2992_v43, 4  ;;  %v3067_v35 = vrot.slane %v2993_v5, 4  ;;  %v3073_v61 = vrot.slane %v2994_v21, 4 }
 0x5db   :  { %v3079_v52 = vrot.slane %v2995_v51, 4  ;;  %v3085_v1 = vrot.slane %v2996_v6, 4  ;;  %v3091_v41 = vrot.slane %v2997_v16, 4  ;;  %v3097_v13 = vrot.slane %v2998_v8, 4  ;;  %v6007_v44 = vpop.permute.xlu0 %2923 }
 0x5dc   :  { %v3056_v31 = vadd.f32 %v3055_v48, %v2991_v32  ;;  %v3062_v10 = vadd.f32 %v3061_v53, %v2992_v43  ;;  %v3068_v58 = vadd.f32 %v3067_v35, %v2993_v5  ;;  %v3074_v24 = vadd.f32 %v3073_v61, %v2994_v21  ;;  %v6450_v48 = vld [vmem:[#allocation17_spill] sm:$0xff] }
 0x5dd   :  { %v3080_v18 = vadd.f32 %v3079_v52, %v2995_v51  ;;  %v3086_v49 = vadd.f32 %v3085_v1, %v2996_v6  ;;  %v3092_v28 = vadd.f32 %v3091_v41, %v2997_v16  ;;  %v3098_v27 = vadd.f32 %v3097_v13, %v2998_v8  ;;  %v6451_v8 = vld [vmem:[#allocation16_spill] sm:$0xff] }
 0x5de   :  { %v3057_v39 = vrot.slane %v3056_v31, 2  ;;  %v3063_v7 = vrot.slane %v3062_v10, 2  ;;  %v3069_v17 = vrot.slane %v3068_v58, 2  ;;  %v3075_v15 = vrot.slane %v3074_v24, 2 }
 0x5df   :  { %v3081_v9 = vrot.slane %v3080_v18, 2  ;;  %v3087_v11 = vrot.slane %v3086_v49, 2  ;;  %v3093_v42 = vrot.slane %v3092_v28, 2  ;;  %v3099_v50 = vrot.slane %v3098_v27, 2  ;;  %v6017_v34 = vpop.permute.xlu0 %2928 }
 0x5e0   :  { %v3058_v22 = vadd.f32 %v3057_v39, %v3056_v31  ;;  %v3064_v60 = vadd.f32 %v3063_v7, %v3062_v10  ;;  %v3070_v38 = vadd.f32 %v3069_v17, %v3068_v58  ;;  %v3076_v45 = vadd.f32 %v3075_v15, %v3074_v24 }
 0x5e1   :  { %v3082_v59 = vadd.f32 %v3081_v9, %v3080_v18  ;;  %v3088_v54 = vadd.f32 %v3087_v11, %v3086_v49  ;;  %v3094_v14 = vadd.f32 %v3093_v42, %v3092_v28  ;;  %v3578_v63 = vrot.slane %v5987_v46, %v5741_v37 }
 0x5e2   :  { %v3059_v40 = vrot.slane %v3058_v22, 1  ;;  %v3065_v3 = vrot.slane %v3064_v60, 1  ;;  %v3071_v26 = vrot.slane %v3070_v38, 1  ;;  %v2999_v62 = vmul.f32 %v6007_v44, %v6448_v29 }
 0x5e3   :  { %v3000_v4 = vmul.f32 %v6007_v44, %v6449_v2  ;;  %v3001_v57 = vmul.f32 %v6007_v44, %v5352_v0  ;;  %v3077_v12 = vrot.slane %v3076_v45, 1  ;;  %v3083_v32 = vrot.slane %v3082_v59, 1 }
 0x5e4   :  { %v3089_v19 = vrot.slane %v3088_v54, 1  ;;  %v3095_v43 = vrot.slane %v3094_v14, 1  ;;  %v3100_v5 = vadd.f32 %v3099_v50, %v3098_v27  ;;  %v3002_v21 = vmul.f32 %v6007_v44, %v5345_v36 }
 0x5e5   :  { %v3103_v33 = vrot.slane %v2999_v62, 4  ;;  %v3109_v51 = vrot.slane %v3000_v4, 4  ;;  %v3060_v23 = vadd.f32 %v3059_v40, %v3058_v22  ;;  %v3066_v6 = vadd.f32 %v3065_v3, %v3064_v60 }
 0x5e6   :  { %v3115_v16 = vrot.slane %v3001_v57, 4  ;;  %v3003_v53 = vmul.f32 %v6017_v34, %v6450_v48  ;;  %v3121_v61 = vrot.slane %v3002_v21, 4  ;;  %v3004_v52 = vmul.f32 %v6017_v34, %v6451_v8 }
 0x5e7   :  { %v3104_v35 = vadd.f32 %v3103_v33, %v2999_v62  ;;  %v3110_v0 = vadd.f32 %v3109_v51, %v3000_v4  ;;  %v3072_v1 = vadd.f32 %v3071_v26, %v3070_v38  ;;  %v3005_v31 = vmul.f32 %v6017_v34, %v5364_v30 }
 0x5e8   :  { %v3116_v41 = vadd.f32 %v3115_v16, %v3001_v57  ;;  %v3006_v36 = vmul.f32 %v6017_v34, %v5357_v56  ;;  %v3122_v24 = vadd.f32 %v3121_v61, %v3002_v21  ;;  %v3127_v18 = vrot.slane %v3003_v53, 4  ;;  %v6031_v57 = vpop.permute.xlu0 %2933 }
 0x5e9   :  { %v3105_v10 = vrot.slane %v3104_v35, 2  ;;  %v3111_v58 = vrot.slane %v3110_v0, 2  ;;  %v3133_v28 = vrot.slane %v3004_v52, 4  ;;  %v3139_v13 = vrot.slane %v3005_v31, 4 }
 0x5ea   :  { %v3117_v49 = vrot.slane %v3116_v41, 2  ;;  %v3145_v39 = vrot.slane %v3006_v36, 4  ;;  %v3101_v7 = vrot.slane %v3100_v5, 1  ;;  %v3123_v15 = vrot.slane %v3122_v24, 2 }
 0x5eb   :  { %v3106_v17 = vadd.f32 %v3105_v10, %v3104_v35  ;;  %v3128_v9 = vadd.f32 %v3127_v18, %v3003_v53  ;;  %v3112_v11 = vadd.f32 %v3111_v58, %v3110_v0  ;;  %v3134_v27 = vadd.f32 %v3133_v28, %v3004_v52  ;;  %v6453_v35 = vld [vmem:[#allocation18_spill] sm:$0xff]  ;;  %v6454_v28 = vld [vmem:[#allocation21_spill] sm:$0xff] }
 0x5ec   :  { %v3118_v42 = vadd.f32 %v3117_v49, %v3116_v41  ;;  %v3140_v22 = vadd.f32 %v3139_v13, %v3005_v31  ;;  %v3084_v30 = vadd.f32 %v3083_v32, %v3082_v59  ;;  %v3090_v60 = vadd.f32 %v3089_v19, %v3088_v54 }
 0x5ed   :  { %v3124_v38 = vadd.f32 %v3123_v15, %v3122_v24  ;;  %v3146_v56 = vadd.f32 %v3145_v39, %v3006_v36  ;;  %v3096_v50 = vadd.f32 %v3095_v43, %v3094_v14  ;;  %v3107_v40 = vrot.slane %v3106_v17, 1  ;;  %v6455_v39 = vld [vmem:[#allocation20_spill] sm:$0xff] }
 0x5ee   :  { %v3129_v3 = vrot.slane %v3128_v9, 2  ;;  %v3135_v26 = vrot.slane %v3134_v27, 2  ;;  %v3078_v29 = vadd.f32 %v3077_v12, %v3076_v45  ;;  %v3102_v62 = vadd.f32 %v3101_v7, %v3100_v5 }
 0x5ef   :  { %v3582_v2 = vrot.slane %v5997_v47, %v5741_v37  ;;  %v3141_v4 = vrot.slane %v3140_v22, 2  ;;  %v3113_v21 = vrot.slane %v3112_v11, 1  ;;  %v3119_v33 = vrot.slane %v3118_v42, 1 }
 0x5f0   :  { %v3586_v59 = vrot.slane %v6007_v44, %v5741_v37  ;;  %v3503_v54 = vsel %vm2487_vm0, %v3084_v30, %v3060_v23  ;;  %v3510_v14 = vsel %vm2487_vm0, %v3090_v60, %v3066_v6  ;;  %v3125_v32 = vrot.slane %v3124_v38, 1  ;;  %v6452_v44 = vld [vmem:[#allocation19_spill] sm:$0xff] }
 0x5f1   :  { %v3147_v19 = vrot.slane %v3146_v56, 2  ;;  %v3517_v45 = vsel %vm2487_vm0, %v3096_v50, %v3072_v1  ;;  %v3108_v12 = vadd.f32 %v3107_v40, %v3106_v17  ;;  %v3130_v43 = vadd.f32 %v3129_v3, %v3128_v9 }
 0x5f2   :  { %v3136_v5 = vadd.f32 %v3135_v26, %v3134_v27  ;;  %v3524_v47 = vsel %vm2487_vm0, %v3102_v62, %v3078_v29  ;;  %v3639_v51 = vsel %vm2487_vm0, %v3582_v2, %v3578_v63  ;;  %v3142_v16 = vadd.f32 %v3141_v4, %v3140_v22  ;;  %v6054_v63 = vpop.permute.xlu0 %2938 }
 0x5f3   :  { %v3007_v23 = vmul.f32 %v6031_v57, %v6452_v44  ;;  %v3114_v48 = vadd.f32 %v3113_v21, %v3112_v11  ;;  %v3120_v6 = vadd.f32 %v3119_v33, %v3118_v42  ;;  %v6046_v53 = vsel %vm2489_vm1, %v3586_v59, %v3639_v51  ;;  %v6456_v42 = vld [vmem:[#allocation42_spill] sm:$0xff] }
 0x5f4   :  { %v3008_v0 = vmul.f32 %v6031_v57, %v6453_v35  ;;  %v3126_v61 = vadd.f32 %v3125_v32, %v3124_v38  ;;  %v3148_v8 = vadd.f32 %v3147_v19, %v3146_v56  ;;  %v3009_v52 = vmul.f32 %v6031_v57, %v5376_v55 }
 0x5f5   :  { %v3010_v46 = vmul.f32 %v6031_v57, %v5369_v20  ;;  %v3504_v1 = vsel %vm2489_vm1, %v3108_v12, %v3503_v54  ;;  %v3131_v41 = vrot.slane %v3130_v43, 1  ;;  %v3137_v31 = vrot.slane %v3136_v5, 1 }
 0x5f6   :  { %v3151_v36 = vrot.slane %v3007_v23, 4  ;;  %v3143_v10 = vrot.slane %v3142_v16, 1  ;;  %v3157_v58 = vrot.slane %v3008_v0, 4  ;;  %v3163_v24 = vrot.slane %v3009_v52, 4 }
 0x5f7   :  { %v3169_v18 = vrot.slane %v3010_v46, 4  ;;  %v3011_v13 = vmul.f32 %v6054_v63, %v6454_v28  ;;  %v3012_v55 = vmul.f32 %v6054_v63, %v6455_v39  ;;  %v3013_v20 = vmul.f32 %v6054_v63, %v5388_v25 }
 0x5f8   :  { %v3152_v49 = vadd.f32 %v3151_v36, %v3007_v23  ;;  %v3149_v7 = vrot.slane %v3148_v8, 1  ;;  %v3158_v17 = vadd.f32 %v3157_v58, %v3008_v0  ;;  %v3164_v15 = vadd.f32 %v3163_v24, %v3009_v52  ;;  %v6458_v24 = vld [vmem:[#allocation26_spill] sm:$0xff] }
 0x5f9   :  { %v3170_v9 = vadd.f32 %v3169_v18, %v3010_v46  ;;  %v3014_v27 = vmul.f32 %v6054_v63, %v6456_v42  ;;  %v3175_v22 = vrot.slane %v3011_v13, 4  ;;  %v3181_v30 = vrot.slane %v3012_v55, 4 }
 0x5fa   :  { %v3153_v11 = vrot.slane %v3152_v49, 2  ;;  %v3159_v60 = vrot.slane %v3158_v17, 2  ;;  %v3165_v38 = vrot.slane %v3164_v15, 2  ;;  %v3187_v50 = vrot.slane %v3013_v20, 4 }
 0x5fb   :  { %v3171_v56 = vrot.slane %v3170_v9, 2  ;;  %v3176_v3 = vadd.f32 %v3175_v22, %v3011_v13  ;;  %v3182_v26 = vadd.f32 %v3181_v30, %v3012_v55  ;;  %v3193_v29 = vrot.slane %v3014_v27, 4  ;;  %v6461_v30 = vld [vmem:[#allocation29_spill] sm:$0xff] }
 0x5fc   :  { %v3154_v40 = vadd.f32 %v3153_v11, %v3152_v49  ;;  %v3511_v25 = vsel %vm2489_vm1, %v3114_v48, %v3510_v14  ;;  %v3132_v62 = vadd.f32 %v3131_v41, %v3130_v43  ;;  %v3160_v2 = vadd.f32 %v3159_v60, %v3158_v17  ;;  %v6459_v49 = vld [vmem:[#allocation48_spill] sm:$0xff]  ;;  %v6460_v17 = vld [vmem:[#allocation47_spill] sm:$0xff] }
 0x5fd   :  { %v3188_v4 = vadd.f32 %v3187_v50, %v3013_v20  ;;  %v3166_v33 = vadd.f32 %v3165_v38, %v3164_v15  ;;  %v3172_v59 = vadd.f32 %v3171_v56, %v3170_v9  ;;  %v3177_v54 = vrot.slane %v3176_v3, 2 }
 0x5fe   :  { %v3155_v21 = vrot.slane %v3154_v40, 1  ;;  %v3138_v32 = vadd.f32 %v3137_v31, %v3136_v5  ;;  %v3144_v19 = vadd.f32 %v3143_v10, %v3142_v16  ;;  %v3590_v12 = vrot.slane %v6017_v34, %v5741_v37  ;;  %v6457_v10 = vld [vmem:[#allocation27_spill] sm:$0xff] }
 0x5ff   :  { %v3183_v51 = vrot.slane %v3182_v26, 2  ;;  %v3150_v44 = vadd.f32 %v3149_v7, %v3148_v8  ;;  %v3594_v23 = vrot.slane %v6031_v57, %v5741_v37  ;;  %v3189_v35 = vrot.slane %v3188_v4, 2 }
 0x600   :  { %v3194_v0 = vadd.f32 %v3193_v29, %v3014_v27  ;;  %v3518_v14 = vsel %vm2489_vm1, %v3120_v6, %v3517_v45  ;;  %v3525_v43 = vsel %vm2489_vm1, %v3126_v61, %v3524_v47  ;;  %v3505_v48 = vsel %vm2491_vm2, %v3132_v62, %v3504_v1  ;;  %v6463_v29 = vld [vmem:[#allocation50_spill] sm:$0xff]  ;;  %v6464_v62 = vld [vmem:[#allocation49_spill] sm:$0xff] }
 0x601   :  { %v3161_v52 = vrot.slane %v3160_v2, 1  ;;  %v3156_v46 = vadd.f32 %v3155_v21, %v3154_v40  ;;  %v3167_v5 = vrot.slane %v3166_v33, 1  ;;  %v3173_v16 = vrot.slane %v3172_v59, 1  ;;  %v6462_v40 = vld [vmem:[#allocation28_spill] sm:$0xff] }
 0x602   :  { %v3178_v41 = vadd.f32 %v3177_v54, %v3176_v3  ;;  %v3512_v34 = vsel %vm2491_vm2, %v3138_v32, %v3511_v25  ;;  %v3519_v8 = vsel %vm2491_vm2, %v3144_v19, %v3518_v14  ;;  %v3641_v57 = vsel %vm2491_vm2, %v3590_v12, %v6046_v53 }
 0x603   :  { %v3184_v36 = vadd.f32 %v3183_v51, %v3182_v26  ;;  %v3526_v45 = vsel %vm2491_vm2, %v3150_v44, %v3525_v43  ;;  %v6081_v47 = vsel %vm2493_vm3, %v3594_v23, %v3641_v57  ;;  %v3190_v6 = vadd.f32 %v3189_v35, %v3188_v4 }
 0x604   :  { %v3195_v61 = vrot.slane %v3194_v0, 2  ;;  %v3162_v1 = vadd.f32 %v3161_v52, %v3160_v2  ;;  %v6089_v13 = vpop.permute.xlu1 %2958  ;;  %v3168_v53 = vadd.f32 %v3167_v5, %v3166_v33  ;;  %v3174_v39 = vadd.f32 %v3173_v16, %v3172_v59 }
 0x605   :  { %v6073_v31 = vpop.permute.xlu0 %2953  ;;  %v3506_v55 = vsel %vm2493_vm3, %v3156_v46, %v3505_v48  ;;  %v3179_v20 = vrot.slane %v3178_v41, 1  ;;  %v3185_v7 = vrot.slane %v3184_v36, 1  ;;  %v3191_v42 = vrot.slane %v3190_v6, 1 }
 0x606   :  { %v3023_v58 = vmul.f32 %v6073_v31, %v6457_v10  ;;  %v3024_v18 = vmul.f32 %v6073_v31, %v6458_v24  ;;  %v3025_v28 = vmul.f32 %v6073_v31, %v6459_v49  ;;  %v3026_v15 = vmul.f32 %v6073_v31, %v6460_v17  ;;  %v6465_v17 = vld [vmem:[#allocation23_spill] sm:$0xff] }
 0x607   :  { %v3196_v27 = vadd.f32 %v3195_v61, %v3194_v0  ;;  %v3027_v60 = vmul.f32 %v6089_v13, %v6461_v30  ;;  %v3028_v3 = vmul.f32 %v6089_v13, %v6462_v40  ;;  %v3029_v25 = vmul.f32 %v6089_v13, %v6463_v29  ;;  %v6468_v30 = vld [vmem:[#allocation43_spill] sm:$0xff] }
 0x608   :  { %v3247_v9 = vrot.slane %v3023_v58, 4  ;;  %v3253_v11 = vrot.slane %v3024_v18, 4  ;;  %v3259_v22 = vrot.slane %v3025_v28, 4  ;;  %v3265_v50 = vrot.slane %v3026_v15, 4  ;;  %v6131_v40 = vpop.permute.xlu1 %2963 }
 0x609   :  { %v3030_v2 = vmul.f32 %v6089_v13, %v6464_v62  ;;  %v3271_v4 = vrot.slane %v3027_v60, 4  ;;  %v3277_v54 = vrot.slane %v3028_v3, 4  ;;  %v3283_v12 = vrot.slane %v3029_v25, 4  ;;  %v6108_v24 = vpop.permute.xlu0 %2943 }
 0x60a   :  { %v3248_v38 = vadd.f32 %v3247_v9, %v3023_v58  ;;  %v3254_v56 = vadd.f32 %v3253_v11, %v3024_v18  ;;  %v3260_v26 = vadd.f32 %v3259_v22, %v3025_v28  ;;  %v3266_v59 = vadd.f32 %v3265_v50, %v3026_v15  ;;  %v6466_v9 = vld [vmem:[#allocation22_spill] sm:$0xff] }
 0x60b   :  { %v3272_v19 = vadd.f32 %v3271_v4, %v3027_v60  ;;  %v3289_v51 = vrot.slane %v3030_v2, 4  ;;  %v3180_v44 = vadd.f32 %v3179_v20, %v3178_v41  ;;  %v3197_v23 = vrot.slane %v3196_v27, 1 }
 0x60c   :  { %v3249_v21 = vrot.slane %v3248_v38, 2  ;;  %v3255_v33 = vrot.slane %v3254_v56, 2  ;;  %v3261_v32 = vrot.slane %v3260_v26, 2  ;;  %v3278_v0 = vadd.f32 %v3277_v54, %v3028_v3  ;;  %v6469_v54 = vld [vmem:[#allocation31_spill] sm:$0xff] }
 0x60d   :  { %v3267_v48 = vrot.slane %v3266_v59, 2  ;;  %v3284_v52 = vadd.f32 %v3283_v12, %v3029_v25  ;;  %v3513_v46 = vsel %vm2493_vm3, %v3162_v1, %v3512_v34  ;;  %v3186_v5 = vadd.f32 %v3185_v7, %v3184_v36  ;;  %v6470_v12 = vld [vmem:[#allocation30_spill] sm:$0xff] }
 0x60e   :  { %v3250_v35 = vadd.f32 %v3249_v21, %v3248_v38  ;;  %v3256_v14 = vadd.f32 %v3255_v33, %v3254_v56  ;;  %v3262_v43 = vadd.f32 %v3261_v32, %v3260_v26  ;;  %v3598_v16 = vrot.slane %v6054_v63, %v5741_v37 }
 0x60f   :  { %v3273_v57 = vrot.slane %v3272_v19, 2  ;;  %v6106_v61 = vsel %vm2493_vm3, %v3168_v53, %v3519_v8  ;;  %v3279_v10 = vrot.slane %v3278_v0, 2  ;;  %v3285_v58 = vrot.slane %v3284_v52, 2 }
 0x610   :  { %v3290_v41 = vadd.f32 %v3289_v51, %v3030_v2  ;;  %v3527_v18 = vsel %vm2493_vm3, %v3174_v39, %v3526_v45  ;;  %v3192_v49 = vadd.f32 %v3191_v42, %v3190_v6  ;;  %v3198_v28 = vadd.f32 %v3197_v23, %v3196_v27  ;;  %v6467_v27 = vld [vmem:[#allocation44_spill] sm:$0xff] }
 0x611   :  { %v3251_v20 = vrot.slane %v3250_v35, 1  ;;  %v6112_v34 = vsel %vm2495_vm4, %v3180_v44, %v3506_v55  ;;  %v3257_v36 = vrot.slane %v3256_v14, 1  ;;  %v3263_v1 = vrot.slane %v3262_v43, 1  ;;  %v6471_v44 = vld [vmem:[#allocation52_spill] sm:$0xff] }
 0x612   :  { %v3268_v63 = vadd.f32 %v3267_v48, %v3266_v59  ;;  %v6115_v7 = vsel %vm2495_vm4, %v3186_v5, %v3513_v46  ;;  %v6119_v8 = vsel %vm2495_vm4, %v3598_v16, %v6081_v47  ;;  %v3274_v53 = vadd.f32 %v3273_v57, %v3272_v19 }
 0x613   :  { %v3015_v45 = vmul.f32 %v6108_v24, %v6465_v17  ;;  %v3280_v6 = vadd.f32 %v3279_v10, %v3278_v0  ;;  %v3286_v39 = vadd.f32 %v3285_v58, %v3284_v52  ;;  %v3291_v15 = vrot.slane %v3290_v41, 2 }
 0x614   :  { %v3016_v55 = vmul.f32 %v6108_v24, %v6466_v9  ;;  %v3252_v11 = vadd.f32 %v3251_v20, %v3250_v35  ;;  %v3610_v42 = vrot.slane %v6073_v31, %v5741_v37  ;;  %v3017_v22 = vmul.f32 %v6108_v24, %v6467_v27  ;;  %v6472_v35 = vld [vmem:[#allocation51_spill] sm:$0xff] }
 0x615   :  { %v3018_v47 = vmul.f32 %v6108_v24, %v6468_v30  ;;  %v3258_v60 = vadd.f32 %v3257_v36, %v3256_v14  ;;  %v3264_v38 = vadd.f32 %v3263_v1, %v3262_v43  ;;  %v3269_v56 = vrot.slane %v3268_v63, 1  ;;  %v2949_v30 = vpop.permute.xlu0 %2948 }
 0x616   :  { %v3199_v50 = vrot.slane %v3015_v45, 4  ;;  %v3275_v3 = vrot.slane %v3274_v53, 1  ;;  %v3205_v26 = vrot.slane %v3016_v55, 4  ;;  %v3211_v29 = vrot.slane %v3017_v22, 4 }
 0x617   :  { %v3217_v25 = vrot.slane %v3018_v47, 4  ;;  %v3281_v62 = vrot.slane %v3280_v6, 1  ;;  %v3287_v2 = vrot.slane %v3286_v39, 1  ;;  %v3292_v4 = vadd.f32 %v3291_v15, %v3290_v41 }
 0x618   :  { %v3200_v31 = vadd.f32 %v3199_v50, %v3015_v45  ;;  %v3206_v21 = vadd.f32 %v3205_v26, %v3016_v55  ;;  %v3212_v33 = vadd.f32 %v3211_v29, %v3017_v22  ;;  %v3031_v32 = vmul.f32 %v6131_v40, %v6469_v54  ;;  %v6474_v26 = vld [vmem:[#allocation24_spill] sm:$0xff] }
 0x619   :  { %v3218_v59 = vadd.f32 %v3217_v25, %v3018_v47  ;;  %v3032_v51 = vmul.f32 %v6131_v40, %v6470_v12  ;;  %v3033_v23 = vmul.f32 %v6131_v40, %v6471_v44  ;;  %v3034_v0 = vmul.f32 %v6131_v40, %v6472_v35  ;;  %v6475_v25 = vld [vmem:[#allocation46_spill] sm:$0xff] }
 0x61a   :  { %v3201_v19 = vrot.slane %v3200_v31, 2  ;;  %v3207_v14 = vrot.slane %v3206_v21, 2  ;;  %v3213_v43 = vrot.slane %v3212_v33, 2  ;;  %v3295_v52 = vrot.slane %v3031_v32, 4 }
 0x61b   :  { %v3219_v48 = vrot.slane %v3218_v59, 2  ;;  %v3614_v46 = vrot.slane %v6089_v13, %v5741_v37  ;;  %v3301_v5 = vrot.slane %v3032_v51, 4  ;;  %v3307_v16 = vrot.slane %v3033_v23, 4 }
 0x61c   :  { %v3313_v57 = vrot.slane %v3034_v0, 4  ;;  %v3276_v10 = vadd.f32 %v3275_v3, %v3274_v53  ;;  %v3282_v58 = vadd.f32 %v3281_v62, %v3280_v6  ;;  %v3293_v41 = vrot.slane %v3292_v4, 1 }
 0x61d   :  { %v3202_v20 = vadd.f32 %v3201_v19, %v3200_v31  ;;  %v3288_v36 = vadd.f32 %v3287_v2, %v3286_v39  ;;  %v3208_v1 = vadd.f32 %v3207_v14, %v3206_v21  ;;  %v3214_v17 = vadd.f32 %v3213_v43, %v3212_v33  ;;  %v6476_v21 = vld [vmem:[#allocation45_spill] sm:$0xff] }
 0x61e   :  { %v3220_v45 = vadd.f32 %v3219_v48, %v3218_v59  ;;  %v3521_v15 = vsel %vm2495_vm4, %v3192_v49, %v6106_v61  ;;  %v3528_v9 = vsel %vm2495_vm4, %v3198_v28, %v3527_v18  ;;  %v6146_v55 = vadd.f32 %v3269_v56, %v3268_v63  ;;  %v6473_v56 = vld [vmem:[#allocation25_spill] sm:$0xff] }
 0x61f   :  { %v3296_v27 = vadd.f32 %v3295_v52, %v3031_v32  ;;  %v6149_v13 = vsel %vm2487_vm0, %v3614_v46, %v3610_v42  ;;  %v3302_v22 = vadd.f32 %v3301_v5, %v3032_v51  ;;  %v3308_v53 = vadd.f32 %v3307_v16, %v3033_v23  ;;  %v6178_v16 = vpop.permute.xlu1 %2968 }
 0x620   :  { %v3314_v6 = vadd.f32 %v3313_v57, %v3034_v0  ;;  %v6151_v47 = vadd.f32 %v3293_v41, %v3292_v4  ;;  %v6154_v39 = vsel %vm2487_vm0, %v3276_v10, %v3252_v11  ;;  %v6157_v50 = vsel %vm2487_vm0, %v3282_v58, %v3258_v60 }
 0x621   :  { %v3203_v61 = vrot.slane %v3202_v20, 1  ;;  %v6160_v18 = vsel %vm2487_vm0, %v3288_v36, %v3264_v38  ;;  %v3209_v49 = vrot.slane %v3208_v1, 1  ;;  %v3215_v28 = vrot.slane %v3214_v17, 1 }
 0x622   :  { %v3221_v63 = vrot.slane %v3220_v45, 1  ;;  %v3297_v42 = vrot.slane %v3296_v27, 2  ;;  %v3019_v3 = vmul.f32 %v2949_v30, %v6473_v56  ;;  %v3020_v29 = vmul.f32 %v2949_v30, %v6474_v26 }
 0x623   :  { %v3021_v62 = vmul.f32 %v2949_v30, %v6475_v25  ;;  %v3602_v11 = vrot.slane %v6108_v24, %v5741_v37  ;;  %v3303_v2 = vrot.slane %v3302_v22, 2  ;;  %v3309_v60 = vrot.slane %v3308_v53, 2 }
 0x624   :  { %v3315_v4 = vrot.slane %v3314_v6, 2  ;;  %v3204_v31 = vadd.f32 %v3203_v61, %v3202_v20  ;;  %v3022_v38 = vmul.f32 %v2949_v30, %v6476_v21  ;;  %v3223_v33 = vrot.slane %v3019_v3, 4 }
 0x625   :  { %v3229_v59 = vrot.slane %v3020_v29, 4  ;;  %v3210_v54 = vadd.f32 %v3209_v49, %v3208_v1  ;;  %v3216_v32 = vadd.f32 %v3215_v28, %v3214_v17  ;;  %v3222_v19 = vadd.f32 %v3221_v63, %v3220_v45  ;;  %v6480_v28 = vld [vmem:[#allocation53_spill] sm:$0xff] }
 0x626   :  { %v3235_v12 = vrot.slane %v3021_v62, 4  ;;  %v6168_v51 = vadd.f32 %v3297_v42, %v3296_v27  ;;  %v3224_v44 = vadd.f32 %v3223_v33, %v3019_v3  ;;  %v3241_v35 = vrot.slane %v3022_v38, 4 }
 0x627   :  { %v3230_v23 = vadd.f32 %v3229_v59, %v3020_v29  ;;  %v6170_v0 = vadd.f32 %v3303_v2, %v3302_v22  ;;  %v6172_v24 = vadd.f32 %v3309_v60, %v3308_v53  ;;  %v6174_v14 = vadd.f32 %v3315_v4, %v3314_v6  ;;  %v6478_v53 = vld [vmem:[#allocation32_spill] sm:$0xff]  ;;  %v6200_v60 = vpop.permute.xlu1 %2973 }
 0x628   :  { %v3236_v43 = vadd.f32 %v3235_v12, %v3021_v62  ;;  %v3225_v48 = vrot.slane %v3224_v44, 2  ;;  %v3242_v46 = vadd.f32 %v3241_v35, %v3022_v38  ;;  %v3508_v5 = vsel %vm2497_vm5, %v3204_v31, %v6112_v34  ;;  %v6477_v34 = vld [vmem:[#allocation33_spill] sm:$0xff] }
 0x629   :  { %v3231_v52 = vrot.slane %v3230_v23, 2  ;;  %v3515_v10 = vsel %vm2497_vm5, %v3210_v54, %v6115_v7  ;;  %v3522_v58 = vsel %vm2497_vm5, %v3216_v32, %v3521_v15  ;;  %v3529_v41 = vsel %vm2497_vm5, %v3222_v19, %v3528_v9 }
 0x62a   :  { %v3237_v57 = vrot.slane %v3236_v43, 2  ;;  %v3226_v20 = vadd.f32 %v3225_v48, %v3224_v44  ;;  %v3243_v1 = vrot.slane %v3242_v46, 2  ;;  %v3606_v17 = vrot.slane %v2949_v30, %v5741_v37  ;;  %v6479_v30 = vld [vmem:[#allocation54_spill] sm:$0xff] }
 0x62b   :  { %v3232_v36 = vadd.f32 %v3231_v52, %v3230_v23  ;;  %v3644_v27 = vsel %vm2497_vm5, %v3602_v11, %v6119_v8  ;;  %v3035_v22 = vmul.f32 %v6178_v16, %v6477_v34  ;;  %v3036_v6 = vmul.f32 %v6178_v16, %v6478_v53  ;;  %v6481_v23 = vld [vmem:[#allocation35_spill] sm:$0xff] }
 0x62c   :  { %v3238_v45 = vadd.f32 %v3237_v57, %v3236_v43  ;;  %v3227_v7 = vrot.slane %v3226_v20, 1  ;;  %v3244_v15 = vadd.f32 %v3243_v1, %v3242_v46  ;;  %v3645_v9 = vsel %vm2499_vm6, %v3606_v17, %v3644_v27  ;;  %v6482_v46 = vld [vmem:[#allocation34_spill] sm:$0xff] }
 0x62d   :  { %v3233_v61 = vrot.slane %v3232_v36, 1  ;;  %3655 = vst.msk [vmem:[%s6330_s8] sm:$0xff] %vm2510_vm7, %v3645_v9  ;;  %v3037_v8 = vmul.f32 %v6178_v16, %v6479_v30  ;;  %v3038_v63 = vmul.f32 %v6178_v16, %v6480_v28  ;;  %v3319_v42 = vrot.slane %v3035_v22, 4 }
 0x62e   :  { %v3239_v49 = vrot.slane %v3238_v45, 1  ;;  %v3228_v56 = vadd.f32 %v3227_v7, %v3226_v20  ;;  %v3245_v26 = vrot.slane %v3244_v15, 1  ;;  %v3325_v29 = vrot.slane %v3036_v6, 4  ;;  %v6484_v20 = vld [vmem:[#allocation55_spill] sm:$0xff] }
 0x62f   :  { %v3234_v3 = vadd.f32 %v3233_v61, %v3232_v36  ;;  %v3320_v62 = vadd.f32 %v3319_v42, %v3035_v22  ;;  %v3331_v11 = vrot.slane %v3037_v8, 4  ;;  %v3337_v2 = vrot.slane %v3038_v63, 4 }
 0x630   :  { %v3240_v25 = vadd.f32 %v3239_v49, %v3238_v45  ;;  %v3246_v4 = vadd.f32 %v3245_v26, %v3244_v15  ;;  %v3509_v31 = vsel %vm2499_vm6, %v3228_v56, %v3508_v5  ;;  %v3326_v38 = vadd.f32 %v3325_v29, %v3036_v6 }
 0x631   :  { %v3516_v21 = vsel %vm2499_vm6, %v3234_v3, %v3515_v10  ;;  %3567 = vst [vmem:[%s6329_s7] sm:$0xff] %v3509_v31  ;;  %v3321_v59 = vrot.slane %v3320_v62, 2  ;;  %v3332_v54 = vadd.f32 %v3331_v11, %v3037_v8  ;;  %v3338_v32 = vadd.f32 %v3337_v2, %v3038_v63  ;;  %v6239_v3 = vpop.permute.xlu1 %2978 }
 0x632   :  { %v3523_v33 = vsel %vm2499_vm6, %v3240_v25, %v3522_v58  ;;  %3568 = vst [vmem:[%s6329_s7 + $0x8] sm:$0xff] %v3516_v21  ;;  %v3299_v19 = vrot.slane %v6168_v51, 1  ;;  %v3530_v12 = vsel %vm2499_vm6, %v3246_v4, %v3529_v41  ;;  %v3327_v44 = vrot.slane %v3326_v38, 2  ;;  %v6483_v58 = vld [vmem:[#allocation56_spill] sm:$0xff]  ;;  %v6485_v4 = vld [vmem:[#allocation37_spill] sm:$0xff] }
 0x633   :  { %3569 = vst [vmem:[%s6329_s7 + $0x10] sm:$0xff] %v3523_v33  ;;  %v3039_v35 = vmul.f32 %v6200_v60, %v6481_v23  ;;  %v3305_v43 = vrot.slane %v6170_v0, 1  ;;  %3570 = vst [vmem:[%s6329_s7 + $0x18] sm:$0xff] %v3530_v12  ;;  %v3333_v48 = vrot.slane %v3332_v54, 2  ;;  %v3339_v52 = vrot.slane %v3338_v32, 2  ;;  %v6487_v33 = vld [vmem:[#allocation58_spill] sm:$0xff] }
 0x634   :  { %v3040_v5 = vmul.f32 %v6200_v60, %v6482_v46  ;;  %v3322_v57 = vadd.f32 %v3321_v59, %v3320_v62  ;;  %v3328_v10 = vadd.f32 %v3327_v44, %v3326_v38  ;;  %v3041_v41 = vmul.f32 %v6200_v60, %v6483_v58  ;;  %v6486_v38 = vld [vmem:[#allocation36_spill] sm:$0xff] }
 0x635   :  { %v3042_v36 = vmul.f32 %v6200_v60, %v6484_v20  ;;  %v3311_v1 = vrot.slane %v6172_v24, 1  ;;  %v3618_v17 = vrot.slane %v6131_v40, %v5741_v37  ;;  %v3334_v45 = vadd.f32 %v3333_v48, %v3332_v54  ;;  %v6261_v58 = vpop.permute.xlu1 %2983 }
 0x636   :  { %v3343_v27 = vrot.slane %v3039_v35, 4  ;;  %v3340_v34 = vadd.f32 %v3339_v52, %v3338_v32  ;;  %v3349_v22 = vrot.slane %v3040_v5, 4  ;;  %v3355_v53 = vrot.slane %v3041_v41, 4  ;;  %v6488_v32 = vld [vmem:[#allocation57_spill] sm:$0xff] }
 0x637   :  { %v3361_v6 = vrot.slane %v3042_v36, 4  ;;  %v3300_v7 = vadd.f32 %v3299_v19, %v6168_v51  ;;  %v3306_v61 = vadd.f32 %v3305_v43, %v6170_v0  ;;  %v3317_v15 = vrot.slane %v6174_v14, 1 }
 0x638   :  { %v3344_v9 = vadd.f32 %v3343_v27, %v3039_v35  ;;  %v3323_v49 = vrot.slane %v3322_v57, 1  ;;  %v3329_v30 = vrot.slane %v3328_v10, 1  ;;  %v3350_v8 = vadd.f32 %v3349_v22, %v3040_v5  ;;  %v6489_v22 = vld [vmem:[#allocation39_spill] sm:$0xff] }
 0x639   :  { %v3356_v28 = vadd.f32 %v3355_v53, %v3041_v41  ;;  %v3552_v40 = vsel %vm2487_vm0, %v6151_v47, %v6146_v55  ;;  %v3647_v63 = vsel %vm2489_vm1, %v3618_v17, %v6149_v13  ;;  %v3362_v56 = vadd.f32 %v3361_v6, %v3042_v36  ;;  %v6490_v6 = vld [vmem:[#allocation38_spill] sm:$0xff] }
 0x63a   :  { %v3345_v42 = vrot.slane %v3344_v9, 2  ;;  %v3312_v51 = vadd.f32 %v3311_v1, %v6172_v24  ;;  %v3335_v0 = vrot.slane %v3334_v45, 1  ;;  %v3341_v26 = vrot.slane %v3340_v34, 1 }
 0x63b   :  { %v3351_v29 = vrot.slane %v3350_v8, 2  ;;  %v3318_v25 = vadd.f32 %v3317_v15, %v6174_v14  ;;  %v3532_v62 = vsel %vm2489_vm1, %v3300_v7, %v6154_v39  ;;  %v3539_v55 = vsel %vm2489_vm1, %v3306_v61, %v6157_v50  ;;  %v6491_v61 = vld [vmem:[#allocation60_spill] sm:$0xff] }
 0x63c   :  { %v3357_v47 = vrot.slane %v3356_v28, 2  ;;  %v3324_v11 = vadd.f32 %v3323_v49, %v3322_v57  ;;  %v3330_v13 = vadd.f32 %v3329_v30, %v3328_v10  ;;  %v3622_v2 = vrot.slane %v6178_v16, %v5741_v37 }
 0x63d   :  { %v3043_v24 = vmul.f32 %v6239_v3, %v6485_v4  ;;  %v3346_v31 = vadd.f32 %v3345_v42, %v3344_v9  ;;  %v3363_v21 = vrot.slane %v3362_v56, 2  ;;  %v3044_v14 = vmul.f32 %v6239_v3, %v6486_v38  ;;  %v2989_v38 = vpop.permute.xlu1 %2988 }
 0x63e   :  { %v3045_v39 = vmul.f32 %v6239_v3, %v6487_v33  ;;  %v3336_v59 = vadd.f32 %v3335_v0, %v3334_v45  ;;  %v3342_v54 = vadd.f32 %v3341_v26, %v3340_v34  ;;  %v3352_v50 = vadd.f32 %v3351_v29, %v3350_v8 }
 0x63f   :  { %v3046_v19 = vmul.f32 %v6239_v3, %v6488_v32  ;;  %v3358_v12 = vadd.f32 %v3357_v47, %v3356_v28  ;;  %v3367_v44 = vrot.slane %v3043_v24, 4  ;;  %v3373_v16 = vrot.slane %v3044_v14, 4 }
 0x640   :  { %v3379_v23 = vrot.slane %v3045_v39, 4  ;;  %v3546_v35 = vsel %vm2489_vm1, %v3312_v51, %v6160_v18  ;;  %v3553_v43 = vsel %vm2489_vm1, %v3318_v25, %v3552_v40  ;;  %v3648_v48 = vsel %vm2491_vm2, %v3622_v2, %v3647_v63  ;;  %v6492_v40 = vld [vmem:[#allocation59_spill] sm:$0xff] }
 0x641   :  { %v3385_v52 = vrot.slane %v3046_v19, 4  ;;  %v3347_v46 = vrot.slane %v3346_v31, 1  ;;  %v3364_v5 = vadd.f32 %v3363_v21, %v3362_v56  ;;  %v3368_v57 = vadd.f32 %v3367_v44, %v3043_v24  ;;  %v6493_v44 = vld [vmem:[#allocation41_spill] sm:$0xff] }
 0x642   :  { %v3374_v10 = vadd.f32 %v3373_v16, %v3044_v14  ;;  %v3533_v41 = vsel %vm2491_vm2, %v3324_v11, %v3532_v62  ;;  %v3540_v20 = vsel %vm2491_vm2, %v3330_v13, %v3539_v55  ;;  %v3547_v36 = vsel %vm2491_vm2, %v3336_v59, %v3546_v35 }
 0x643   :  { %v3380_v1 = vadd.f32 %v3379_v23, %v3045_v39  ;;  %v3554_v18 = vsel %vm2491_vm2, %v3342_v54, %v3553_v43  ;;  %v3353_v17 = vrot.slane %v3352_v50, 1  ;;  %v3359_v45 = vrot.slane %v3358_v12, 1  ;;  %v6494_v23 = vld [vmem:[#allocation40_spill] sm:$0xff] }
 0x644   :  { %v3386_v27 = vadd.f32 %v3385_v52, %v3046_v19  ;;  %v3369_v34 = vrot.slane %v3368_v57, 2  ;;  %v3047_v53 = vmul.f32 %v6261_v58, %v6489_v22  ;;  %v3048_v7 = vmul.f32 %v6261_v58, %v6490_v6 }
 0x645   :  { %v3049_v15 = vmul.f32 %v6261_v58, %v6491_v61  ;;  %v3348_v9 = vadd.f32 %v3347_v46, %v3346_v31  ;;  %v3365_v49 = vrot.slane %v3364_v5, 1  ;;  %v3626_v30 = vrot.slane %v6200_v60, %v5741_v37  ;;  %v6495_v46 = vld [vmem:[#allocation62_spill] sm:$0xff] }
 0x646   :  { %v3375_v8 = vrot.slane %v3374_v10, 2  ;;  %v3381_v28 = vrot.slane %v3380_v1, 2  ;;  %v3050_v63 = vmul.f32 %v6261_v58, %v6492_v40  ;;  %v3391_v42 = vrot.slane %v3047_v53, 4 }
 0x647   :  { %v3397_v56 = vrot.slane %v3048_v7, 4  ;;  %v3354_v51 = vadd.f32 %v3353_v17, %v3352_v50  ;;  %v3360_v0 = vadd.f32 %v3359_v45, %v3358_v12  ;;  %v3387_v26 = vrot.slane %v3386_v27, 2 }
 0x648   :  { %v3403_v29 = vrot.slane %v3049_v15, 4  ;;  %v3370_v25 = vadd.f32 %v3369_v34, %v3368_v57  ;;  %v3392_v62 = vadd.f32 %v3391_v42, %v3047_v53  ;;  %v3409_v47 = vrot.slane %v3050_v63, 4 }
 0x649   :  { %v3398_v55 = vadd.f32 %v3397_v56, %v3048_v7  ;;  %v3366_v11 = vadd.f32 %v3365_v49, %v3364_v5  ;;  %v3649_v13 = vsel %vm2493_vm3, %v3626_v30, %v3648_v48  ;;  %v3630_v60 = vrot.slane %v6239_v3, %v5741_v37 }
 0x64a   :  { %v3404_v2 = vadd.f32 %v3403_v29, %v3049_v15  ;;  %v3376_v4 = vadd.f32 %v3375_v8, %v3374_v10  ;;  %v3382_v24 = vadd.f32 %v3381_v28, %v3380_v1  ;;  %v3393_v31 = vrot.slane %v3392_v62, 2 }
 0x64b   :  { %v3410_v21 = vadd.f32 %v3409_v47, %v3050_v63  ;;  %v3534_v14 = vsel %vm2493_vm3, %v3348_v9, %v3533_v41  ;;  %v3541_v33 = vsel %vm2493_vm3, %v3354_v51, %v3540_v20  ;;  %v3388_v39 = vadd.f32 %v3387_v26, %v3386_v27  ;;  %v6496_v41 = vld [vmem:[#allocation61_spill] sm:$0xff] }
 0x64c   :  { %v3399_v59 = vrot.slane %v3398_v55, 2  ;;  %v3548_v54 = vsel %vm2493_vm3, %v3360_v0, %v3547_v36  ;;  %v3371_v50 = vrot.slane %v3370_v25, 1  ;;  %v3405_v32 = vrot.slane %v3404_v2, 2 }
 0x64d   :  { %v3411_v19 = vrot.slane %v3410_v21, 2  ;;  %v3555_v12 = vsel %vm2493_vm3, %v3366_v11, %v3554_v18  ;;  %v3650_v3 = vsel %vm2495_vm4, %v3630_v60, %v3649_v13  ;;  %v3051_v16 = vmul.f32 %v2989_v38, %v6493_v44 }
 0x64e   :  { %v3052_v35 = vmul.f32 %v2989_v38, %v6494_v23  ;;  %v3377_v43 = vrot.slane %v3376_v4, 1  ;;  %v3383_v48 = vrot.slane %v3382_v24, 1  ;;  %v3394_v52 = vadd.f32 %v3393_v31, %v3392_v62 }
 0x64f   :  { %v3053_v5 = vmul.f32 %v2989_v38, %v6495_v46  ;;  %v3389_v57 = vrot.slane %v3388_v39, 1  ;;  %v3400_v10 = vadd.f32 %v3399_v59, %v3398_v55  ;;  %v3054_v20 = vmul.f32 %v2989_v38, %v6496_v41 }
 0x650   :  { %v3415_v36 = vrot.slane %v3051_v16, 4  ;;  %v3372_v1 = vadd.f32 %v3371_v50, %v3370_v25  ;;  %v3406_v17 = vadd.f32 %v3405_v32, %v3404_v2  ;;  %v3412_v45 = vadd.f32 %v3411_v19, %v3410_v21 }
 0x651   :  { %v3421_v18 = vrot.slane %v3052_v35, 4  ;;  %v3634_v27 = vrot.slane %v6261_v58, %v5741_v37  ;;  %v3427_v22 = vrot.slane %v3053_v5, 4  ;;  %v3433_v53 = vrot.slane %v3054_v20, 4 }
 0x652   :  { %v3416_v34 = vadd.f32 %v3415_v36, %v3051_v16  ;;  %v3378_v6 = vadd.f32 %v3377_v43, %v3376_v4  ;;  %v3384_v7 = vadd.f32 %v3383_v48, %v3382_v24  ;;  %v3395_v61 = vrot.slane %v3394_v52, 1 }
 0x653   :  { %v3422_v15 = vadd.f32 %v3421_v18, %v3052_v35  ;;  %v3401_v9 = vrot.slane %v3400_v10, 1  ;;  %v3428_v30 = vadd.f32 %v3427_v22, %v3053_v5  ;;  %v3434_v8 = vadd.f32 %v3433_v53, %v3054_v20 }
 0x654   :  { %v3417_v49 = vrot.slane %v3416_v34, 2  ;;  %v3407_v28 = vrot.slane %v3406_v17, 1  ;;  %v3413_v40 = vrot.slane %v3412_v45, 1  ;;  %v3638_v42 = vrot.slane %v2989_v38, %v5741_v37 }
 0x655   :  { %v3423_v63 = vrot.slane %v3422_v15, 2  ;;  %v3651_v56 = vsel %vm2497_vm5, %v3634_v27, %v3650_v3  ;;  %v3429_v58 = vrot.slane %v3428_v30, 2  ;;  %v3435_v0 = vrot.slane %v3434_v8, 2 }
 0x656   :  { %v3418_v51 = vadd.f32 %v3417_v49, %v3416_v34  ;;  %v3390_v26 = vadd.f32 %v3389_v57, %v3388_v39  ;;  %v3396_v29 = vadd.f32 %v3395_v61, %v3394_v52  ;;  %v3652_v62 = vsel %vm2499_vm6, %v3638_v42, %v3651_v56 }
 0x657   :  { %v3424_v25 = vadd.f32 %v3423_v63, %v3422_v15  ;;  %v3402_v55 = vadd.f32 %v3401_v9, %v3400_v10  ;;  %v3430_v11 = vadd.f32 %v3429_v58, %v3428_v30  ;;  %v3436_v13 = vadd.f32 %v3435_v0, %v3434_v8  ;;  %3656 = vst.msk [vmem:[%s6330_s8 + $0x8] sm:$0xff] %vm2510_vm7, %v3652_v62 }
 0x658   :  { %v3419_v47 = vrot.slane %v3418_v51, 1  ;;  %v3535_v37 = vsel %vm2495_vm4, %v3372_v1, %v3534_v14  ;;  %v3408_v60 = vadd.f32 %v3407_v28, %v3406_v17  ;;  %v3414_v2 = vadd.f32 %v3413_v40, %v3412_v45 }
 0x659   :  { %v3425_v4 = vrot.slane %v3424_v25, 1  ;;  %v3542_v24 = vsel %vm2495_vm4, %v3378_v6, %v3541_v33  ;;  %v3431_v21 = vrot.slane %v3430_v11, 1  ;;  %v3437_v38 = vrot.slane %v3436_v13, 1 }
 0x65a   :  { %v3420_v31 = vadd.f32 %v3419_v47, %v3418_v51  ;;  %v3549_v39 = vsel %vm2495_vm4, %v3384_v7, %v3548_v54  ;;  %v3556_v59 = vsel %vm2495_vm4, %v3390_v26, %v3555_v12  ;;  %v3536_v50 = vsel %vm2497_vm5, %v3396_v29, %v3535_v37 }
 0x65b   :  { %v3426_v32 = vadd.f32 %v3425_v4, %v3424_v25  ;;  %v3543_v19 = vsel %vm2497_vm5, %v3402_v55, %v3542_v24  ;;  %v3432_v3 = vadd.f32 %v3431_v21, %v3430_v11  ;;  %v3438_v44 = vadd.f32 %v3437_v38, %v3436_v13 }
 0x65c   :  { %v3537_v14 = vsel %vm2499_vm6, %v3420_v31, %v3536_v50  ;;  %v3550_v16 = vsel %vm2497_vm5, %v3408_v60, %v3549_v39  ;;  %v3557_v33 = vsel %vm2497_vm5, %v3414_v2, %v3556_v59 }
 0x65d   :  { %v3544_v23 = vsel %vm2499_vm6, %v3426_v32, %v3543_v19  ;;  %3571 = vst [vmem:[%s6329_s7 + $0x20] sm:$0xff] %v3537_v14  ;;  %v3551_v54 = vsel %vm2499_vm6, %v3432_v3, %v3550_v16  ;;  %v3558_v12 = vsel %vm2499_vm6, %v3438_v44, %v3557_v33 }
 0x65e   :  { %3572 = vst [vmem:[%s6329_s7 + $0x28] sm:$0xff] %v3544_v23  ;;  %3573 = vst [vmem:[%s6329_s7 + $0x30] sm:$0xff] %v3551_v54 }
 0x65f   :  { %3574 = vst [vmem:[%s6329_s7 + $0x38] sm:$0xff] %v3558_v12 }
 0x660   :  { %3671 = vsyncpa [#allocation4], 1 }
 0x661   :  { %3672 = vsyncpa [#allocation6], 1 }

</bundles_post_ra>
